<compile_context>
chip_gen: v5e
topology: v5e:2x2
jax: 0.10.0
libtpu: 0.0.40
codegen_flags: <defaults>
</compile_context>

<pallas_src>
import functools

import jax
import jax.numpy as jnp
import numpy as np
from jax.experimental import pallas as pl
from jax.experimental.pallas import tpu as pltpu


# ----------------------------------------------------------------------------
# Fused Pallas kernel (one batch element per grid step)
# ----------------------------------------------------------------------------
def _msr_block_kernel(xpf_ref, mask_ref, w1_ref, b1_ref, w2_ref, b2_ref,
                      wc_ref, bc_ref, o_ref, *, shifts):
    """Whole MSRBlock on one image, in (channels, padded-flat-spatial) layout.

    xpf_ref : (1, C, Pp)   zero-padded, flattened, lane-padded input
    mask_ref: (1, Pp)      1.0 on interior pixels, 0.0 on halo / lane padding
    w1_ref  : (2C, 25*C)   fused [conv_3_1 (zero-embedded in 5x5) ; conv_5_1]
    b1_ref  : (2C, 1)
    w2_ref  : (4C, 25*2C)  fused [conv_3_2 (zero-embedded in 5x5) ; conv_5_2]
    b2_ref  : (4C, 1)
    wc_ref  : (C, 4C)      confusion 1x1
    bc_ref  : (C, 1)
    o_ref   : (1, C, Pp)   output in the same padded-flat layout
    """
    mask = mask_ref[...]                      # (1, Pp)
    x = xpf_ref[0]                            # (C, Pp), halo lanes are zero

    def fused_conv(inp, w_ref, b_ref):
        # im2col via static lane rotations: tap (kh, kw) of output pixel q is
        # inp[:, q + d] with d = (kh-2)*Wp + (kw-2); roll(shift=-d) puts it at
        # lane q.  Halo lanes of the result are garbage and get masked later.
        cols = [inp if s == 0 else pltpu.roll(inp, shift=s, axis=1)
                for s in shifts]
        col = jnp.concatenate(cols, axis=0)   # (25*Cin, Pp)
        y = jnp.dot(w_ref[...], col, preferred_element_type=jnp.float32)
        return y + b_ref[...]

    # stage 1: conv_3_1 + conv_5_1 (fused), ReLU, re-zero halo
    in2 = mask * jnp.maximum(fused_conv(x, w1_ref, b1_ref), 0.0)      # (2C, Pp)
    # stage 2: conv_3_2 + conv_5_2 (fused), ReLU, re-zero halo
    in3 = mask * jnp.maximum(fused_conv(in2, w2_ref, b2_ref), 0.0)    # (4C, Pp)
    # confusion 1x1 + residual
    out = jnp.dot(wc_ref[...], in3, preferred_element_type=jnp.float32)
    out = out + bc_ref[...] + x
    o_ref[0] = out.astype(o_ref.dtype)


# ----------------------------------------------------------------------------
# Weight preparation helpers (host-side, traced once under jit)
# ----------------------------------------------------------------------------
def _embed_3x3_in_5x5(w3):
    """(Cout, Cin, 3, 3) -> (Cout, Cin, 5, 5), centered, zero elsewhere."""
    cout, cin = w3.shape[:2]
    return jnp.zeros((cout, cin, 5, 5), w3.dtype).at[:, :, 1:4, 1:4].set(w3)


def _flatten_conv_weight(w):
    """(Cout, Cin, K, K) -> (Cout, K*K*Cin) with row order (kh, kw, ci)."""
    cout, cin, K, _ = w.shape
    return jnp.transpose(w, (0, 2, 3, 1)).reshape(cout, K * K * cin)


# ----------------------------------------------------------------------------
# MSRBlock forward (NCHW in / NCHW out, PyTorch convention)
# ----------------------------------------------------------------------------
def msr_block_forward(x_nchw, params):
    N, C, H, W = x_nchw.shape
    K = 5                      # shared 5x5 halo for both branches
    p = K // 2
    Hp, Wp = H + 2 * p, W + 2 * p
    P = Hp * Wp
    P_pad = ((P + 127) // 128) * 128       # lane-align the flat spatial axis

    # --- fused weights --------------------------------------------------------
    w31, b31 = params["conv_3_1"]
    w51, b51 = params["conv_5_1"]
    w32, b32 = params["conv_3_2"]
    w52, b52 = params["conv_5_2"]
    wc, bc = params["confusion"]

    w1 = jnp.concatenate([_flatten_conv_weight(_embed_3x3_in_5x5(w31)),
                          _flatten_conv_weight(w51)], axis=0)    # (2C, 25C)
    b1 = jnp.concatenate([b31, b51]).reshape(-1, 1)              # (2C, 1)
    w2 = jnp.concatenate([_flatten_conv_weight(_embed_3x3_in_5x5(w32)),
                          _flatten_conv_weight(w52)], axis=0)    # (4C, 50C)
    b2 = jnp.concatenate([b32, b52]).reshape(-1, 1)              # (4C, 1)
    wcm = wc.reshape(wc.shape[0], wc.shape[1])                   # (C, 4C)
    bcm = bc.reshape(-1, 1)                                      # (C, 1)

    # --- padded-flat input + interior mask ------------------------------------
    xpad = jnp.pad(x_nchw, ((0, 0), (0, 0), (p, p), (p, p)))
    xflat = jnp.pad(xpad.reshape(N, C, P), ((0, 0), (0, 0), (0, P_pad - P)))

    mask2d = jnp.zeros((Hp, Wp), x_nchw.dtype).at[p:p + H, p:p + W].set(1.0)
    mask = jnp.pad(mask2d.reshape(1, P), ((0, 0), (0, P_pad - P)))

    # Lane shift per conv tap (kh, kw): output pixel q needs input lane q + d.
    shifts = tuple((-((kh - p) * Wp + (kw - p))) % P_pad
                   for kh in range(K) for kw in range(K))

    kernel = functools.partial(_msr_block_kernel, shifts=shifts)
    out_flat = pl.pallas_call(
        kernel,
        out_shape=jax.ShapeDtypeStruct((N, C, P_pad), x_nchw.dtype),
        grid=(N,),
        in_specs=[
            pl.BlockSpec((1, C, P_pad), lambda n: (n, 0, 0)),
            pl.BlockSpec((1, P_pad), lambda n: (0, 0)),
            pl.BlockSpec(w1.shape, lambda n: (0, 0)),
            pl.BlockSpec(b1.shape, lambda n: (0, 0)),
            pl.BlockSpec(w2.shape, lambda n: (0, 0)),
            pl.BlockSpec(b2.shape, lambda n: (0, 0)),
            pl.BlockSpec(wcm.shape, lambda n: (0, 0)),
            pl.BlockSpec(bcm.shape, lambda n: (0, 0)),
        ],
        out_specs=pl.BlockSpec((1, C, P_pad), lambda n: (n, 0, 0)),
        compiler_params=pltpu.CompilerParams(
            dimension_semantics=("parallel",)),
    )(xflat, mask, w1, b1, w2, b2, wcm, bcm)

    # Strip lane padding + halo (cheap XLA slice at the boundary).
    out = out_flat[:, :, :P].reshape(N, C, Hp, Wp)[:, :, p:p + H, p:p + W]
    return out


# ----------------------------------------------------------------------------
# Parameter init (PyTorch layout: weight (Cout, Cin, K, K), bias (Cout,))
# ----------------------------------------------------------------------------
def init_msr_params(key, n_feats, dtype=jnp.float32):
    def conv_params(k, K, cin, cout):
        kw_, kb_ = jax.random.split(k)
        bound = 1.0 / np.sqrt(cin * K * K)
        w = jax.random.uniform(kw_, (cout, cin, K, K), dtype, -bound, bound)
        b = jax.random.uniform(kb_, (cout,), dtype, -bound, bound)
        return w, b

    ks = jax.random.split(key, 5)
    return {
        "conv_3_1": conv_params(ks[0], 3, n_feats, n_feats),
        "conv_5_1": conv_params(ks[1], 5, n_feats, n_feats),
        "conv_3_2": conv_params(ks[2], 3, 2 * n_feats, 2 * n_feats),
        "conv_5_2": conv_params(ks[3], 5, 2 * n_feats, 2 * n_feats),
        "confusion": conv_params(ks[4], 1, 4 * n_feats, n_feats),
    }


# ----------------------------------------------------------------------------
# Pure-JAX reference (for correctness check)
# ----------------------------------------------------------------------------
def _ref_conv(x, w, b, relu):
    K = w.shape[-1]
    p = K // 2
    y = jax.lax.conv_general_dilated(
        x, w, window_strides=(1, 1), padding=[(p, p), (p, p)],
        dimension_numbers=("NCHW", "OIHW", "NCHW"))
    y = y + b[None, :, None, None]
    return jnp.maximum(y, 0.0) if relu else y


def msr_block_ref(x, params):
    o31 = _ref_conv(x, *params["conv_3_1"], True)
    o51 = _ref_conv(x, *params["conv_5_1"], True)
    i2 = jnp.concatenate([o31, o51], axis=1)
    o32 = _ref_conv(i2, *params["conv_3_2"], True)
    o52 = _ref_conv(i2, *params["conv_5_2"], True)
    i3 = jnp.concatenate([o32, o52], axis=1)
    return _ref_conv(i3, *params["confusion"], False) + x


# ----------------------------------------------------------------------------
if __name__ == "__main__":
    n_feats = 8
    N, H, W = 2, 16, 16

    key = jax.random.PRNGKey(0)
    k_x, k_p = jax.random.split(key)
    x = jax.random.normal(k_x, (N, n_feats, H, W), dtype=jnp.float32)  # NCHW
    params = init_msr_params(k_p, n_feats)

    out = jax.jit(msr_block_forward)(x, params)
    out = jax.block_until_ready(out)

    ref = jax.block_until_ready(msr_block_ref(x, params))
    assert out.shape == (N, n_feats, H, W)
    np.testing.assert_allclose(np.asarray(out), np.asarray(ref),
                               rtol=1e-4, atol=1e-4)

    print("KERNEL_OK")
</pallas_src>

<mosaic_0001>
module attributes {stable_mosaic.version = 11 : i64} {
  func.func @_msr_block_kernel(%arg0: i32, %arg1: memref<1x8x512xf32, #tpu.memory_space<vmem>>, %arg2: memref<1x512xf32, #tpu.memory_space<vmem>>, %arg3: memref<16x200xf32, #tpu.memory_space<vmem>>, %arg4: memref<16x1xf32, #tpu.memory_space<vmem>>, %arg5: memref<32x400xf32, #tpu.memory_space<vmem>>, %arg6: memref<32x1xf32, #tpu.memory_space<vmem>>, %arg7: memref<8x32xf32, #tpu.memory_space<vmem>>, %arg8: memref<8x1xf32, #tpu.memory_space<vmem>>, %arg9: memref<1x8x512xf32, #tpu.memory_space<vmem>>) attributes {dimension_semantics = [#tpu.dimension_semantics<parallel>], iteration_bounds = array<i64: 2>, scalar_prefetch = 0 : i64, scratch_operands = 0 : i64, tpu.core_type = #tpu.core_type<tc>, window_params = [{transform_indices = @transform_0, window_bounds = array<i64: 1, 8, 512>}, {pipeline_mode = #tpu.pipeline_mode<synchronous>, transform_indices = @transform_1, window_bounds = array<i64: 1, 512>}, {pipeline_mode = #tpu.pipeline_mode<synchronous>, transform_indices = @transform_2, window_bounds = array<i64: 16, 200>}, {pipeline_mode = #tpu.pipeline_mode<synchronous>, transform_indices = @transform_3, window_bounds = array<i64: 16, 1>}, {pipeline_mode = #tpu.pipeline_mode<synchronous>, transform_indices = @transform_4, window_bounds = array<i64: 32, 400>}, {pipeline_mode = #tpu.pipeline_mode<synchronous>, transform_indices = @transform_5, window_bounds = array<i64: 32, 1>}, {pipeline_mode = #tpu.pipeline_mode<synchronous>, transform_indices = @transform_6, window_bounds = array<i64: 8, 32>}, {pipeline_mode = #tpu.pipeline_mode<synchronous>, transform_indices = @transform_7, window_bounds = array<i64: 8, 1>}, {transform_indices = @transform_8, window_bounds = array<i64: 1, 8, 512>}]} {
    %c0 = arith.constant 0 : index
    %c0_0 = arith.constant 0 : index
    %0 = vector.load %arg2[%c0, %c0_0] : memref<1x512xf32, #tpu.memory_space<vmem>>, vector<1x512xf32>
    %c0_1 = arith.constant 0 : index
    %c0_2 = arith.constant 0 : index
    %c0_3 = arith.constant 0 : index
    %1 = vector.load %arg1[%c0_1, %c0_2, %c0_3] : memref<1x8x512xf32, #tpu.memory_space<vmem>>, vector<1x8x512xf32>
    %2 = vector.shape_cast %1 : vector<1x8x512xf32> to vector<8x512xf32>
    %c42_i32 = arith.constant 42 : i32
    %3 = tpu.dynamic_rotate %2 by %c42_i32 dim 1 : vector<8x512xf32>, i32 -> vector<8x512xf32>
    %c41_i32 = arith.constant 41 : i32
    %4 = tpu.dynamic_rotate %2 by %c41_i32 dim 1 : vector<8x512xf32>, i32 -> vector<8x512xf32>
    %c40_i32 = arith.constant 40 : i32
    %5 = tpu.dynamic_rotate %2 by %c40_i32 dim 1 : vector<8x512xf32>, i32 -> vector<8x512xf32>
    %c39_i32 = arith.constant 39 : i32
    %6 = tpu.dynamic_rotate %2 by %c39_i32 dim 1 : vector<8x512xf32>, i32 -> vector<8x512xf32>
    %c38_i32 = arith.constant 38 : i32
    %7 = tpu.dynamic_rotate %2 by %c38_i32 dim 1 : vector<8x512xf32>, i32 -> vector<8x512xf32>
    %c22_i32 = arith.constant 22 : i32
    %8 = tpu.dynamic_rotate %2 by %c22_i32 dim 1 : vector<8x512xf32>, i32 -> vector<8x512xf32>
    %c21_i32 = arith.constant 21 : i32
    %9 = tpu.dynamic_rotate %2 by %c21_i32 dim 1 : vector<8x512xf32>, i32 -> vector<8x512xf32>
    %c20_i32 = arith.constant 20 : i32
    %10 = tpu.dynamic_rotate %2 by %c20_i32 dim 1 : vector<8x512xf32>, i32 -> vector<8x512xf32>
    %c19_i32 = arith.constant 19 : i32
    %11 = tpu.dynamic_rotate %2 by %c19_i32 dim 1 : vector<8x512xf32>, i32 -> vector<8x512xf32>
    %c18_i32 = arith.constant 18 : i32
    %12 = tpu.dynamic_rotate %2 by %c18_i32 dim 1 : vector<8x512xf32>, i32 -> vector<8x512xf32>
    %c2_i32 = arith.constant 2 : i32
    %13 = tpu.dynamic_rotate %2 by %c2_i32 dim 1 : vector<8x512xf32>, i32 -> vector<8x512xf32>
    %c1_i32 = arith.constant 1 : i32
    %14 = tpu.dynamic_rotate %2 by %c1_i32 dim 1 : vector<8x512xf32>, i32 -> vector<8x512xf32>
    %c511_i32 = arith.constant 511 : i32
    %15 = tpu.dynamic_rotate %2 by %c511_i32 dim 1 : vector<8x512xf32>, i32 -> vector<8x512xf32>
    %c510_i32 = arith.constant 510 : i32
    %16 = tpu.dynamic_rotate %2 by %c510_i32 dim 1 : vector<8x512xf32>, i32 -> vector<8x512xf32>
    %c494_i32 = arith.constant 494 : i32
    %17 = tpu.dynamic_rotate %2 by %c494_i32 dim 1 : vector<8x512xf32>, i32 -> vector<8x512xf32>
    %c493_i32 = arith.constant 493 : i32
    %18 = tpu.dynamic_rotate %2 by %c493_i32 dim 1 : vector<8x512xf32>, i32 -> vector<8x512xf32>
    %c492_i32 = arith.constant 492 : i32
    %19 = tpu.dynamic_rotate %2 by %c492_i32 dim 1 : vector<8x512xf32>, i32 -> vector<8x512xf32>
    %c491_i32 = arith.constant 491 : i32
    %20 = tpu.dynamic_rotate %2 by %c491_i32 dim 1 : vector<8x512xf32>, i32 -> vector<8x512xf32>
    %c490_i32 = arith.constant 490 : i32
    %21 = tpu.dynamic_rotate %2 by %c490_i32 dim 1 : vector<8x512xf32>, i32 -> vector<8x512xf32>
    %c474_i32 = arith.constant 474 : i32
    %22 = tpu.dynamic_rotate %2 by %c474_i32 dim 1 : vector<8x512xf32>, i32 -> vector<8x512xf32>
    %c473_i32 = arith.constant 473 : i32
    %23 = tpu.dynamic_rotate %2 by %c473_i32 dim 1 : vector<8x512xf32>, i32 -> vector<8x512xf32>
    %c472_i32 = arith.constant 472 : i32
    %24 = tpu.dynamic_rotate %2 by %c472_i32 dim 1 : vector<8x512xf32>, i32 -> vector<8x512xf32>
    %c471_i32 = arith.constant 471 : i32
    %25 = tpu.dynamic_rotate %2 by %c471_i32 dim 1 : vector<8x512xf32>, i32 -> vector<8x512xf32>
    %c470_i32 = arith.constant 470 : i32
    %26 = tpu.dynamic_rotate %2 by %c470_i32 dim 1 : vector<8x512xf32>, i32 -> vector<8x512xf32>
    %27 = tpu.concatenate %3, %4, %5, %6, %7, %8, %9, %10, %11, %12, %13, %14, %2, %15, %16, %17 in 0 : vector<8x512xf32>, vector<8x512xf32>, vector<8x512xf32>, vector<8x512xf32>, vector<8x512xf32>, vector<8x512xf32>, vector<8x512xf32>, vector<8x512xf32>, vector<8x512xf32>, vector<8x512xf32>, vector<8x512xf32>, vector<8x512xf32>, vector<8x512xf32>, vector<8x512xf32>, vector<8x512xf32>, vector<8x512xf32> -> vector<128x512xf32>
    %28 = tpu.concatenate %18, %19, %20, %21, %22, %23, %24, %25, %26 in 0 : vector<8x512xf32>, vector<8x512xf32>, vector<8x512xf32>, vector<8x512xf32>, vector<8x512xf32>, vector<8x512xf32>, vector<8x512xf32>, vector<8x512xf32>, vector<8x512xf32> -> vector<72x512xf32>
    %29 = tpu.concatenate %27, %28 in 0 : vector<128x512xf32>, vector<72x512xf32> -> vector<200x512xf32>
    %c0_4 = arith.constant 0 : index
    %c0_5 = arith.constant 0 : index
    %30 = vector.load %arg3[%c0_4, %c0_5] : memref<16x200xf32, #tpu.memory_space<vmem>>, vector<16x200xf32>
    %cst = arith.constant dense<0.000000e+00> : vector<16x512xf32>
    %31 = tpu.matmul %30, %29, %cst {dimension_numbers = #tpu.dot_dimension_numbers<[1], [0], [0], [1], [0, 0, 1, 1], [], []>} : vector<16x200xf32>, vector<200x512xf32>, vector<16x512xf32> -> vector<16x512xf32>
    %c0_6 = arith.constant 0 : index
    %c0_7 = arith.constant 0 : index
    %32 = vector.load %arg4[%c0_6, %c0_7] : memref<16x1xf32, #tpu.memory_space<vmem>>, vector<16x1xf32>
    %33 = vector.broadcast %32 : vector<16x1xf32> to vector<16x512xf32>
    %34 = arith.addf %31, %33 : vector<16x512xf32>
    %cst_8 = arith.constant 0.000000e+00 : f32
    %35 = vector.broadcast %cst_8 : f32 to vector<16x512xf32>
    %36 = arith.maximumf %34, %35 : vector<16x512xf32>
    %37 = vector.broadcast %0 : vector<1x512xf32> to vector<16x512xf32>
    %38 = arith.mulf %37, %36 : vector<16x512xf32>
    %c42_i32_9 = arith.constant 42 : i32
    %39 = tpu.dynamic_rotate %38 by %c42_i32_9 dim 1 : vector<16x512xf32>, i32 -> vector<16x512xf32>
    %c41_i32_10 = arith.constant 41 : i32
    %40 = tpu.dynamic_rotate %38 by %c41_i32_10 dim 1 : vector<16x512xf32>, i32 -> vector<16x512xf32>
    %c40_i32_11 = arith.constant 40 : i32
    %41 = tpu.dynamic_rotate %38 by %c40_i32_11 dim 1 : vector<16x512xf32>, i32 -> vector<16x512xf32>
    %c39_i32_12 = arith.constant 39 : i32
    %42 = tpu.dynamic_rotate %38 by %c39_i32_12 dim 1 : vector<16x512xf32>, i32 -> vector<16x512xf32>
    %c38_i32_13 = arith.constant 38 : i32
    %43 = tpu.dynamic_rotate %38 by %c38_i32_13 dim 1 : vector<16x512xf32>, i32 -> vector<16x512xf32>
    %c22_i32_14 = arith.constant 22 : i32
    %44 = tpu.dynamic_rotate %38 by %c22_i32_14 dim 1 : vector<16x512xf32>, i32 -> vector<16x512xf32>
    %c21_i32_15 = arith.constant 21 : i32
    %45 = tpu.dynamic_rotate %38 by %c21_i32_15 dim 1 : vector<16x512xf32>, i32 -> vector<16x512xf32>
    %c20_i32_16 = arith.constant 20 : i32
    %46 = tpu.dynamic_rotate %38 by %c20_i32_16 dim 1 : vector<16x512xf32>, i32 -> vector<16x512xf32>
    %c19_i32_17 = arith.constant 19 : i32
    %47 = tpu.dynamic_rotate %38 by %c19_i32_17 dim 1 : vector<16x512xf32>, i32 -> vector<16x512xf32>
    %c18_i32_18 = arith.constant 18 : i32
    %48 = tpu.dynamic_rotate %38 by %c18_i32_18 dim 1 : vector<16x512xf32>, i32 -> vector<16x512xf32>
    %c2_i32_19 = arith.constant 2 : i32
    %49 = tpu.dynamic_rotate %38 by %c2_i32_19 dim 1 : vector<16x512xf32>, i32 -> vector<16x512xf32>
    %c1_i32_20 = arith.constant 1 : i32
    %50 = tpu.dynamic_rotate %38 by %c1_i32_20 dim 1 : vector<16x512xf32>, i32 -> vector<16x512xf32>
    %c511_i32_21 = arith.constant 511 : i32
    %51 = tpu.dynamic_rotate %38 by %c511_i32_21 dim 1 : vector<16x512xf32>, i32 -> vector<16x512xf32>
    %c510_i32_22 = arith.constant 510 : i32
    %52 = tpu.dynamic_rotate %38 by %c510_i32_22 dim 1 : vector<16x512xf32>, i32 -> vector<16x512xf32>
    %c494_i32_23 = arith.constant 494 : i32
    %53 = tpu.dynamic_rotate %38 by %c494_i32_23 dim 1 : vector<16x512xf32>, i32 -> vector<16x512xf32>
    %c493_i32_24 = arith.constant 493 : i32
    %54 = tpu.dynamic_rotate %38 by %c493_i32_24 dim 1 : vector<16x512xf32>, i32 -> vector<16x512xf32>
    %c492_i32_25 = arith.constant 492 : i32
    %55 = tpu.dynamic_rotate %38 by %c492_i32_25 dim 1 : vector<16x512xf32>, i32 -> vector<16x512xf32>
    %c491_i32_26 = arith.constant 491 : i32
    %56 = tpu.dynamic_rotate %38 by %c491_i32_26 dim 1 : vector<16x512xf32>, i32 -> vector<16x512xf32>
    %c490_i32_27 = arith.constant 490 : i32
    %57 = tpu.dynamic_rotate %38 by %c490_i32_27 dim 1 : vector<16x512xf32>, i32 -> vector<16x512xf32>
    %c474_i32_28 = arith.constant 474 : i32
    %58 = tpu.dynamic_rotate %38 by %c474_i32_28 dim 1 : vector<16x512xf32>, i32 -> vector<16x512xf32>
    %c473_i32_29 = arith.constant 473 : i32
    %59 = tpu.dynamic_rotate %38 by %c473_i32_29 dim 1 : vector<16x512xf32>, i32 -> vector<16x512xf32>
    %c472_i32_30 = arith.constant 472 : i32
    %60 = tpu.dynamic_rotate %38 by %c472_i32_30 dim 1 : vector<16x512xf32>, i32 -> vector<16x512xf32>
    %c471_i32_31 = arith.constant 471 : i32
    %61 = tpu.dynamic_rotate %38 by %c471_i32_31 dim 1 : vector<16x512xf32>, i32 -> vector<16x512xf32>
    %c470_i32_32 = arith.constant 470 : i32
    %62 = tpu.dynamic_rotate %38 by %c470_i32_32 dim 1 : vector<16x512xf32>, i32 -> vector<16x512xf32>
    %63 = tpu.concatenate %39, %40, %41, %42, %43, %44, %45, %46, %47, %48, %49, %50, %38, %51, %52, %53 in 0 : vector<16x512xf32>, vector<16x512xf32>, vector<16x512xf32>, vector<16x512xf32>, vector<16x512xf32>, vector<16x512xf32>, vector<16x512xf32>, vector<16x512xf32>, vector<16x512xf32>, vector<16x512xf32>, vector<16x512xf32>, vector<16x512xf32>, vector<16x512xf32>, vector<16x512xf32>, vector<16x512xf32>, vector<16x512xf32> -> vector<256x512xf32>
    %64 = tpu.concatenate %54, %55, %56, %57, %58, %59, %60, %61, %62 in 0 : vector<16x512xf32>, vector<16x512xf32>, vector<16x512xf32>, vector<16x512xf32>, vector<16x512xf32>, vector<16x512xf32>, vector<16x512xf32>, vector<16x512xf32>, vector<16x512xf32> -> vector<144x512xf32>
    %65 = tpu.concatenate %63, %64 in 0 : vector<256x512xf32>, vector<144x512xf32> -> vector<400x512xf32>
    %c0_33 = arith.constant 0 : index
    %c0_34 = arith.constant 0 : index
    %66 = vector.load %arg5[%c0_33, %c0_34] : memref<32x400xf32, #tpu.memory_space<vmem>>, vector<32x400xf32>
    %cst_35 = arith.constant dense<0.000000e+00> : vector<32x512xf32>
    %67 = tpu.matmul %66, %65, %cst_35 {dimension_numbers = #tpu.dot_dimension_numbers<[1], [0], [0], [1], [0, 0, 1, 1], [], []>} : vector<32x400xf32>, vector<400x512xf32>, vector<32x512xf32> -> vector<32x512xf32>
    %c0_36 = arith.constant 0 : index
    %c0_37 = arith.constant 0 : index
    %68 = vector.load %arg6[%c0_36, %c0_37] : memref<32x1xf32, #tpu.memory_space<vmem>>, vector<32x1xf32>
    %69 = vector.broadcast %68 : vector<32x1xf32> to vector<32x512xf32>
    %70 = arith.addf %67, %69 : vector<32x512xf32>
    %cst_38 = arith.constant 0.000000e+00 : f32
    %71 = vector.broadcast %cst_38 : f32 to vector<32x512xf32>
    %72 = arith.maximumf %70, %71 : vector<32x512xf32>
    %73 = vector.broadcast %0 : vector<1x512xf32> to vector<32x512xf32>
    %74 = arith.mulf %73, %72 : vector<32x512xf32>
    %c0_39 = arith.constant 0 : index
    %c0_40 = arith.constant 0 : index
    %75 = vector.load %arg7[%c0_39, %c0_40] : memref<8x32xf32, #tpu.memory_space<vmem>>, vector<8x32xf32>
    %cst_41 = arith.constant dense<0.000000e+00> : vector<8x512xf32>
    %76 = tpu.matmul %75, %74, %cst_41 {dimension_numbers = #tpu.dot_dimension_numbers<[1], [0], [0], [1], [0, 0, 1, 1], [], []>} : vector<8x32xf32>, vector<32x512xf32>, vector<8x512xf32> -> vector<8x512xf32>
    %c0_42 = arith.constant 0 : index
    %c0_43 = arith.constant 0 : index
    %77 = vector.load %arg8[%c0_42, %c0_43] : memref<8x1xf32, #tpu.memory_space<vmem>>, vector<8x1xf32>
    %78 = vector.broadcast %77 : vector<8x1xf32> to vector<8x512xf32>
    %79 = arith.addf %76, %78 : vector<8x512xf32>
    %80 = arith.addf %79, %2 : vector<8x512xf32>
    %c0_44 = arith.constant 0 : index
    %c0_45 = arith.constant 0 : index
    %c0_46 = arith.constant 0 : index
    %81 = vector.load %arg9[%c0_44, %c0_45, %c0_46] : memref<1x8x512xf32, #tpu.memory_space<vmem>>, vector<1x8x512xf32>
    %82 = vector.shape_cast %81 : vector<1x8x512xf32> to vector<8x512xf32>
    %83 = vector.shape_cast %80 : vector<8x512xf32> to vector<1x8x512xf32>
    tpu.vector_store %arg9[%c0_44, %c0_45, %c0_46], %83 {strides = array<i32>} : memref<1x8x512xf32, #tpu.memory_space<vmem>>, vector<1x8x512xf32>,
    return
  }
  func.func @transform_0(%arg0: i32) -> (i32, i32, i32) {
    %c0_i32 = arith.constant 0 : i32
    %c0_i32_0 = arith.constant 0 : i32
    %c0_i32_1 = arith.constant 0 : i32
    return %arg0, %c0_i32, %c0_i32_0 : i32, i32, i32
  }
  func.func @transform_1(%arg0: i32) -> (i32, i32) {
    %c0_i32 = arith.constant 0 : i32
    %c0_i32_0 = arith.constant 0 : i32
    %c0_i32_1 = arith.constant 0 : i32
    return %c0_i32, %c0_i32_0 : i32, i32
  }
  func.func @transform_2(%arg0: i32) -> (i32, i32) {
    %c0_i32 = arith.constant 0 : i32
    %c0_i32_0 = arith.constant 0 : i32
    %c0_i32_1 = arith.constant 0 : i32
    return %c0_i32, %c0_i32_0 : i32, i32
  }
  func.func @transform_3(%arg0: i32) -> (i32, i32) {
    %c0_i32 = arith.constant 0 : i32
    %c0_i32_0 = arith.constant 0 : i32
    %c0_i32_1 = arith.constant 0 : i32
    return %c0_i32, %c0_i32_0 : i32, i32
  }
  func.func @transform_4(%arg0: i32) -> (i32, i32) {
    %c0_i32 = arith.constant 0 : i32
    %c0_i32_0 = arith.constant 0 : i32
    %c0_i32_1 = arith.constant 0 : i32
    return %c0_i32, %c0_i32_0 : i32, i32
  }
  func.func @transform_5(%arg0: i32) -> (i32, i32) {
    %c0_i32 = arith.constant 0 : i32
    %c0_i32_0 = arith.constant 0 : i32
    %c0_i32_1 = arith.constant 0 : i32
    return %c0_i32, %c0_i32_0 : i32, i32
  }
  func.func @transform_6(%arg0: i32) -> (i32, i32) {
    %c0_i32 = arith.constant 0 : i32
    %c0_i32_0 = arith.constant 0 : i32
    %c0_i32_1 = arith.constant 0 : i32
    return %c0_i32, %c0_i32_0 : i32, i32
  }
  func.func @transform_7(%arg0: i32) -> (i32, i32) {
    %c0_i32 = arith.constant 0 : i32
    %c0_i32_0 = arith.constant 0 : i32
    %c0_i32_1 = arith.constant 0 : i32
    return %c0_i32, %c0_i32_0 : i32, i32
  }
  func.func @transform_8(%arg0: i32) -> (i32, i32, i32) {
    %c0_i32 = arith.constant 0 : i32
    %c0_i32_0 = arith.constant 0 : i32
    %c0_i32_1 = arith.constant 0 : i32
    return %arg0, %c0_i32, %c0_i32_0 : i32, i32, i32
  }
}

</mosaic_0001>

<bundles_post_ra>
// kernel: msr_block_forward.1
= control target key start
LH: loop header
LB: loop body
LE: loop exit
PB: predicated region body
PF: predicated region fallthrough
CT: control target
= control target key end

     0   :  { %s3015_s27 = smov 0   ;;  %s5883_s0 = inlined_call_operand.vmem [shape: f32[2,8,512], index: 0, kind: input, shape index: {}]   ;;  %s5884_s1 = inlined_call_operand.vmem [shape: f32[1,512], index: 1, kind: input, shape index: {}]   ;;  %s5885_s2 = inlined_call_operand.vmem [shape: f32[16,200], index: 2, kind: input, shape index: {}]   ;;  %s5886_s3 = inlined_call_operand.vmem [shape: f32[16,1], index: 3, kind: input, shape index: {}]   ;;  %s5887_s4 = inlined_call_operand.vmem [shape: f32[32,400], index: 4, kind: input, shape index: {}]   ;;  %s5888_s5 = inlined_call_operand.vmem [shape: f32[32,1], index: 5, kind: input, shape index: {}]   ;;  %s5889_s6 = inlined_call_operand.vmem [shape: f32[8,32], index: 6, kind: input, shape index: {}]   ;;  %s5890_s7 = inlined_call_operand.vmem [shape: f32[8,1], index: 7, kind: input, shape index: {}]   ;;  %s5891_s8 = inlined_call_operand.vmem [shape: f32[2,8,512], index: 8, kind: output, shape index: {}]  }
   0x1 LB: > { %s2136_s28 = sadd.s32 4294967295, %s2943_s27   ;;  %p2140_p0 = scmp.ge.s32.totalorder %s2943_s27, 1  ;;  %s2943_s27 = sphi %s3015_s27, %s18_s27  }
   0x2   : > { %p262_p1 = scmp.lt.s32.totalorder %s2943_s27, 3 }
   0x4   : > { %p263_p2 = pnand %p2140_p0, %p262_p1 }
   0x6   : > { %266 = sbr.rel (%p263_p2) target bundleno = 1126 (0x466), region = 52 }
   0xb   : > { %p296_p3 = scmp.lt.s32.totalorder %s2136_s28, 1  ;;  %s2945_s11 = smov 41   ;;  %v319_v17 = vlaneseq }
   0xc   : > { %s2946_s12 = smov 42   ;;  %s2947_s13 = smov 40  }
   0xd   : > { %s6686_s28 = smov (!%p296_p3, %s2136_s28), 1  ;;  %s2948_s14 = smov 39   ;;  %v3119_v18 = vand.u32 127, %v319_v17 }
   0xe   : > { %s5892_s29 = sshll.u32 %s6686_s28, 5  ;;  %s5928_s15 = smov 38  }
   0xf   : > { %s3031_s10 = scalar_lea.vmem %s5883_s0, %s5892_s29  ;;  %s2950_s16 = smov 22   ;;  %vm5971_vm0 = vcmp.lt.s32.totalorder %v3119_v18, 39  ;;  %vm386_vm1 = vcmp.lt.s32.totalorder %v3119_v18, 22  ;;  %vm373_vm2 = vcmp.lt.s32.totalorder %v3119_v18, 38  ;;  %vm5972_vm3 = vcmp.lt.s32.totalorder %v3119_v18, 110 }
  0x10   : > { %v3034_v0 = vld [vmem:[%s3031_s10] sm:$0xff]  ;;  %v3037_v1 = vld [vmem:[%s3031_s10 + $0x8] sm:$0xff]  ;;  %v3045_v3 = vld [vmem:[%s3031_s10 + $0x10] sm:$0xff]  ;;  %s5901_s17 = smov 21   ;;  %s5926_s18 = smov 20   ;;  %vm5953_vm4 = vcmp.lt.s32.totalorder %v3119_v18, 126 }
  0x11   : > { %v2220_v2 = vpack.i.bf16 %v3037_v1, %v3034_v0  ;;  %v3048_v4 = vld [vmem:[%s3031_s10 + $0x18] sm:$0xff]  ;;  %s5893_s19 = smov 19   ;;  %s5899_s20 = smov 18   ;;  %v2425_v10 = vpack.i.bf16 %v3045_v3, %v3037_v1  ;;  %vm5943_vm5 = vcmp.lt.s32.totalorder %v3119_v18, 127  ;;  %vm5948_vm6 = vcmp.lt.s32.totalorder %v3119_v18, 1 }
  0x12   : > { %v2225_v5 = vpack.i.bf16 %v3048_v4, %v3045_v3  ;;  %s5895_s21 = smov 2   ;;  %s5897_s22 = smov 1   ;;  %v2400_v7 = vpack.i.bf16 %v3048_v4, %v3034_v0  ;;  %vm5951_vm7 = vcmp.lt.s32.totalorder %v3119_v18, 2  ;;  %vm5957_vm8 = vcmp.lt.s32.totalorder %v3119_v18, 18 }
  0x13   : > { %2221 = vrot.lane.b32.xlu1 %v2220_v2, %s2945_s11  ;;  %2211 = vrot.lane.b32.xlu0 %v2220_v2, %s2946_s12  ;;  %s2957_s23 = smov 127   ;;  %s2958_s24 = smov 126   ;;  %vm5956_vm9 = vcmp.lt.s32.totalorder %v3119_v18, 19  ;;  %vm412_vm10 = vcmp.lt.s32.totalorder %v3119_v18, 20  ;;  %vm5969_vm11 = vcmp.lt.s32.totalorder %v3119_v18, 21  ;;  %vm5925_vm12 = vcmp.lt.s32.totalorder %v3119_v18, 41 }
  0x14   : > { %2231 = vrot.lane.b32.xlu2 %v2220_v2, %s2947_s13  ;;  %s2959_s25 = smov 110   ;;  %s5979_s26 = smov 109   ;;  %vm347_vm13 = vcmp.lt.s32.totalorder %v3119_v18, 40  ;;  %vm5934_vm14 = vcmp.lt.s32.totalorder %v3119_v18, 42  ;;  %vm5981_vm15 = vcmp.lt.s32.totalorder %v3119_v18, 86 }
  0x15   : > { %s5975_s30 = smov 108   ;;  %s2962_s9 = smov 107  }
  0x16   : > { %s5977_s29 = smov 106  }
  0x1b   : > { %2226 = vrot.lane.b32.xlu1 %v2225_v5, %s2945_s11  ;;  %2216 = vrot.lane.b32.xlu0 %v2225_v5, %s2946_s12 }
  0x1c   : > { %2236 = vrot.lane.b32.xlu2 %v2225_v5, %s2947_s13 }
  0x23   : > { %2246 = vrot.lane.b32.xlu1 %v2225_v5, %s2948_s14  ;;  %2241 = vrot.lane.b32.xlu0 %v2220_v2, %s2948_s14 }
  0x24   : > { %2251 = vrot.lane.b32.xlu2 %v2220_v2, %s5928_s15 }
  0x2b   : > { %2261 = vrot.lane.b32.xlu1 %v2220_v2, %s2950_s16  ;;  %2256 = vrot.lane.b32.xlu0 %v2225_v5, %s5928_s15  ;;  %s6199_s15 = smov 38  }
  0x2c   : > { %2266 = vrot.lane.b32.xlu2 %v2225_v5, %s2950_s16 }
  0x33   : > { %2276 = vrot.lane.b32.xlu1 %v2225_v5, %s5901_s17  ;;  %2271 = vrot.lane.b32.xlu0 %v2220_v2, %s5901_s17  ;;  %s5973_s17 = smov 89  }
  0x34   : > { %2281 = vrot.lane.b32.xlu2 %v2220_v2, %s5926_s18 }
  0x3b   : > { %2291 = vrot.lane.b32.xlu1 %v2220_v2, %s5893_s19  ;;  %2286 = vrot.lane.b32.xlu0 %v2225_v5, %s5926_s18  ;;  %s6202_s18 = smov 20  }
  0x3c   : > { %2296 = vrot.lane.b32.xlu2 %v2225_v5, %s5893_s19  ;;  %s2964_s19 = smov 90  }
  0x43   : > { %2306 = vrot.lane.b32.xlu1 %v2225_v5, %s5899_s20  ;;  %2301 = vrot.lane.b32.xlu0 %v2220_v2, %s5899_s20  ;;  %s2967_s20 = smov 88  }
  0x44   : > { %2311 = vrot.lane.b32.xlu2 %v2220_v2, %s5895_s21 }
  0x4b   : > { %2321 = vrot.lane.b32.xlu1 %v2220_v2, %s5897_s22  ;;  %2316 = vrot.lane.b32.xlu0 %v2225_v5, %s5895_s21  ;;  %s2965_s21 = smov 87  }
  0x4c   : > { %2326 = vrot.lane.b32.xlu2 %v2225_v5, %s5897_s22  ;;  %s2966_s22 = smov 86  }
  0x53   : > { %2336 = vrot.lane.b32.xlu1 %v2225_v5, %s2957_s23  ;;  %2331 = vrot.lane.b32.xlu0 %v2220_v2, %s2957_s23 }
  0x54   : > { %2341 = vrot.lane.b32.xlu2 %v2220_v2, %s2958_s24 }
  0x5b   : > { %2351 = vrot.lane.b32.xlu1 %v2220_v2, %s2959_s25  ;;  %2346 = vrot.lane.b32.xlu0 %v2225_v5, %s2958_s24 }
  0x5c   : > { %2356 = vrot.lane.b32.xlu2 %v2225_v5, %s2959_s25 }
  0x63   : > { %2366 = vrot.lane.b32.xlu1 %v2225_v5, %s5979_s26  ;;  %2361 = vrot.lane.b32.xlu0 %v2220_v2, %s5979_s26 }
  0x64   : > { %2371 = vrot.lane.b32.xlu2 %v2220_v2, %s5975_s30 }
  0x6b   : > { %2381 = vrot.lane.b32.xlu1 %v2220_v2, %s2962_s9  ;;  %2376 = vrot.lane.b32.xlu0 %v2225_v5, %s5975_s30 }
  0x6c   : > { %2386 = vrot.lane.b32.xlu2 %v2225_v5, %s2962_s9 }
  0x6e   : > { %v3085_v6 = vpop.permute.xlu2 %2231 }
  0x73   : > { %2396 = vrot.lane.b32.xlu1 %v2225_v5, %s5977_s29  ;;  %2391 = vrot.lane.b32.xlu0 %v2220_v2, %s5977_s29 }
  0x74   : > { %2401 = vrot.lane.b32.xlu2 %v2400_v7, %s2964_s19 }
  0x76   : > { %v3092_v8 = vpop.permute.xlu2 %2236 }
  0x7b   : > { %2411 = vrot.lane.b32.xlu1 %v2400_v7, %s2965_s21  ;;  %2406 = vrot.lane.b32.xlu0 %v2400_v7, %s2966_s22 }
  0x7c   : > { %2416 = vrot.lane.b32.xlu2 %v2400_v7, %s2967_s20 }
  0x7e   : > { %v3097_v9 = vpop.permute.xlu2 %2251 }
  0x7f   : > { %v2253_v29 = vunpack.i.l.bf16 %v3097_v9  ;;  %v2254_v37 = vunpack.i.h.bf16 %v3097_v9 }
  0x83   : > { %2426 = vrot.lane.b32.xlu1 %v2425_v10, %s2966_s22  ;;  %2421 = vrot.lane.b32.xlu0 %v2400_v7, %s5973_s17 }
  0x84   : > { %2431 = vrot.lane.b32.xlu2 %v2425_v10, %s2965_s21 }
  0x85   : > { %v3104_v11 = vpop.permute.xlu1 %2221  ;;  %v3106_v12 = vpop.permute.xlu0 %2211 }
  0x86   : > { %v3108_v13 = vpop.permute.xlu2 %2266 }
  0x87   : > { %v5910_v28 = vunpack.i.h.bf16 %v3108_v13  ;;  %v5909_v30 = vunpack.i.l.bf16 %v3108_v13 }
  0x8b   : > { %2441 = vrot.lane.b32.xlu1 %v2425_v10, %s5973_s17  ;;  %2436 = vrot.lane.b32.xlu0 %v2425_v10, %s2967_s20 }
  0x8c   : > { %2446 = vrot.lane.b32.xlu2 %v2425_v10, %s2964_s19 }
  0x8d   : > { %v3113_v14 = vpop.permute.xlu1 %2226  ;;  %v3115_v15 = vpop.permute.xlu0 %2216 }
  0x8e   : > { %v3117_v16 = vpop.permute.xlu2 %2281  ;;  %v5933_v9 = vunpack.i.h.bf16 %v3115_v15 }
  0x95   : > { %v3121_v19 = vpop.permute.xlu1 %2246  ;;  %v3123_v20 = vpop.permute.xlu0 %2241 }
  0x96   : > { %v5904_v21 = vunpack.i.h.bf16 %v3121_v19  ;;  %v5903_v22 = vunpack.i.l.bf16 %v3121_v19  ;;  %v2244_v23 = vunpack.i.h.bf16 %v3123_v20  ;;  %v5919_v24 = vunpack.i.l.bf16 %v3123_v20  ;;  %v3130_v25 = vpop.permute.xlu2 %2296 }
  0x98   : > { %v3138_v26 = vsel %vm5971_vm0, %v5904_v21, %v5919_v24  ;;  %v3146_v27 = vsel %vm5971_vm0, %v2244_v23, %v5903_v22 }
  0x9d   : > { %v3151_v31 = vpop.permute.xlu1 %2261  ;;  %v3153_v32 = vpop.permute.xlu0 %2256 }
  0x9e   : > { %v2264_v33 = vunpack.i.h.bf16 %v3151_v31  ;;  %v2263_v34 = vunpack.i.l.bf16 %v3151_v31  ;;  %v5906_v35 = vunpack.i.h.bf16 %v3153_v32  ;;  %v5905_v36 = vunpack.i.l.bf16 %v3153_v32  ;;  %v3194_v42 = vpop.permute.xlu2 %2311 }
  0x9f   : > { %v376_v31 = vsel %vm373_vm2, %v2253_v29, %v2254_v37 }
  0xa0   : > { %v3168_v38 = vsel %vm386_vm1, %v5910_v28, %v2263_v34  ;;  %v3176_v39 = vsel %vm373_vm2, %v5906_v35, %v2253_v29  ;;  %v3184_v40 = vsel %vm386_vm1, %v2264_v33, %v5909_v30  ;;  %v3192_v41 = vsel %vm373_vm2, %v2254_v37, %v5905_v36 }
  0xa1   : > { %v2313_v30 = vunpack.i.l.bf16 %v3194_v42  ;;  %v6113_v29 = vunpack.i.l.bf16 %v3123_v20 }
  0xa3   : > { %v363_v37 = vsel %vm5971_vm0, %v6113_v29, %v2244_v23 }
  0xa5   : > { %v3196_v43 = vpop.permute.xlu1 %2276  ;;  %v3198_v44 = vpop.permute.xlu0 %2271 }
  0xa6   : > { %v3200_v45 = vpop.permute.xlu2 %2326  ;;  %v2273_v24 = vunpack.i.l.bf16 %v3198_v44 }
  0xa7   : > { %v5914_v35 = vunpack.i.h.bf16 %v3200_v45 }
  0xad   : > { %v3202_v46 = vpop.permute.xlu1 %2291  ;;  %v3204_v47 = vpop.permute.xlu0 %2286 }
  0xae   : > { %v3210_v50 = vpop.permute.xlu2 %2341 }
  0xaf   : > { %v2344_v58 = vunpack.i.h.bf16 %v3210_v50  ;;  %v5913_v61 = vunpack.i.l.bf16 %v3210_v50 }
  0xb1   : > { %v493_v21 = vsel %vm5953_vm4, %v5913_v61, %v2344_v58  ;;  %v2293_v61 = vunpack.i.l.bf16 %v3202_v46 }
  0xb5   : > { %v3206_v48 = vpop.permute.xlu1 %2306  ;;  %v3208_v49 = vpop.permute.xlu0 %2301 }
  0xb6   : > { %v3216_v53 = vpop.permute.xlu2 %2356 }
  0xb7   : > { %v5907_v57 = vunpack.i.l.bf16 %v3216_v53  ;;  %v5939_v20 = vunpack.i.h.bf16 %v3216_v53 }
  0xbd   : > { %v3212_v51 = vpop.permute.xlu1 %2321  ;;  %v3214_v52 = vpop.permute.xlu0 %2316 }
  0xbe   : > { %v3222_v56 = vpop.permute.xlu2 %2371  ;;  %v5916_v28 = vunpack.i.h.bf16 %v3214_v52 }
  0xc5   : > { %v3218_v54 = vpop.permute.xlu1 %2336  ;;  %v3220_v55 = vpop.permute.xlu0 %2331 }
  0xc6   : > { %v5912_v5 = vunpack.i.l.bf16 %v3218_v54  ;;  %v2334_v7 = vunpack.i.h.bf16 %v3220_v55  ;;  %v5911_v10 = vunpack.i.l.bf16 %v3220_v55 }
  0xcd   : > { %v3226_v59 = vpop.permute.xlu1 %2351  ;;  %v3228_v60 = vpop.permute.xlu0 %2346 }
  0xce   : > { %v2354_v62 = vunpack.i.h.bf16 %v3226_v59  ;;  %v5918_v63 = vunpack.i.l.bf16 %v3226_v59  ;;  %v5908_v2 = vunpack.i.l.bf16 %v3228_v60 }
  0xd0   : > { %v506_v17 = vsel %vm5972_vm3, %v5918_v63, %v2354_v62  ;;  %v505_v22 = vsel %vm5972_vm3, %v2354_v62, %v5907_v57  ;;  %v492_v36 = vsel %vm5953_vm4, %v2344_v58, %v5908_v2  ;;  %v5915_v62 = vunpack.i.h.bf16 %v3212_v51 }
  0xd1   : > { %648 = vmatpush.msra.mxu0 %v506_v17  ;;  %694 = vmatpush.msra.mxu2 %v505_v22  ;;  %v2323_v22 = vunpack.i.l.bf16 %v3212_v51  ;;  %v3259_v17 = vpop.permute.xlu2 %2386  ;;  %v480_v57 = vsel %vm5943_vm5, %v5911_v10, %v2334_v7  ;;  %v479_v58 = vsel %vm5943_vm5, %v2334_v7, %v5912_v5  ;;  %v5920_v10 = vunpack.i.h.bf16 %v3206_v48 }
  0xd2   : > { %v5921_v7 = vunpack.i.h.bf16 %v3208_v49  ;;  %v5922_v63 = vunpack.i.h.bf16 %v3198_v44 }
  0xd3   : > { %649 = vmatpush.msra.mxu0 %v493_v21  ;;  %695 = vmatpush.msra.mxu2 %v492_v36  ;;  %v5917_v36 = vunpack.i.h.bf16 %v3194_v42  ;;  %v467_v5 = vsel %vm5948_vm6, %v2323_v22, %v5915_v62  ;;  %v5931_v62 = vunpack.i.h.bf16 %v3117_v16 }
  0xd5   : > { %v3269_v2 = vpop.permute.xlu1 %2366  ;;  %v3271_v21 = vpop.permute.xlu0 %2361  ;;  %650 = vmatpush.msra.mxu0 %v480_v57  ;;  %696 = vmatpush.msra.mxu2 %v479_v58  ;;  %v2303_v57 = vunpack.i.l.bf16 %v3208_v49  ;;  %v468_v58 = vsel %vm5948_vm6, %v5914_v35, %v2323_v22  ;;  %v455_v35 = vsel %vm5951_vm7, %v5916_v28, %v2313_v30  ;;  %v454_v22 = vsel %vm5951_vm7, %v2313_v30, %v5917_v36 }
  0xd6   : > { %v5945_v36 = vunpack.i.h.bf16 %v3196_v43 }
  0xd7   : > { %651 = vmatpush.msra.mxu0 %v3034_v0  ;;  %697 = vmatpush.msra.mxu2 %v3037_v1  ;;  %v5949_v0 = vunpack.i.h.bf16 %v3130_v25  ;;  %v5932_v1 = vunpack.i.h.bf16 %v3202_v46  ;;  %v442_v28 = vsel %vm5957_vm8, %v5920_v10, %v2303_v57  ;;  %v441_v30 = vsel %vm5957_vm8, %v2303_v57, %v5921_v7 }
  0xd9   : > { %652 = vmatpush.msra.mxu0 %v468_v58  ;;  %698 = vmatpush.msra.mxu2 %v467_v5  ;;  %v2283_v5 = vunpack.i.l.bf16 %v3117_v16  ;;  %v5947_v58 = vunpack.i.h.bf16 %v3204_v47  ;;  %v3323_v10 = vpop.permute.xlu2 %2401  ;;  %v429_v57 = vsel %vm5956_vm9, %v5949_v0, %v2293_v61  ;;  %v428_v7 = vsel %vm5956_vm9, %v2293_v61, %v5932_v1 }
  0xda   : > { %v403_v61 = vsel %vm5969_vm11, %v5945_v36, %v2273_v24 }
  0xdb   : > { %653 = vmatpush.msra.mxu0 %v455_v35  ;;  %699 = vmatpush.msra.mxu2 %v454_v22 }
  0xdd   : > { %v3316_v35 = vpop.permute.xlu1 %2381  ;;  %v3318_v22 = vpop.permute.xlu0 %2376  ;;  %654 = vmatpush.msra.mxu0 %v442_v28  ;;  %700 = vmatpush.msra.mxu2 %v441_v30  ;;  %v416_v28 = vsel %vm412_vm10, %v5947_v58, %v2283_v5  ;;  %v415_v30 = vsel %vm412_vm10, %v2283_v5, %v5931_v62  ;;  %v389_v5 = vsel %vm386_vm1, %v2263_v34, %v2264_v33  ;;  %v5923_v33 = vunpack.i.h.bf16 %v3104_v11 }
  0xde   : > { %v2223_v34 = vunpack.i.l.bf16 %v3104_v11  ;;  %v6118_v58 = vunpack.i.h.bf16 %v3214_v52 }
  0xdf   : > { %655 = vmatpush.msra.mxu0 %v429_v57  ;;  %701 = vmatpush.msra.mxu2 %v428_v7  ;;  %v402_v7 = vsel %vm5969_vm11, %v2273_v24, %v5922_v63  ;;  %v5924_v24 = vunpack.i.h.bf16 %v3085_v6 }
  0xe0   : > { %v337_v23 = vsel %vm5925_vm12, %v2223_v34, %v5923_v33 }
  0xe1   : > { %656 = vmatpush.msra.mxu0 %v416_v28  ;;  %702 = vmatpush.msra.mxu2 %v415_v30  ;;  %v2233_v30 = vunpack.i.l.bf16 %v3085_v6  ;;  %v3379_v63 = vpop.permute.xlu2 %2416 }
  0xe3   : > { %657 = vmatpush.msra.mxu0 %v403_v61  ;;  %703 = vmatpush.msra.mxu2 %v402_v7  ;;  %v5942_v61 = vunpack.i.h.bf16 %v3092_v8  ;;  %v2213_v7 = vunpack.i.l.bf16 %v3106_v12 }
  0xe5   : > { %v3356_v57 = vpop.permute.xlu1 %2396  ;;  %v3358_v28 = vpop.permute.xlu0 %2391  ;;  %658 = vmatpush.msra.mxu0 %v3168_v38  ;;  %704 = vmatpush.msra.mxu2 %v389_v5  ;;  %v5930_v38 = vunpack.i.h.bf16 %v3106_v12  ;;  %v5935_v5 = vunpack.i.h.bf16 %v3113_v14 }
  0xe6   : > { %v5962_v0 = vunpack.i.l.bf16 %v3358_v28 }
  0xe7   : > { %659 = vmatpush.msra.mxu0 %v3176_v39  ;;  %705 = vmatpush.msra.mxu2 %v376_v31  ;;  %v351_v39 = vsel %vm347_vm13, %v5942_v61, %v2233_v30  ;;  %v350_v31 = vsel %vm347_vm13, %v2233_v30, %v5924_v24  ;;  %v338_v29 = vsel %vm5925_vm12, %v5935_v5, %v2223_v34  ;;  %vm607_vm12 = vcmp.lt.s32.totalorder %v3119_v18, 87  ;;  %v3426_v34 = vld [vmem:[%s5885_s2] sm:$0xff] }
  0xe8   : > { %v325_v30 = vsel %vm5934_vm14, %v5933_v9, %v2213_v7 }
  0xe9   : > { %660 = vmatpush.msra.mxu0 %v3138_v26  ;;  %706 = vmatpush.msra.mxu2 %v363_v37  ;;  %v5937_v26 = vunpack.i.h.bf16 %v3228_v60  ;;  %v324_v37 = vsel %vm5934_vm14, %v2213_v7, %v5930_v38  ;;  %vm594_vm14 = vcmp.lt.s32.totalorder %v3119_v18, 88 }
  0xeb   : > { %661 = vmatpush.msra.mxu0 %v351_v39  ;;  %707 = vmatpush.msra.mxu2 %v350_v31  ;;  %v5940_v39 = vunpack.i.h.bf16 %v3379_v63  ;;  %v5946_v31 = vunpack.i.l.bf16 %v3379_v63 }
  0xed   : > { %v3417_v33 = vpop.permute.xlu1 %2411  ;;  %v3419_v24 = vpop.permute.xlu0 %2406  ;;  %662 = vmatpush.msra.mxu0 %v338_v29  ;;  %708 = vmatpush.msra.mxu2 %v337_v23  ;;  %v5941_v29 = vunpack.i.h.bf16 %v3218_v54  ;;  %v6114_v23 = vunpack.i.l.bf16 %v3226_v59  ;;  %v6115_v59 = vunpack.i.l.bf16 %v3210_v50  ;;  %v5950_v50 = vunpack.i.l.bf16 %v3214_v52 }
  0xee   : > { %v5936_v7 = vunpack.i.h.bf16 %v3417_v33  ;;  %v2413_v38 = vunpack.i.l.bf16 %v3417_v33  ;;  %v5938_v62 = vunpack.i.h.bf16 %v3419_v24  ;;  %v2408_v1 = vunpack.i.l.bf16 %v3419_v24 }
  0xef   : > { %663 = vmatpush.msra.mxu0 %v325_v30  ;;  %709 = vmatpush.msra.mxu2 %v324_v37  ;;  %v507_v9 = vsel %vm5972_vm3, %v5939_v20, %v6114_v23  ;;  %v5944_v37 = vunpack.i.l.bf16 %v3200_v45  ;;  %v3457_v23 = vpop.permute.xlu2 %2431  ;;  %v6117_v20 = vunpack.i.h.bf16 %v3200_v45 }
  0xf0   : > { %v624_v5 = vsel %vm5981_vm15, %v5938_v62, %v2408_v1  ;;  %v611_v30 = vsel %vm607_vm12, %v5936_v7, %v2413_v38  ;;  %710 = vmatmul.f32.vlgmr.msra.gmra.mxu2 %v3426_v34  ;;  %664 = vmatmul.f32.vlgmr.msra.gmra.mxu0 %v3426_v34  ;;  %v6116_v7 = vunpack.i.l.bf16 %v3220_v55  ;;  %v5954_v55 = vunpack.i.h.bf16 %v3323_v10 }
  0xf1   : > { %786 = vmatpush.msrb.mxu0 %v507_v9  ;;  %816 = vmatpush.msrb.mxu2 %v624_v5  ;;  %v494_v9 = vsel %vm5953_vm4, %v5937_v26, %v6115_v59  ;;  %v598_v5 = vsel %vm594_vm14, %v5940_v39, %v5946_v31  ;;  %v5963_v39 = vunpack.i.l.bf16 %v3323_v10  ;;  %v452_v26 = vsel %vm5951_vm7, %v5950_v50, %v6118_v58 }
  0xf2   : > { %v481_v59 = vsel %vm5943_vm5, %v5941_v29, %v6116_v7  ;;  %v2433_v7 = vunpack.i.l.bf16 %v3457_v23  ;;  %vm581_vm5 = vcmp.lt.s32.totalorder %v3119_v18, 89  ;;  %v5960_v50 = vunpack.i.h.bf16 %v3259_v17 }
  0xf3   : > { %787 = vmatpush.msrb.mxu0 %v494_v9  ;;  %817 = vmatpush.msrb.mxu2 %v611_v30  ;;  %v465_v30 = vsel %vm5948_vm6, %v5944_v37, %v6117_v20  ;;  %v5955_v9 = vunpack.i.h.bf16 %v3457_v23  ;;  %vm568_vm6 = vcmp.lt.s32.totalorder %v3119_v18, 90  ;;  %vm555_vm7 = vcmp.lt.s32.totalorder %v3119_v18, 106 }
  0xf4   : > { %vm542_vm4 = vcmp.lt.s32.totalorder %v3119_v18, 107 }
  0xf5   : > { %788 = vmatpush.msrb.mxu0 %v481_v59  ;;  %v3484_v29 = vpop.permute.xlu1 %2426  ;;  %v3486_v61 = vpop.permute.xlu0 %2421  ;;  %818 = vmatpush.msrb.mxu2 %v598_v5  ;;  %v3492_v59 = vld [vmem:[%s5885_s2 + $0x10] sm:$0xff]  ;;  %v5958_v5 = vunpack.i.h.bf16 %v3356_v57 }
  0xf6   : > { %v5959_v20 = vunpack.i.h.bf16 %v3484_v29  ;;  %v2428_v37 = vunpack.i.l.bf16 %v3484_v29  ;;  %v5952_v36 = vunpack.i.h.bf16 %v3486_v61  ;;  %v5964_v31 = vunpack.i.l.bf16 %v3486_v61 }
  0xf7   : > { %789 = vmatpush.msrb.mxu0 %v3048_v4 }
  0xf8   : > { %v623_v62 = vsel %vm5981_vm15, %v2408_v1, %v2428_v37  ;;  %v585_v4 = vsel %vm581_vm5, %v5952_v36, %v5964_v31  ;;  %v622_v58 = vsel %vm5981_vm15, %v2428_v37, %v5959_v20  ;;  %713 = vmatmul.f32.gmra.mxu2 %v3492_v59  ;;  %v609_v1 = vsel %vm607_vm12, %v2433_v7, %v5955_v9  ;;  %v3551_v9 = vpop.permute.xlu2 %2446 }
  0xf9   : > { %790 = vmatpush.msrb.mxu0 %v465_v30  ;;  %v5961_v30 = vunpack.i.l.bf16 %v3316_v35  ;;  %678 = vmatpush.msra.mxu1 %v623_v62  ;;  %v610_v36 = vsel %vm607_vm12, %v2413_v38, %v2433_v7  ;;  %v572_v62 = vsel %vm568_vm6, %v5954_v55, %v5963_v39  ;;  %v6119_v37 = vunpack.i.h.bf16 %v3206_v48 }
  0xfa   : > { %819 = vmatpush.msrb.mxu2 %v585_v4  ;;  %724 = vmatpush.msra.mxu3 %v622_v58  ;;  %v6120_v4 = vunpack.i.l.bf16 %v3206_v48  ;;  %v6121_v38 = vunpack.i.h.bf16 %v3130_v25  ;;  %v6122_v7 = vunpack.i.l.bf16 %v3130_v25  ;;  %v5965_v20 = vmov 0  }
  0xfb   : > { %791 = vmatpush.msrb.mxu0 %v452_v26  ;;  %679 = vmatpush.msra.mxu1 %v610_v36  ;;  %v559_v36 = vsel %vm555_vm7, %v5958_v5, %v5962_v0  ;;  %v5970_v31 = vunpack.i.h.bf16 %v3551_v9  ;;  %v2448_v55 = vunpack.i.l.bf16 %v3551_v9 }
  0xfc   : > { %820 = vmatpush.msrb.mxu2 %v572_v62  ;;  %v439_v26 = vsel %vm5957_vm8, %v6120_v4, %v6119_v37  ;;  %v426_v58 = vsel %vm5956_vm9, %v6122_v7, %v6121_v38  ;;  %725 = vmatpush.msra.mxu3 %v609_v1  ;;  %v6123_v62 = vunpack.i.h.bf16 %v3204_v47  ;;  %v6124_v37 = vunpack.i.l.bf16 %v3204_v47 }
  0xfd   : > { %792 = vmatpush.msrb.mxu0 %v439_v26  ;;  %v3566_v7 = vpop.permute.xlu1 %2441  ;;  %v3568_v26 = vpop.permute.xlu0 %2436  ;;  %v546_v1 = vsel %vm542_vm4, %v5960_v50, %v5961_v30  ;;  %vm529_vm9 = vcmp.lt.s32.totalorder %v3119_v18, 108  ;;  %vm516_vm8 = vcmp.lt.s32.totalorder %v3119_v18, 109  ;;  %2450 = vset.pattern.permute.xlu0 %v5965_v20  ;;  %v629_v50 = vld [vmem:[%s5886_s3] sm:$0xff]  ;;  %v2373_v30 = vunpack.i.l.bf16 %v3222_v56 }
  0xfe   : > { %v413_v4 = vsel %vm412_vm10, %v6124_v37, %v6123_v62  ;;  %821 = vmatpush.msrb.mxu2 %v559_v36  ;;  %667 = vmatmul.f32.gmra.mxu0 %v3492_v59  ;;  %v5968_v62 = vunpack.i.h.bf16 %v3566_v7  ;;  %v2443_v37 = vunpack.i.l.bf16 %v3566_v7  ;;  %v5967_v5 = vunpack.i.h.bf16 %v3568_v26 }
  0xff   : > { %v2438_v36 = vunpack.i.l.bf16 %v3568_v26  ;;  %793 = vmatpush.msrb.mxu0 %v426_v58  ;;  %633 = vperm.xlu0 %2450, %v629_v50   ;;  %v6125_v58 = vunpack.i.l.bf16 %v3379_v63  ;;  %v6126_v50 = vunpack.i.h.bf16 %v3318_v22 }
 0x100   : > { %822 = vmatpush.msrb.mxu2 %v546_v1  ;;  %v583_v0 = vsel %vm581_vm5, %v2443_v37, %v5968_v62  ;;  %v6127_v1 = vunpack.i.h.bf16 %v3196_v43  ;;  %v6133_v62 = vunpack.i.l.bf16 %v3108_v13 }
 0x101   : > { %794 = vmatpush.msrb.mxu0 %v413_v4  ;;  %v597_v20 = vsel %vm594_vm14, %v6125_v58, %v2438_v36  ;;  %v596_v38 = vsel %vm594_vm14, %v2438_v36, %v5967_v5  ;;  %v533_v4 = vsel %vm529_vm9, %v6126_v50, %v2373_v30  ;;  %v6128_v58 = vunpack.i.l.bf16 %v3196_v43 }
 0x102   : > { %680 = vmatpush.msra.mxu1 %v597_v20  ;;  %726 = vmatpush.msra.mxu3 %v596_v38  ;;  %v2398_v36 = vunpack.i.l.bf16 %v3356_v57  ;;  %v2394_v5 = vunpack.i.h.bf16 %v3358_v28  ;;  %v6129_v20 = vunpack.i.l.bf16 %v3486_v61  ;;  %v570_v50 = vsel %vm568_vm6, %v2448_v55, %v5970_v31 }
 0x103   : > { %v400_v39 = vsel %vm5969_vm11, %v6128_v58, %v6127_v1  ;;  %823 = vmatpush.msrb.mxu2 %v533_v4  ;;  %v6130_v1 = vunpack.i.l.bf16 %v3271_v21  ;;  %v6131_v58 = vunpack.i.h.bf16 %v3269_v2  ;;  %vm641_vm11 = vcmask 588800  }
 0x104   : > { %795 = vmatpush.msrb.mxu0 %v400_v39  ;;  %v584_v38 = vsel %vm581_vm5, %v6129_v20, %v2443_v37  ;;  %727 = vmatpush.msra.mxu3 %v583_v0  ;;  %v6132_v39 = vunpack.i.h.bf16 %v3108_v13  ;;  %v3639_v20 = vld [vmem:[%s5885_s2 + $0x8] sm:$0xff]  ;;  %v2374_v31 = vunpack.i.h.bf16 %v3222_v56  ;;  %v2378_v0 = vunpack.i.l.bf16 %v3318_v22 }
 0x105   : > { %681 = vmatpush.msra.mxu1 %v584_v38  ;;  %v520_v4 = vsel %vm516_vm8, %v6131_v58, %v6130_v1  ;;  %v2384_v38 = vunpack.i.h.bf16 %v3316_v35  ;;  %v6134_v1 = vunpack.i.l.bf16 %v3323_v10  ;;  %v6136_v58 = vunpack.i.l.bf16 %v3153_v32 }
 0x106   : > { %v387_v37 = vsel %vm386_vm1, %v6133_v62, %v6132_v39  ;;  %824 = vmatpush.msrb.mxu2 %v520_v4  ;;  %728 = vmatpush.msra.mxu3 %v570_v50  ;;  %v6135_v62 = vunpack.i.h.bf16 %v3153_v32  ;;  %v6137_v4 = vunpack.i.l.bf16 %v3358_v28  ;;  %v2238_v32 = vunpack.i.l.bf16 %v3092_v8 }
 0x107   : > { %796 = vmatpush.msrb.mxu0 %v387_v37  ;;  %v571_v13 = vsel %vm568_vm6, %v6134_v1, %v2448_v55  ;;  %v557_v55 = vsel %vm555_vm7, %v2394_v5, %v2398_v36  ;;  %2151 = vmatmul.msk.f32.vlgmr.msrb.gmra.mxu2 %vm641_vm11, %v3639_v20  ;;  %v6138_v56 = vunpack.i.h.bf16 %v3121_v19  ;;  %v6139_v50 = vunpack.i.l.bf16 %v3121_v19  ;;  %v630_v1 = vld [vmem:[%s5886_s3 + $0x8] sm:$0xff] }
 0x108   : > { %682 = vmatpush.msra.mxu1 %v571_v13  ;;  %v374_v39 = vsel %vm373_vm2, %v6136_v58, %v6135_v62  ;;  %v558_v37 = vsel %vm555_vm7, %v6137_v4, %v2394_v5  ;;  %729 = vmatpush.msra.mxu3 %v557_v55  ;;  %v2368_v5 = vunpack.i.l.bf16 %v3269_v2  ;;  %v2364_v13 = vunpack.i.h.bf16 %v3271_v21 }
 0x109   : > { %797 = vmatpush.msrb.mxu0 %v374_v39  ;;  %v361_v28 = vsel %vm5971_vm0, %v6139_v50, %v6138_v56  ;;  %v6140_v62 = vunpack.i.l.bf16 %v3316_v35  ;;  %v6141_v39 = vunpack.i.l.bf16 %v3259_v17  ;;  %v6142_v4 = vmov 0  }
 0x10a   : > { %683 = vmatpush.msra.mxu1 %v558_v37  ;;  %2451 = vset.pattern.permute.xlu1 %v6142_v4  ;;  %v2228_v37 = vunpack.i.l.bf16 %v3113_v14  ;;  %v6143_v55 = vunpack.i.h.bf16 %v3092_v8  ;;  %v532_v56 = vsel %vm529_vm9, %v2373_v30, %v2374_v31  ;;  %v2218_v50 = vunpack.i.l.bf16 %v3115_v15 }
 0x10b   : > { %798 = vmatpush.msrb.mxu0 %v361_v28  ;;  %v545_v58 = vsel %vm542_vm4, %v6140_v62, %v2384_v38  ;;  %v544_v19 = vsel %vm542_vm4, %v2384_v38, %v6141_v39  ;;  %v531_v38 = vsel %vm529_vm9, %v2374_v31, %v2378_v0  ;;  %638 = vperm.xlu1 %2451, %v630_v1   ;;  %v6144_v28 = vunpack.i.h.bf16 %v3113_v14  ;;  %v628_v1 = vld [vmem:[%s5885_s2 + $0x18] sm:$0xff] }
 0x10c   : > { %684 = vmatpush.msra.mxu1 %v545_v58  ;;  %730 = vmatpush.msra.mxu3 %v544_v19  ;;  %v348_v35 = vsel %vm347_vm13, %v2238_v32, %v6143_v55  ;;  %vm6145_vm0 = vcmp.lt.s32.totalorder %v3119_v18, 41  ;;  %v6146_v30 = vunpack.i.l.bf16 %v3271_v21  ;;  %v518_v31 = vsel %vm516_vm8, %v2364_v13, %v2368_v5 }
 0x10d   : > { %799 = vmatpush.msrb.mxu0 %v348_v35  ;;  %v335_v62 = vsel %vm6145_vm0, %v2228_v37, %v6144_v28  ;;  %2932 = vset.pattern.permute.xlu2 %v6142_v4  ;;  %v6147_v21 = vunpack.i.h.bf16 %v3216_v53  ;;  %v6148_v39 = vunpack.i.l.bf16 %v3216_v53  ;;  %v6149_v19 = vunpack.i.h.bf16 %v3419_v24 }
 0x10e   : > { %685 = vmatpush.msra.mxu1 %v532_v56  ;;  %731 = vmatpush.msra.mxu3 %v531_v38  ;;  %v519_v58 = vsel %vm516_vm8, %v6146_v30, %v2364_v13  ;;  %v6150_v4 = vunpack.i.h.bf16 %v3484_v29  ;;  %v6151_v35 = vunpack.i.h.bf16 %v3115_v15  ;;  %vm6152_vm0 = vcmp.lt.s32.totalorder %v3119_v18, 42 }
 0x10f   : > { %800 = vmatpush.msrb.mxu0 %v335_v62  ;;  %v504_v13 = vsel %vm5972_vm3, %v6148_v39, %v6147_v21  ;;  %v6153_v53 = vunpack.i.h.bf16 %v3228_v60  ;;  %v6154_v38 = vunpack.i.l.bf16 %v3228_v60  ;;  %vm6155_vm3 = vcmp.lt.s32.totalorder %v3119_v18, 126  ;;  %2152 = vmatmul.msk.f32.gmra.mxu2 %vm641_vm11, %v628_v1 }
 0x110   : > { %686 = vmatpush.msra.mxu1 %v519_v58  ;;  %732 = vmatpush.msra.mxu3 %v518_v31  ;;  %v621_v55 = vsel %vm5981_vm15, %v6150_v4, %v6149_v19  ;;  %v322_v56 = vsel %vm6152_vm0, %v2218_v50, %v6151_v35  ;;  %v6156_v29 = vunpack.i.h.bf16 %v3417_v33  ;;  %v6157_v28 = vunpack.i.h.bf16 %v3457_v23 }
 0x111   : > { %2145 = vmatmul.msk.f32.vlgmr.msra.gmra.mxu1 %vm641_vm11, %v3639_v20  ;;  %2147 = vmatmul.msk.f32.vlgmr.msra.gmra.mxu3 %vm641_vm11, %v3639_v20  ;;  %v491_v24 = vsel %vm6155_vm3, %v6154_v38, %v6153_v53  ;;  %v6158_v30 = vunpack.i.h.bf16 %v3218_v54  ;;  %v6159_v60 = vunpack.i.l.bf16 %v3218_v54  ;;  %vm6160_vm0 = vcmp.lt.s32.totalorder %v3119_v18, 127 }
 0x112   : > { %740 = vmatpush.msrb.mxu1 %v504_v13  ;;  %770 = vmatpush.msrb.mxu3 %v621_v55  ;;  %v608_v62 = vsel %vm607_vm12, %v6157_v28, %v6156_v29  ;;  %v6161_v31 = vunpack.i.h.bf16 %v3379_v63  ;;  %v6162_v21 = vunpack.i.h.bf16 %v3568_v26  ;;  %v6163_v23 = vunpack.i.h.bf16 %v3486_v61 }
 0x113   : > { %801 = vmatpush.msrb.mxu0 %v322_v56  ;;  %v478_v58 = vsel %vm6160_vm0, %v6159_v60, %v6158_v30  ;;  %v6164_v39 = vunpack.i.h.bf16 %v3566_v7  ;;  %v6165_v63 = vunpack.i.l.bf16 %v3200_v45  ;;  %v6166_v26 = vunpack.i.h.bf16 %v3212_v51 }
 0x114   : > { %802 = vmatmul.f32.vlgmr.msrb.gmra.mxu0 %v3426_v34  ;;  %741 = vmatpush.msrb.mxu1 %v491_v24  ;;  %v595_v33 = vsel %vm594_vm14, %v6162_v21, %v6161_v31  ;;  %vm6167_vm3 = vcmp.lt.s32.totalorder %v3119_v18, 1  ;;  %v6169_v61 = vunpack.i.h.bf16 %v3551_v9  ;;  %v6170_v19 = vunpack.i.l.bf16 %v3214_v52 }
 0x115   : > { %771 = vmatpush.msrb.mxu3 %v608_v62  ;;  %v582_v54 = vsel %vm581_vm5, %v6164_v39, %v6163_v23  ;;  %v466_v13 = vsel %vm6167_vm3, %v6166_v26, %v6165_v63  ;;  %v6171_v45 = vunpack.i.h.bf16 %v3194_v42  ;;  %vm6172_vm0 = vcmp.lt.s32.totalorder %v3119_v18, 2 }
 0x116   : > { %742 = vmatpush.msrb.mxu1 %v478_v58  ;;  %v6173_v4 = vunpack.i.h.bf16 %v3356_v57  ;;  %v6174_v9 = vunpack.i.l.bf16 %v3206_v48  ;;  %v6175_v52 = vunpack.i.h.bf16 %v3208_v49  ;;  %vm6176_vm3 = vcmp.lt.s32.totalorder %v3119_v18, 18 }
 0x117   : > { %772 = vmatpush.msrb.mxu3 %v595_v33  ;;  %v453_v51 = vsel %vm6172_vm0, %v6171_v45, %v6170_v19  ;;  %v6177_v55 = vunpack.i.h.bf16 %v3259_v17  ;;  %v6178_v35 = vunpack.i.l.bf16 %v3259_v17  ;;  %v6179_v57 = vunpack.i.l.bf16 %v3130_v25 }
 0x118   : > { %743 = vmatpush.msrb.mxu1 %v3045_v3  ;;  %v6168_v3 = vunpack.i.h.bf16 %v3323_v10  ;;  %v556_v10 = vsel %vm555_vm7, %v2398_v36, %v6173_v4  ;;  %v440_v42 = vsel %vm6176_vm3, %v6175_v52, %v6174_v9  ;;  %v6180_v36 = vunpack.i.h.bf16 %v3202_v46 }
 0x119   : > { %773 = vmatpush.msrb.mxu3 %v582_v54  ;;  %2146 = vmatmul.msk.f32.gmra.mxu1 %vm641_vm11, %v628_v1  ;;  %v543_v56 = vsel %vm542_vm4, %v6178_v35, %v6177_v55  ;;  %vm6181_vm0 = vcmp.lt.s32.totalorder %v3119_v18, 19  ;;  %v6182_v49 = vunpack.i.h.bf16 %v3318_v22  ;;  %v6183_v17 = vunpack.i.l.bf16 %v3204_v47 }
 0x11a   : > { %2148 = vmatmul.msk.f32.gmra.mxu3 %vm641_vm11, %v628_v1  ;;  %744 = vmatpush.msrb.mxu1 %v466_v13  ;;  %v569_v7 = vsel %vm568_vm6, %v6169_v61, %v6168_v3  ;;  %v427_v48 = vsel %vm6181_vm0, %v6180_v36, %v6179_v57  ;;  %v6184_v38 = vunpack.i.h.bf16 %v3117_v16  ;;  %v6185_v46 = vunpack.i.h.bf16 %v3269_v2 }
 0x11b   : > { %774 = vmatpush.msrb.mxu3 %v569_v7  ;;  %v530_v53 = vsel %vm529_vm9, %v2378_v0, %v6182_v49  ;;  %v6186_v22 = vunpack.i.l.bf16 %v3196_v43  ;;  %v6187_v0 = vunpack.i.h.bf16 %v3198_v44  ;;  %vm6188_vm3 = vcmp.lt.s32.totalorder %v3119_v18, 21 }
 0x11c   : > { %805 = vmatmul.f32.gmra.mxu0 %v3492_v59  ;;  %745 = vmatpush.msrb.mxu1 %v453_v51  ;;  %v414_v25 = vsel %vm412_vm10, %v6184_v38, %v6183_v17  ;;  %v517_v24 = vsel %vm516_vm8, %v2368_v5, %v6185_v46  ;;  %v6189_v16 = vunpack.i.h.bf16 %v3085_v6  ;;  %v6190_v44 = vunpack.i.h.bf16 %v3104_v11 }
 0x11d   : > { %775 = vmatpush.msrb.mxu3 %v556_v10  ;;  %v401_v47 = vsel %vm6188_vm3, %v6187_v0, %v6186_v22  ;;  %vm6191_vm0 = vcmp.lt.s32.totalorder %v3119_v18, 41  ;;  %v6192_v8 = vunpack.i.h.bf16 %v3106_v12  ;;  %vm6193_vm3 = vcmp.lt.s32.totalorder %v3119_v18, 42  ;;  %v3874_v12 = vld [vmem:[%s5884_s1] sm:$0xf] }
 0x11e   : > { %746 = vmatpush.msrb.mxu1 %v440_v42  ;;  %v349_v43 = vsel %vm347_vm13, %v6189_v16, %v2238_v32  ;;  %v3878_v32 = vperm.slane %v3874_v12, 0  ;;  %v3915_v9 = vperm.slane %v3874_v12, 2  ;;  %v3960_v46 = vperm.slane %v3874_v12, 3  ;;  %vm6222_vm15 = vmmov %vm6191_vm0 }
 0x11f   : > { %776 = vmatpush.msrb.mxu3 %v543_v56  ;;  %v323_v6 = vsel %vm6193_vm3, %v6192_v8, %v2218_v50  ;;  %vm6220_vm3 = vmmov %vm6191_vm0 }
 0x120   : > { %747 = vmatpush.msrb.mxu1 %v427_v48  ;;  %6194 = vst [vmem:[#allocation2_spill] sm:$0xff] %v3878_v32 }
 0x121   : > { %777 = vmatpush.msrb.mxu3 %v530_v53  ;;  %6196 = vst [vmem:[#allocation4_spill] sm:$0xff] %v3915_v9 }
 0x122   : > { %748 = vmatpush.msrb.mxu1 %v414_v25  ;;  %6201 = vst [vmem:[#allocation8_spill] sm:$0xff] %v3960_v46 }
 0x123   : > { %778 = vmatpush.msrb.mxu3 %v517_v24 }
 0x124   : > { %749 = vmatpush.msrb.mxu1 %v401_v47  ;;  %2149 = vmatmul.msk.f32.vlgmr.msrb.gmra.mxu3 %vm641_vm11, %v3639_v20 }
 0x126   : > { %750 = vmatpush.msrb.mxu1 %v3184_v40  ;;  %v336_v40 = vsel %vm6191_vm0, %v6190_v44, %v2228_v37  ;;  %v3881_v37 = vperm.slane %v3874_v12, 1 }
 0x128   : > { %751 = vmatpush.msrb.mxu1 %v3192_v41  ;;  %6195 = vst [vmem:[#allocation3_spill] sm:$0xff] %v3881_v37 }
 0x12a   : > { %752 = vmatpush.msrb.mxu1 %v3146_v27 }
 0x12c   : > { %753 = vmatpush.msrb.mxu1 %v349_v43  ;;  %2150 = vmatmul.msk.f32.gmra.mxu3 %vm641_vm11, %v628_v1  ;;  %vm6217_vm11 = vmmov %vm6191_vm0 }
 0x12e   : > { %754 = vmatpush.msrb.mxu1 %v336_v40 }
 0x130   : > { %755 = vmatpush.msrb.mxu1 %v323_v6 }
 0x131   : > { %756 = vmatmul.f32.vlgmr.msrb.gmra.mxu1 %v3426_v34 }
 0x139   : > { %759 = vmatmul.f32.gmra.mxu1 %v3492_v59 }
 0x16d   : > { %v665_v14 = vpop.f32.mrf.mxu0 }
 0x171   : > { %v3868_v27 = vpop.permute.xlu0 %633 }
 0x172   : > { %v666_v11 = vadd.f32 %v665_v14, %v3868_v27 }
 0x173   : > { %v711_v20 = vpop.f32.mrf.mxu2 }
 0x174   : > { %v712_v15 = vadd.f32 %v711_v20, %v3868_v27 }
 0x17b   : > { %v668_v30 = vpop.f32.mrf.mxu0  ;;  %v714_v45 = vpop.f32.mrf.mxu2 }
 0x17d   : > { %v3894_v62 = vpop.permute.xlu1 %638 }
 0x17e   : > { %v669_v60 = vadd.f32 %v668_v30, %v3894_v62  ;;  %v715_v51 = vadd.f32 %v714_v45, %v3894_v62 }
 0x18a   : > { %v826_v17 = vpop.f32.mrf.mxu2 }
 0x18e   : > { %v688_v41 = vpop.f32.mrf.mxu1 }
 0x18f   : > { %v689_v2 = vadd.f32 %v688_v41, %v666_v11 }
 0x191   : > { %v832_v34 = vmax.f32 %v689_v2, 0.0  ;;  %v803_v49 = vpop.f32.mrf.mxu0 }
 0x192   : > { %v804_v53 = vadd.f32 %v803_v49, %v3868_v27  ;;  %v829_v6 = vpop.f32.mrf.mxu2 }
 0x193   : > { %v3884_v50 = vmul.f32 %v3878_v32, %v832_v34 }
 0x194   : > { %v734_v59 = vpop.f32.mrf.mxu3  ;;  %v827_v38 = vadd.f32 %v826_v17, %v804_v53 }
 0x195   : > { %v735_v5 = vadd.f32 %v734_v59, %v712_v15 }
 0x196   : > { %v691_v58 = vpop.f32.mrf.mxu1  ;;  %v835_v24 = vmax.f32 %v827_v38, 0.0 }
 0x197   : > { %v833_v1 = vmax.f32 %v735_v5, 0.0  ;;  %v692_v21 = vadd.f32 %v691_v58, %v669_v60 }
 0x198   : > { %v3971_v0 = vmul.f32 %v3960_v46, %v835_v24 }
 0x199   : > { %v3887_v29 = vmul.f32 %v3881_v37, %v833_v1  ;;  %v836_v33 = vmax.f32 %v692_v21, 0.0  ;;  %v806_v44 = vpop.f32.mrf.mxu0 }
 0x19a   : > { %6203 = vst [vmem:[#allocation9_spill] sm:$0xff] %v3971_v0  ;;  %v3977_v16 = vpack.i.bf16 %v3971_v0, %v3884_v50  ;;  %v807_v40 = vadd.f32 %v806_v44, %v3894_v62 }
 0x19b   : > { %v2462_v28 = vpack.i.bf16 %v3887_v29, %v3884_v50  ;;  %v3904_v54 = vmul.f32 %v3878_v32, %v836_v33 }
 0x19d   : > { %2463 = vrot.lane.b32.xlu0 %v2462_v28, %s2967_s20  ;;  %2458 = vrot.lane.b32.xlu2 %v2462_v28, %s2959_s25  ;;  %v737_v31 = vpop.f32.mrf.mxu3  ;;  %v2512_v63 = vpack.i.bf16 %v3904_v54, %v3884_v50 }
 0x19e   : > { %2453 = vrot.lane.b32.xlu1 %v2462_v28, %s2965_s21  ;;  %v738_v52 = vadd.f32 %v737_v31, %v715_v51 }
 0x1a0   : > { %v837_v35 = vmax.f32 %v738_v52, 0.0 }
 0x1a2   : > { %v3932_v57 = vmul.f32 %v3881_v37, %v837_v35 }
 0x1a4   : > { %v2562_v36 = vpack.i.bf16 %v3932_v57, %v3887_v29  ;;  %v2597_v48 = vpack.i.bf16 %v3932_v57, %v3904_v54  ;;  %v3964_v22 = vpack.i.bf16 %v3887_v29, %v3932_v57 }
 0x1a5   : > { %2468 = vrot.lane.b32.xlu0 %v2462_v28, %s2958_s24  ;;  %2483 = vrot.lane.b32.xlu2 %v2462_v28, %s2964_s19 }
 0x1a6   : > { %2473 = vrot.lane.b32.xlu1 %v2462_v28, %s5973_s17 }
 0x1a7   : > { %v780_v23 = vpop.f32.mrf.mxu3 }
 0x1ad   : > { %2503 = vrot.lane.b32.xlu0 %v2462_v28, %s5979_s26  ;;  %2493 = vrot.lane.b32.xlu2 %v2462_v28, %s2962_s9 }
 0x1ae   : > { %v757_v39 = vpop.f32.mrf.mxu1  ;;  %2478 = vrot.lane.b32.xlu1 %v2462_v28, %s2957_s23 }
 0x1af   : > { %v758_v26 = vadd.f32 %v757_v39, %v3868_v27  ;;  %v783_v3 = vpop.f32.mrf.mxu3  ;;  %v830_v27 = vadd.f32 %v829_v6, %v807_v40 }
 0x1b1   : > { %v781_v7 = vadd.f32 %v780_v23, %v758_v26  ;;  %v839_v2 = vmax.f32 %v830_v27, 0.0 }
 0x1b3   : > { %v834_v10 = vmax.f32 %v781_v7, 0.0  ;;  %v4005_v20 = vmul.f32 %v3960_v46, %v839_v2 }
 0x1b5   : > { %2508 = vrot.lane.b32.xlu0 %v2462_v28, %s2966_s22  ;;  %2513 = vrot.lane.b32.xlu2 %v2512_v63, %s2946_s12  ;;  %v3924_v55 = vmul.f32 %v3915_v9, %v834_v10  ;;  %6209 = vst [vmem:[#allocation12_spill] sm:$0xff] %v4005_v20  ;;  %v2707_v59 = vpack.i.bf16 %v4005_v20, %v3971_v0 }
 0x1b6   : > { %v760_v13 = vpop.f32.mrf.mxu1  ;;  %2488 = vrot.lane.b32.xlu1 %v2462_v28, %s5977_s29 }
 0x1b7   : > { %v761_v61 = vadd.f32 %v760_v13, %v3894_v62  ;;  %6198 = vst [vmem:[#allocation6_spill] sm:$0xff] %v3924_v55  ;;  %v4027_v62 = vpack.i.bf16 %v4005_v20, %v3904_v54  ;;  %v2722_v21 = vpack.i.bf16 %v4005_v20, %v3924_v55 }
 0x1b9   : > { %v784_v19 = vadd.f32 %v783_v3, %v761_v61 }
 0x1bb   : > { %v838_v4 = vmax.f32 %v784_v19, 0.0 }
 0x1bd   : > { %2528 = vrot.lane.b32.xlu0 %v2512_v63, %s2948_s14  ;;  %2523 = vrot.lane.b32.xlu2 %v2512_v63, %s2947_s13  ;;  %v3921_v42 = vmul.f32 %v3915_v9, %v838_v4 }
 0x1be   : > { %2498 = vrot.lane.b32.xlu1 %v2462_v28, %s5975_s30 }
 0x1bf   : > { %6197 = vst [vmem:[#allocation5_spill] sm:$0xff] %v3921_v42  ;;  %v2557_v56 = vpack.i.bf16 %v3921_v42, %v3924_v55  ;;  %v2677_v8 = vpack.i.bf16 %v3921_v42, %v3971_v0  ;;  %v4041_v31 = vpack.i.bf16 %v3924_v55, %v3921_v42 }
 0x1c5   : > { %2558 = vrot.lane.b32.xlu0 %v2557_v56, %s2945_s11  ;;  %2538 = vrot.lane.b32.xlu2 %v2512_v63, %s2950_s16 }
 0x1c6   : > { %2518 = vrot.lane.b32.xlu1 %v2512_v63, %s2945_s11 }
 0x1cd   : > { %2563 = vrot.lane.b32.xlu0 %v2562_v36, %s2947_s13  ;;  %2548 = vrot.lane.b32.xlu2 %v2557_v56, %s2946_s12 }
 0x1ce   : > { %2533 = vrot.lane.b32.xlu1 %v2512_v63, %s6199_s15 }
 0x1d5   : > { %2588 = vrot.lane.b32.xlu0 %v2557_v56, %s6199_s15  ;;  %2553 = vrot.lane.b32.xlu2 %v2562_v36, %s2945_s11 }
 0x1d6   : > { %2543 = vrot.lane.b32.xlu1 %v2562_v36, %s2946_s12 }
 0x1dd   : > { %2593 = vrot.lane.b32.xlu0 %v2562_v36, %s2950_s16  ;;  %2578 = vrot.lane.b32.xlu2 %v2557_v56, %s2948_s14 }
 0x1de   : > { %2568 = vrot.lane.b32.xlu1 %v2557_v56, %s2947_s13 }
 0x1e5   : > { %2598 = vrot.lane.b32.xlu0 %v2597_v48, %s2965_s21  ;;  %2583 = vrot.lane.b32.xlu2 %v2562_v36, %s6199_s15 }
 0x1e6   : > { %2573 = vrot.lane.b32.xlu1 %v2562_v36, %s2948_s14 }
 0x1ed   : > { %2603 = vrot.lane.b32.xlu0 %v2597_v48, %s2959_s25  ;;  %2618 = vrot.lane.b32.xlu2 %v2597_v48, %s5973_s17  ;;  %s6205_s17 = smov 21  }
 0x1ee   : > { %2608 = vrot.lane.b32.xlu1 %v2597_v48, %s2967_s20 }
 0x1f5   : > { %2628 = vrot.lane.b32.xlu0 %v2597_v48, %s2964_s19  ;;  %2623 = vrot.lane.b32.xlu2 %v2597_v48, %s2957_s23 }
 0x1f6   : > { %2613 = vrot.lane.b32.xlu1 %v2597_v48, %s2958_s24 }
 0x1f7   : > { %v3957_v25 = vpop.permute.xlu2 %2458 }
 0x1f8   : > { %6200 = vst [vmem:[#allocation7_spill] sm:$0xff] %v3957_v25 }
 0x1fd   : > { %2633 = vrot.lane.b32.xlu0 %v2597_v48, %s5977_s29  ;;  %2648 = vrot.lane.b32.xlu2 %v3964_v22, %s6202_s18  ;;  %s6208_s29 = smov 1  }
 0x1fe   : > { %2643 = vrot.lane.b32.xlu1 %v2597_v48, %s5975_s30  ;;  %s6207_s30 = smov 18  }
 0x1ff   : > { %v3973_v47 = vpop.permute.xlu2 %2483 }
 0x200   : > { %6204 = vst [vmem:[#allocation10_spill] sm:$0xff] %v3973_v47 }
 0x205   : > { %2638 = vrot.lane.b32.xlu0 %v2597_v48, %s2962_s9  ;;  %2673 = vrot.lane.b32.xlu2 %v3977_v16, %s6205_s17 }
 0x206   : > { %2658 = vrot.lane.b32.xlu1 %v3964_v22, %s6205_s17 }
 0x207   : > { %v3984_v43 = vpop.permute.xlu2 %2493 }
 0x208   : > { %6206 = vst [vmem:[#allocation11_spill] sm:$0xff] %v3984_v43 }
 0x20d   : > { %2653 = vrot.lane.b32.xlu0 %v2597_v48, %s5979_s26  ;;  %2678 = vrot.lane.b32.xlu2 %v2677_v8, %s2950_s16  ;;  %s6211_s26 = smov 2  }
 0x20e   : > { %2663 = vrot.lane.b32.xlu1 %v2597_v48, %s2966_s22 }
 0x20f   : > { %v3992_v14 = vpop.permute.xlu0 %2463  ;;  %v3994_v11 = vpop.permute.xlu2 %2513 }
 0x210   : > { %v3996_v41 = vpop.permute.xlu1 %2453 }
 0x215   : > { %2668 = vrot.lane.b32.xlu0 %v3977_v16, %s6202_s18  ;;  %2693 = vrot.lane.b32.xlu2 %v3977_v16, %s6207_s30 }
 0x216   : > { %2683 = vrot.lane.b32.xlu1 %v3977_v16, %s6208_s29 }
 0x217   : > { %v4007_v12 = vpop.permute.xlu0 %2468  ;;  %v4009_v15 = vpop.permute.xlu2 %2523 }
 0x218   : > { %6210 = vst [vmem:[#allocation13_spill] sm:$0xff] %v4007_v12  ;;  %v4011_v34 = vpop.permute.xlu1 %2473  ;;  %v5995_v56 = vunpack.i.h.bf16 %v4009_v15  ;;  %v5988_v36 = vunpack.i.l.bf16 %v4009_v15 }
 0x21d   : > { %2688 = vrot.lane.b32.xlu0 %v3977_v16, %s6211_s26  ;;  %2708 = vrot.lane.b32.xlu2 %v2707_v59, %s2947_s13  ;;  %s6241_s13 = smov 106  }
 0x21e   : > { %2703 = vrot.lane.b32.xlu1 %v2707_v59, %s2945_s11  ;;  %s6224_s11 = smov 19  }
 0x21f   : > { %v4019_v5 = vpop.permute.xlu0 %2503  ;;  %v4021_v1 = vpop.permute.xlu2 %2538 }
 0x220   : > { %6212 = vst [vmem:[#allocation14_spill] sm:$0xff] %v4019_v5  ;;  %v4023_v28 = vpop.permute.xlu1 %2478  ;;  %v6264_v42 = vunpack.i.l.bf16 %v4021_v1 }
 0x221   : > { %6213 = vst [vmem:[#allocation15_spill] sm:$0xff] %v4023_v28 }
 0x225   : > { %2698 = vrot.lane.b32.xlu0 %v2707_v59, %s2946_s12  ;;  %2728 = vrot.lane.b32.xlu2 %v4027_v62, %s6202_s18  ;;  %s6237_s12 = smov 89  }
 0x226   : > { %2718 = vrot.lane.b32.xlu1 %v2707_v59, %s6199_s15 }
 0x227   : > { %v4033_v30 = vpop.permute.xlu0 %2508  ;;  %v4035_v60 = vpop.permute.xlu2 %2548 }
 0x228   : > { %6214 = vst [vmem:[#allocation16_spill] sm:$0xff] %v4033_v30  ;;  %v4037_v58 = vpop.permute.xlu1 %2488 }
 0x229   : > { %6215 = vst [vmem:[#allocation17_spill] sm:$0xff] %v4037_v58 }
 0x22d   : > { %2713 = vrot.lane.b32.xlu0 %v2707_v59, %s2948_s14  ;;  %2743 = vrot.lane.b32.xlu2 %v4041_v31, %s2959_s25  ;;  %s6252_s14 = smov 108  }
 0x22e   : > { %2723 = vrot.lane.b32.xlu1 %v2722_v21, %s2950_s16  ;;  %s6271_s16 = smov 109  }
 0x22f   : > { %v4049_v33 = vpop.permute.xlu0 %2528  ;;  %v2554_v23 = vpop.permute.xlu2 %2553 }
 0x230   : > { %v4051_v39 = vpop.permute.xlu1 %2498  ;;  %v2556_v13 = vunpack.i.h.bf16 %v2554_v23  ;;  %v2555_v3 = vunpack.i.l.bf16 %v2554_v23  ;;  %v5990_v23 = vunpack.i.h.bf16 %v3994_v11 }
 0x231   : > { %6216 = vst [vmem:[#allocation18_spill] sm:$0xff] %v4051_v39 }
 0x235   : > { %2748 = vrot.lane.b32.xlu0 %v4041_v31, %s2965_s21  ;;  %2758 = vrot.lane.b32.xlu2 %v4041_v31, %s2967_s20 }
 0x236   : > { %2733 = vrot.lane.b32.xlu1 %v4027_v62, %s6205_s17 }
 0x237   : > { %v4059_v63 = vpop.permute.xlu0 %2558  ;;  %v4061_v26 = vpop.permute.xlu2 %2578 }
 0x238   : > { %v5987_v61 = vunpack.i.h.bf16 %v4059_v63  ;;  %v5986_v7 = vunpack.i.l.bf16 %v4059_v63  ;;  %v4065_v19 = vpop.permute.xlu1 %2518 }
 0x239   : > { %v5983_v45 = vunpack.i.h.bf16 %v4065_v19  ;;  %v5982_v51 = vunpack.i.l.bf16 %v4065_v19 }
 0x23a   : > { %v4073_v4 = vsel %vm6217_vm11, %v2556_v13, %v5987_v61  ;;  %v4079_v10 = vsel %vm6191_vm0, %v2555_v3, %v5986_v7 }
 0x23b   : > { %6218 = vst [vmem:[#allocation19_spill] sm:$0xff] %v4073_v4  ;;  %v4085_v52 = vsel %vm6220_vm3, %v5983_v45, %v2556_v13  ;;  %v4091_v35 = vsel %vm6222_vm15, %v5982_v51, %v2555_v3  ;;  %v5989_v13 = vunpack.i.l.bf16 %v3994_v11  ;;  %v5991_v51 = vunpack.i.h.bf16 %v4035_v60 }
 0x23c   : > { %6219 = vst [vmem:[#allocation20_spill] sm:$0xff] %v4079_v10  ;;  %v5992_v45 = vunpack.i.l.bf16 %v4035_v60  ;;  %vm6229_vm15 = vcmp.lt.s32.totalorder %v3119_v18, 42 }
 0x23d   : > { %6221 = vst [vmem:[#allocation21_spill] sm:$0xff] %v4085_v52  ;;  %2763 = vrot.lane.b32.xlu0 %v4041_v31, %s2957_s23  ;;  %2773 = vrot.lane.b32.xlu2 %v4041_v31, %s2964_s19  ;;  %vm6231_vm11 = vmmov %vm6229_vm15 }
 0x23e   : > { %6223 = vst [vmem:[#allocation22_spill] sm:$0xff] %v4091_v35  ;;  %2738 = vrot.lane.b32.xlu1 %v3977_v16, %s6224_s11  ;;  %vm6233_vm0 = vmmov %vm6231_vm11 }
 0x23f   : > { %v2564_v48 = vpop.permute.xlu0 %2563  ;;  %v2584_v49 = vpop.permute.xlu2 %2583  ;;  %vm6235_vm3 = vmmov %vm6233_vm0 }
 0x240   : > { %v2566_v53 = vunpack.i.h.bf16 %v2564_v48  ;;  %v2565_v17 = vunpack.i.l.bf16 %v2564_v48  ;;  %v2586_v38 = vunpack.i.h.bf16 %v2584_v49  ;;  %v2585_v24 = vunpack.i.l.bf16 %v2584_v49  ;;  %v4101_v44 = vpop.permute.xlu1 %2533 }
 0x241   : > { %v5985_v40 = vunpack.i.h.bf16 %v4101_v44  ;;  %v5984_v8 = vunpack.i.l.bf16 %v4101_v44 }
 0x242   : > { %v4109_v16 = vsel %vm347_vm13, %v5995_v56, %v2566_v53  ;;  %v4115_v6 = vsel %vm347_vm13, %v5988_v36, %v2565_v17 }
 0x243   : > { %6225 = vst [vmem:[#allocation23_spill] sm:$0xff] %v4109_v16  ;;  %v4121_v27 = vsel %vm373_vm2, %v5985_v40, %v2586_v38  ;;  %v4127_v2 = vsel %vm373_vm2, %v5984_v8, %v2585_v24 }
 0x244   : > { %6226 = vst [vmem:[#allocation24_spill] sm:$0xff] %v4115_v6 }
 0x245   : > { %2783 = vrot.lane.b32.xlu0 %v4027_v62, %s6211_s26  ;;  %2778 = vrot.lane.b32.xlu2 %v4027_v62, %s6208_s29 }
 0x246   : > { %2753 = vrot.lane.b32.xlu1 %v4041_v31, %s2958_s24 }
 0x247   : > { %v4135_v59 = vpop.permute.xlu0 %2588  ;;  %v4137_v21 = vpop.permute.xlu2 %2618 }
 0x248   : > { %v5994_v3 = vunpack.i.h.bf16 %v4135_v59  ;;  %v5993_v48 = vunpack.i.l.bf16 %v4135_v59  ;;  %v2544_v49 = vpop.permute.xlu1 %2543 }
 0x249   : > { %v2546_v8 = vunpack.i.h.bf16 %v2544_v49  ;;  %v2545_v40 = vunpack.i.l.bf16 %v2544_v49 }
 0x24a   : > { %v4149_v7 = vsel %vm373_vm2, %v2586_v38, %v5994_v3  ;;  %v4155_v61 = vsel %vm373_vm2, %v2585_v24, %v5993_v48 }
 0x24b   : > { %6227 = vst [vmem:[#allocation25_spill] sm:$0xff] %v4149_v7  ;;  %v4161_v36 = vsel %vm6229_vm15, %v5990_v23, %v2546_v8  ;;  %v4167_v49 = vsel %vm6231_vm11, %v5989_v13, %v2545_v40  ;;  %v4173_v38 = vsel %vm6233_vm0, %v2546_v8, %v5991_v51  ;;  %v4179_v24 = vsel %vm6235_vm3, %v2545_v40, %v5992_v45 }
 0x24c   : > { %6228 = vst [vmem:[#allocation26_spill] sm:$0xff] %v4155_v61  ;;  %v6002_v8 = vunpack.i.h.bf16 %v4021_v1  ;;  %v6006_v51 = vunpack.i.l.bf16 %v4021_v1  ;;  %vm6243_vm15 = vcmp.lt.s32.totalorder %v3119_v18, 39  ;;  %v6020_v61 = vunpack.i.h.bf16 %v4137_v21 }
 0x24d   : > { %6230 = vst [vmem:[#allocation27_spill] sm:$0xff] %v4161_v36  ;;  %2788 = vrot.lane.b32.xlu0 %v3964_v22, %s6208_s29  ;;  %2798 = vrot.lane.b32.xlu2 %v4027_v62, %s6207_s30  ;;  %vm6245_vm11 = vmmov %vm6243_vm15 }
 0x24e   : > { %6232 = vst [vmem:[#allocation28_spill] sm:$0xff] %v4167_v49  ;;  %2768 = vrot.lane.b32.xlu1 %v4041_v31, %s6237_s12  ;;  %vm6247_vm0 = vmmov %vm6245_vm11 }
 0x24f   : > { %6234 = vst [vmem:[#allocation29_spill] sm:$0xff] %v4173_v38  ;;  %v4187_v13 = vpop.permute.xlu0 %2593  ;;  %v4189_v23 = vpop.permute.xlu2 %2623  ;;  %vm6250_vm3 = vmmov %vm6247_vm0 }
 0x250   : > { %6236 = vst [vmem:[#allocation30_spill] sm:$0xff] %v4179_v24  ;;  %v6005_v40 = vunpack.i.h.bf16 %v4187_v13  ;;  %v6003_v45 = vunpack.i.l.bf16 %v4187_v13  ;;  %v4195_v48 = vpop.permute.xlu1 %2568  ;;  %v6244_v24 = vunpack.i.l.bf16 %v4049_v33  ;;  %v6266_v7 = vunpack.i.h.bf16 %v4187_v13 }
 0x251   : > { %v6004_v3 = vunpack.i.h.bf16 %v4195_v48  ;;  %v6239_v37 = vunpack.i.l.bf16 %v4195_v48 }
 0x252   : > { %v4205_v46 = vsel %vm386_vm1, %v6002_v8, %v6005_v40  ;;  %v4213_v9 = vsel %vm386_vm1, %v6006_v51, %v6003_v45 }
 0x253   : > { %v4219_v56 = vsel %vm347_vm13, %v2566_v53, %v6004_v3  ;;  %v4225_v8 = vsel %vm347_vm13, %v2565_v17, %v6239_v37  ;;  %v6011_v37 = vunpack.i.h.bf16 %v4049_v33 }
 0x254   : > { %6238 = vst [vmem:[#allocation31_spill] sm:$0xff] %v4219_v56 }
 0x255   : > { %6240 = vst [vmem:[#allocation32_spill] sm:$0xff] %v4225_v8  ;;  %2813 = vrot.lane.b32.xlu0 %v4041_v31, %s2962_s9  ;;  %2803 = vrot.lane.b32.xlu2 %v4027_v62, %s6224_s11 }
 0x256   : > { %2793 = vrot.lane.b32.xlu1 %v4041_v31, %s6241_s13 }
 0x257   : > { %v4235_v3 = vpop.permute.xlu0 %2598  ;;  %v4237_v40 = vpop.permute.xlu2 %2648 }
 0x258   : > { %6242 = vst [vmem:[#allocation33_spill] sm:$0xff] %v4237_v40  ;;  %v6010_v51 = vunpack.i.h.bf16 %v4235_v3  ;;  %v6009_v32 = vunpack.i.l.bf16 %v4235_v3  ;;  %v2574_v62 = vpop.permute.xlu1 %2573 }
 0x259   : > { %v2576_v45 = vunpack.i.h.bf16 %v2574_v62  ;;  %v2575_v10 = vunpack.i.l.bf16 %v2574_v62  ;;  %v6246_v62 = vunpack.i.h.bf16 %v4061_v26 }
 0x25a   : > { %v1406_v53 = vsel %vm607_vm12, %v6009_v32, %v6010_v51  ;;  %v6254_v51 = vunpack.i.l.bf16 %v3996_v41 }
 0x25b   : > { %1544 = vmatpush.msra.mxu2 %v1406_v53  ;;  %v4255_v17 = vsel %vm6243_vm15, %v6011_v37, %v2576_v45  ;;  %v4261_v38 = vsel %vm6245_vm11, %v6244_v24, %v2575_v10  ;;  %v4267_v4 = vsel %vm6247_vm0, %v2576_v45, %v6246_v62  ;;  %v6249_v53 = vunpack.i.l.bf16 %v4061_v26 }
 0x25c   : > { %6248 = vst [vmem:[#allocation34_spill] sm:$0xff] %v4267_v4  ;;  %v6253_v24 = vunpack.i.h.bf16 %v3996_v41  ;;  %v6018_v4 = vunpack.i.l.bf16 %v3992_v14  ;;  %vm6257_vm15 = vcmp.lt.s32.totalorder %v3119_v18, 110  ;;  %vm6270_vm0 = vcmp.lt.s32.totalorder %v3119_v18, 126 }
 0x25d   : > { %v4273_v32 = vsel %vm6250_vm3, %v2575_v10, %v6249_v53  ;;  %2828 = vrot.lane.b32.xlu0 %v4041_v31, %s6252_s14  ;;  %2808 = vrot.lane.b32.xlu2 %v3964_v22, %s6211_s26  ;;  %vm6259_vm11 = vmmov %vm6257_vm15 }
 0x25e   : > { %6251 = vst [vmem:[#allocation35_spill] sm:$0xff] %v4273_v32  ;;  %v1405_v45 = vsel %vm607_vm12, %v6254_v51, %v6253_v24  ;;  %2818 = vrot.lane.b32.xlu1 %v4041_v31, %s6202_s18  ;;  %v6017_v32 = vunpack.i.l.bf16 %v3957_v25  ;;  %vm6274_vm3 = vmmov %vm6270_vm0 }
 0x25f   : > { %1545 = vmatpush.msra.mxu2 %v1405_v45  ;;  %v4287_v62 = vpop.permute.xlu0 %2603  ;;  %v4289_v10 = vpop.permute.xlu2 %2673 }
 0x260   : > { %6255 = vst [vmem:[#allocation36_spill] sm:$0xff] %v4287_v62  ;;  %v6014_v53 = vunpack.i.h.bf16 %v4287_v62  ;;  %v6013_v37 = vunpack.i.l.bf16 %v4287_v62  ;;  %v4293_v8 = vpop.permute.xlu1 %2608  ;;  %v6293_v6 = vunpack.i.l.bf16 %v4289_v10 }
 0x261   : > { %6256 = vst [vmem:[#allocation37_spill] sm:$0xff] %v4289_v10  ;;  %v6016_v51 = vunpack.i.h.bf16 %v4293_v8  ;;  %v6015_v24 = vunpack.i.l.bf16 %v4293_v8 }
 0x262   : > { %v1214_v55 = vsel %vm6257_vm15, %v6013_v37, %v6014_v53  ;;  %v6258_v37 = vunpack.i.h.bf16 %v3957_v25  ;;  %vm6282_vm15 = vcmp.lt.s32.totalorder %v3119_v18, 127 }
 0x263   : > { %1515 = vmatpush.msra.mxu1 %v1214_v55  ;;  %v1382_v45 = vsel %vm594_vm14, %v6015_v24, %v6016_v51 }
 0x264   : > { %1546 = vmatpush.msra.mxu2 %v1382_v45  ;;  %v1213_v55 = vsel %vm6259_vm11, %v6017_v32, %v6258_v37  ;;  %v6260_v45 = vunpack.i.h.bf16 %v3992_v14  ;;  %vm6285_vm11 = vmmov %vm6282_vm15 }
 0x265   : > { %2843 = vrot.lane.b32.xlu0 %v3964_v22, %s6224_s11  ;;  %2823 = vrot.lane.b32.xlu2 %v3964_v22, %s6207_s30 }
 0x266   : > { %1516 = vmatpush.msra.mxu1 %v1213_v55  ;;  %2833 = vrot.lane.b32.xlu1 %v4041_v31, %s2966_s22  ;;  %v1381_v22 = vsel %vm594_vm14, %v6018_v4, %v6260_v45  ;;  %v6261_v55 = vunpack.i.l.bf16 %v4137_v21 }
 0x267   : > { %1547 = vmatpush.msra.mxu2 %v1381_v22  ;;  %v4337_v37 = vpop.permute.xlu0 %2628  ;;  %v4339_v32 = vpop.permute.xlu2 %2678 }
 0x268   : > { %v1358_v56 = vsel %vm581_vm5, %v6261_v55, %v6020_v61  ;;  %v6022_v53 = vunpack.i.h.bf16 %v4337_v37  ;;  %v6021_v45 = vunpack.i.l.bf16 %v4337_v37  ;;  %v6023_v51 = vunpack.i.l.bf16 %v4339_v32  ;;  %v4351_v22 = vpop.permute.xlu1 %2613 }
 0x269   : > { %1548 = vmatpush.msra.mxu2 %v1358_v56  ;;  %v6262_v55 = vunpack.i.h.bf16 %v4011_v34  ;;  %v6263_v61 = vunpack.i.l.bf16 %v4011_v34  ;;  %v6265_v49 = vunpack.i.h.bf16 %v4339_v32 }
 0x26a   : > { %v1334_v24 = vsel %vm568_vm6, %v6021_v45, %v6022_v53  ;;  %v4375_v56 = vsel %vm386_vm1, %v6023_v51, %v6264_v42  ;;  %v6269_v45 = vunpack.i.l.bf16 %v4351_v22  ;;  %v4393_v42 = vpack.i.bf16 %v3971_v0, %v4005_v20 }
 0x26b   : > { %v1357_v4 = vsel %vm581_vm5, %v6263_v61, %v6262_v55  ;;  %v4383_v61 = vsel %vm386_vm1, %v6266_v7, %v6265_v49  ;;  %v6268_v55 = vunpack.i.h.bf16 %v4351_v22  ;;  %v6272_v49 = vunpack.i.h.bf16 %v4007_v12 }
 0x26c   : > { %6267 = vst [vmem:[#allocation38_spill] sm:$0xff] %v4383_v61  ;;  %1549 = vmatpush.msra.mxu2 %v1357_v4 }
 0x26d   : > { %v1190_v53 = vsel %vm6270_vm0, %v6269_v45, %v6268_v55  ;;  %2858 = vrot.lane.b32.xlu0 %v4393_v42, %s2965_s21  ;;  %2838 = vrot.lane.b32.xlu2 %v4041_v31, %s6205_s17  ;;  %v6273_v45 = vunpack.i.l.bf16 %v4007_v12  ;;  %v6276_v55 = vunpack.i.l.bf16 %v3973_v47  ;;  %vm6294_vm0 = vcmp.lt.s32.totalorder %v3119_v18, 21 }
 0x26e   : > { %1517 = vmatpush.msra.mxu1 %v1190_v53  ;;  %1550 = vmatpush.msra.mxu2 %v1334_v24  ;;  %v6275_v24 = vunpack.i.h.bf16 %v3973_v47 }
 0x26f   : > { %2848 = vrot.lane.b32.xlu1 %v4041_v31, %s6271_s16  ;;  %v1189_v53 = vsel %vm6274_vm3, %v6273_v45, %v6272_v49  ;;  %v4417_v7 = vpop.permute.xlu0 %2633  ;;  %v4419_v36 = vpop.permute.xlu2 %2693  ;;  %v6280_v49 = vunpack.i.h.bf16 %v4189_v23  ;;  %v6281_v45 = vunpack.i.l.bf16 %v4189_v23 }
 0x270   : > { %v1333_v4 = vsel %vm568_vm6, %v6276_v55, %v6275_v24  ;;  %1518 = vmatpush.msra.mxu1 %v1189_v53  ;;  %6277 = vst [vmem:[#allocation39_spill] sm:$0xff] %v4417_v7  ;;  %v6026_v51 = vunpack.i.h.bf16 %v4417_v7  ;;  %v4423_v20 = vpop.permute.xlu1 %2643  ;;  %v6027_v53 = vunpack.i.l.bf16 %v4037_v58  ;;  %v6283_v24 = vunpack.i.h.bf16 %v4023_v28 }
 0x271   : > { %1551 = vmatpush.msra.mxu2 %v1333_v4  ;;  %6278 = vst [vmem:[#allocation40_spill] sm:$0xff] %v4419_v36  ;;  %v1166_v61 = vsel %vm6282_vm15, %v6281_v45, %v6280_v49  ;;  %v6028_v4 = vunpack.i.h.bf16 %v4037_v58  ;;  %v6284_v55 = vunpack.i.l.bf16 %v4023_v28  ;;  %v6286_v35 = vunpack.i.l.bf16 %v4417_v7 }
 0x272   : > { %6279 = vst [vmem:[#allocation41_spill] sm:$0xff] %v4423_v20  ;;  %1519 = vmatpush.msra.mxu1 %v1166_v61  ;;  %vm6315_vm15 = vcmp.lt.s32.totalorder %v3119_v18, 110 }
 0x273   : > { %v1165_v0 = vsel %vm6285_vm11, %v6284_v55, %v6283_v24  ;;  %v1310_v52 = vsel %vm555_vm7, %v6286_v35, %v6026_v51  ;;  %v1309_v35 = vsel %vm555_vm7, %v6027_v53, %v6028_v4  ;;  %v6289_v53 = vunpack.i.l.bf16 %v4009_v15  ;;  %vm6318_vm11 = vmmov %vm6315_vm15 }
 0x274   : > { %1520 = vmatpush.msra.mxu1 %v1165_v0  ;;  %1552 = vmatpush.msra.mxu2 %v1310_v52  ;;  %v6288_v0 = vunpack.i.h.bf16 %v4009_v15  ;;  %v6290_v4 = vunpack.i.h.bf16 %v4195_v48 }
 0x275   : > { %2873 = vrot.lane.b32.xlu0 %v4393_v42, %s2957_s23  ;;  %2853 = vrot.lane.b32.xlu2 %v4393_v42, %s2959_s25  ;;  %s6684_s23 = sshll.u32 %s6686_s28, 5 }
 0x276   : > { %1521 = vmatpush.msra.mxu1 %v3904_v54  ;;  %1553 = vmatpush.msra.mxu2 %v1309_v35 }
 0x277   : > { %2863 = vrot.lane.b32.xlu1 %v4393_v42, %s2958_s24  ;;  %v4461_v52 = vpop.permute.xlu0 %2638  ;;  %v2709_v61 = vpop.permute.xlu2 %2708 }
 0x278   : > { %1522 = vmatpush.msra.mxu1 %v3884_v50  ;;  %6287 = vst [vmem:[#allocation42_spill] sm:$0xff] %v4461_v52  ;;  %v6030_v49 = vunpack.i.h.bf16 %v4461_v52  ;;  %v6029_v45 = vunpack.i.l.bf16 %v4461_v52  ;;  %v2711_v24 = vunpack.i.h.bf16 %v2709_v61  ;;  %v2710_v55 = vunpack.i.l.bf16 %v2709_v61  ;;  %v4465_v51 = vpop.permute.xlu1 %2658 }
 0x27a   : > { %v1286_v35 = vsel %vm542_vm4, %v6029_v45, %v6030_v49  ;;  %v4481_v61 = vsel %vm347_vm13, %v2711_v24, %v6288_v0  ;;  %v4487_v54 = vsel %vm347_vm13, %v2710_v55, %v6289_v53  ;;  %v4493_v50 = vsel %vm347_vm13, %v6290_v4, %v2711_v24 }
 0x27b   : > { %6291 = vst [vmem:[#allocation43_spill] sm:$0xff] %v4493_v50  ;;  %v6036_v45 = vunpack.i.h.bf16 %v4051_v39  ;;  %v6035_v49 = vunpack.i.l.bf16 %v4051_v39  ;;  %1554 = vmatpush.msra.mxu2 %v1286_v35  ;;  %v6292_v0 = vunpack.i.h.bf16 %v4465_v51  ;;  %v6295_v53 = vunpack.i.l.bf16 %v4195_v48 }
 0x27c   : > { %v6297_v4 = vunpack.i.h.bf16 %v3984_v43  ;;  %v6298_v24 = vunpack.i.l.bf16 %v3984_v43  ;;  %v6300_v48 = vunpack.i.l.bf16 %v4423_v20  ;;  %v6303_v50 = vunpack.i.l.bf16 %v4237_v40 }
 0x27d   : > { %v4503_v15 = vsel %vm6294_vm0, %v6293_v6, %v6292_v0  ;;  %v4509_v16 = vsel %vm347_vm13, %v6295_v53, %v2710_v55  ;;  %2888 = vrot.lane.b32.xlu0 %v4041_v31, %s6208_s29  ;;  %2868 = vrot.lane.b32.xlu2 %v4393_v42, %s2967_s20  ;;  %v6299_v6 = vunpack.i.h.bf16 %v4423_v20  ;;  %vm6305_vm13 = vcmp.lt.s32.totalorder %v3119_v18, 86 }
 0x27e   : > { %6296 = vst [vmem:[#allocation44_spill] sm:$0xff] %v4509_v16  ;;  %v1285_v35 = vsel %vm542_vm4, %v6298_v24, %v6297_v4  ;;  %v1261_v16 = vsel %vm529_vm9, %v6035_v49, %v6036_v45  ;;  %v6306_v39 = vunpack.i.h.bf16 %v4019_v5  ;;  %vm6310_vm3 = vmmov %vm6305_vm13  ;;  %vm6321_vm0 = vcmp.lt.s32.totalorder %v3119_v18, 41 }
 0x27f   : > { %1555 = vmatpush.msra.mxu2 %v1285_v35  ;;  %2878 = vrot.lane.b32.xlu1 %v4393_v42, %s6237_s12  ;;  %v1262_v55 = vsel %vm529_vm9, %v6300_v48, %v6299_v6  ;;  %v4532_v24 = vpop.permute.xlu0 %2653  ;;  %v4534_v35 = vpop.permute.xlu2 %2728  ;;  %v6335_v43 = vunpack.i.l.bf16 %v4035_v60 }
 0x280   : > { %6301 = vst [vmem:[#allocation45_spill] sm:$0xff] %v4532_v24  ;;  %v6039_v6 = vunpack.i.h.bf16 %v4532_v24  ;;  %v6038_v48 = vunpack.i.l.bf16 %v4532_v24  ;;  %v6037_v53 = vunpack.i.h.bf16 %v4534_v35  ;;  %v2730_v0 = vunpack.i.l.bf16 %v4534_v35  ;;  %v4546_v4 = vpop.permute.xlu1 %2663 }
 0x281   : > { %6302 = vst [vmem:[#allocation46_spill] sm:$0xff] %v4534_v35  ;;  %1556 = vmatpush.msra.mxu2 %v1262_v55  ;;  %v6040_v55 = vunpack.i.h.bf16 %v4546_v4 }
 0x282   : > { %v1048_v49 = vsel %vm412_vm10, %v6037_v53, %v2730_v0  ;;  %v1238_v45 = vsel %vm516_vm8, %v6038_v48, %v6039_v6  ;;  %v4566_v20 = vsel %vm412_vm10, %v2730_v0, %v6303_v50  ;;  %v6307_v48 = vunpack.i.l.bf16 %v4019_v5 }
 0x283   : > { %1557 = vmatpush.msra.mxu2 %v1261_v16  ;;  %1486 = vmatpush.msra.mxu3 %v1048_v49  ;;  %v6304_v16 = vunpack.i.l.bf16 %v4546_v4  ;;  %v6308_v49 = vunpack.i.h.bf16 %v4033_v30  ;;  %v6046_v0 = vunpack.i.h.bf16 %v4237_v40  ;;  %v6317_v5 = vunpack.i.h.bf16 %v3957_v25 }
 0x284   : > { %v1237_v6 = vsel %vm516_vm8, %v6307_v48, %v6306_v39 }
 0x285   : > { %1558 = vmatpush.msra.mxu2 %v1238_v45  ;;  %v1430_v53 = vsel %vm6305_vm13, %v6304_v16, %v6040_v55  ;;  %2903 = vrot.lane.b32.xlu0 %v4393_v42, %s2962_s9  ;;  %v6309_v45 = vunpack.i.l.bf16 %v4033_v30  ;;  %vm6324_vm13 = vmmov %vm6321_vm0 }
 0x286   : > { %1587 = vmatpush.msra.mxu0 %v1430_v53  ;;  %2883 = vrot.lane.b32.xlu2 %v4393_v42, %s2964_s19 }
 0x287   : > { %1559 = vmatpush.msra.mxu2 %v1237_v6  ;;  %2893 = vrot.lane.b32.xlu1 %v4393_v42, %s6241_s13  ;;  %v1429_v50 = vsel %vm6310_vm3, %v6309_v45, %v6308_v49  ;;  %v4593_v39 = vpop.permute.xlu0 %2668  ;;  %v4595_v53 = vpop.permute.xlu2 %2743  ;;  %v6314_v45 = vunpack.i.h.bf16 %v4287_v62  ;;  %vm6332_vm3 = vcmp.lt.s32.totalorder %v3119_v18, 42 }
 0x288   : > { %1588 = vmatpush.msra.mxu0 %v1429_v50  ;;  %6311 = vst [vmem:[#allocation47_spill] sm:$0xff] %v4593_v39  ;;  %v6045_v6 = vunpack.i.h.bf16 %v4593_v39  ;;  %v2670_v48 = vunpack.i.l.bf16 %v4593_v39  ;;  %v6047_v55 = vunpack.i.l.bf16 %v4595_v53  ;;  %v4601_v35 = vpop.permute.xlu1 %2683  ;;  %v6316_v39 = vunpack.i.h.bf16 %v4595_v53 }
 0x289   : > { %6312 = vst [vmem:[#allocation48_spill] sm:$0xff] %v4595_v53 }
 0x28a   : > { %6313 = vst [vmem:[#allocation49_spill] sm:$0xff] %v4601_v35  ;;  %v1047_v49 = vsel %vm412_vm10, %v6045_v6, %v2670_v48  ;;  %v1212_v50 = vsel %vm6315_vm15, %v6314_v45, %v6047_v55  ;;  %v4617_v16 = vsel %vm412_vm10, %v2670_v48, %v6046_v0  ;;  %v1211_v6 = vsel %vm6318_vm11, %v6317_v5, %v6316_v39  ;;  %v1452_v39 = vld [vmem:[%s5888_s5 + $0x18] sm:$0xff]  ;;  %vm6336_vm15 = vmmov %vm6332_vm3 }
 0x28b   : > { %1487 = vmatpush.msra.mxu3 %v1047_v49  ;;  %1631 = vmatpush.msrb.mxu0 %v1212_v50  ;;  %v6323_v55 = vunpack.i.l.bf16 %v4059_v63  ;;  %vm6339_vm11 = vcmp.lt.s32.totalorder %v3119_v18, 1 }
 0x28d   : > { %2918 = vrot.lane.b32.xlu0 %v4393_v42, %s2966_s22  ;;  %1632 = vmatpush.msrb.mxu0 %v1211_v6  ;;  %v6320_v6 = vunpack.i.h.bf16 %v4059_v63 }
 0x28e   : > { %2898 = vrot.lane.b32.xlu2 %v4041_v31, %s6211_s26  ;;  %s305_s26 = scalar_lea.vmem %s5891_s8, %s6684_s23 }
 0x28f   : > { %2908 = vrot.lane.b32.xlu1 %v4041_v31, %s6207_s30  ;;  %v4631_v48 = vpop.permute.xlu0 %2688  ;;  %v4633_v49 = vpop.permute.xlu2 %2758 }
 0x290   : > { %6319 = vst [vmem:[#allocation50_spill] sm:$0xff] %v4631_v48  ;;  %v4635_v45 = vpop.permute.xlu1 %2703 }
 0x291   : > { %v6052_v50 = vunpack.i.h.bf16 %v4635_v45  ;;  %v6055_v5 = vunpack.i.l.bf16 %v4635_v45 }
 0x293   : > { %v4648_v0 = vsel %vm6321_vm0, %v6320_v6, %v6052_v50  ;;  %v4656_v25 = vsel %vm6324_vm13, %v6323_v55, %v6055_v5  ;;  %v1449_v55 = vld [vmem:[%s5888_s5] sm:$0xff]  ;;  %v6328_v6 = vunpack.i.l.bf16 %v4135_v59  ;;  %vm6341_vm0 = vcmp.lt.s32.totalorder %v3119_v18, 39  ;;  %vm6351_vm13 = vmmov %vm6339_vm11 }
 0x294   : > { %6322 = vst [vmem:[#allocation51_spill] sm:$0xff] %v4648_v0 }
 0x295   : > { %6325 = vst [vmem:[#allocation52_spill] sm:$0xff] %v4656_v25  ;;  %1470 = vperm.xlu0 %2450, %v1452_v39   ;;  %v1451_v39 = vld [vmem:[%s5888_s5 + $0x10] sm:$0xff]  ;;  %v6331_v25 = vunpack.i.h.bf16 %v4035_v60 }
 0x296   : > { %2913 = vrot.lane.b32.xlu2 %v4393_v42, %s6252_s14 }
 0x297   : > { %2923 = vrot.lane.b32.xlu1 %v4041_v31, %s6224_s11  ;;  %v4662_v62 = vpop.permute.xlu0 %2698  ;;  %v4664_v40 = vpop.permute.xlu2 %2773  ;;  %v6326_v31 = vunpack.i.h.bf16 %v4135_v59 }
 0x298   : > { %v2719_v63 = vpop.permute.xlu1 %2718  ;;  %v6334_v30 = vunpack.i.l.bf16 %v4662_v62 }
 0x299   : > { %v2721_v0 = vunpack.i.h.bf16 %v2719_v63  ;;  %v2720_v24 = vunpack.i.l.bf16 %v2719_v63  ;;  %v6330_v63 = vunpack.i.h.bf16 %v4662_v62 }
 0x29b   : > { %v4678_v5 = vsel %vm373_vm2, %v6326_v31, %v2721_v0  ;;  %v4684_v50 = vsel %vm373_vm2, %v6328_v6, %v2720_v24  ;;  %v4692_v53 = vsel %vm6332_vm3, %v6331_v25, %v6330_v63  ;;  %v4700_v31 = vsel %vm6336_vm15, %v6335_v43, %v6334_v30  ;;  %vm6353_vm3 = vmmov %vm6341_vm0 }
 0x29c   : > { %6327 = vst [vmem:[#allocation53_spill] sm:$0xff] %v4678_v5  ;;  %vm6356_vm15 = vcmp.lt.s32.totalorder %v3119_v18, 21 }
 0x29d   : > { %6329 = vst [vmem:[#allocation54_spill] sm:$0xff] %v4684_v50  ;;  %1455 = vperm.xlu0 %2450, %v1449_v55  }
 0x29e   : > { %6333 = vst [vmem:[#allocation55_spill] sm:$0xff] %v4692_v53  ;;  %2928 = vrot.lane.b32.xlu2 %v4393_v42, %s6271_s16 }
 0x29f   : > { %6337 = vst [vmem:[#allocation56_spill] sm:$0xff] %v4700_v31  ;;  %1465 = vperm.xlu1 %2451, %v1451_v39   ;;  %v2714_v50 = vpop.permute.xlu0 %2713  ;;  %v4706_v25 = vpop.permute.xlu2 %2778  ;;  %v6340_v39 = vunpack.i.h.bf16 %v4061_v26  ;;  %v6345_v31 = vunpack.i.h.bf16 %v4339_v32 }
 0x2a0   : > { %6338 = vst [vmem:[#allocation57_spill] sm:$0xff] %v4706_v25  ;;  %v2716_v63 = vunpack.i.h.bf16 %v2714_v50  ;;  %v2715_v53 = vunpack.i.l.bf16 %v2714_v50  ;;  %v6062_v60 = vunpack.i.h.bf16 %v4706_v25  ;;  %v6063_v5 = vunpack.i.l.bf16 %v4706_v25  ;;  %v2724_v43 = vpop.permute.xlu1 %2723  ;;  %v1983_v50 = vld [vmem:[%s5890_s7] sm:$0xff] }
 0x2a1   : > { %v2726_v30 = vunpack.i.h.bf16 %v2724_v43  ;;  %v2725_v55 = vunpack.i.l.bf16 %v2724_v43  ;;  %v6343_v43 = vunpack.i.l.bf16 %v4187_v13  ;;  %v6350_v13 = vunpack.i.h.bf16 %v4601_v35 }
 0x2a2   : > { %v1144_v42 = vsel %vm6339_vm11, %v6062_v60, %v6063_v5  ;;  %v4720_v59 = vsel %vm6341_vm0, %v6340_v39, %v2716_v63  ;;  %v6347_v39 = vunpack.i.l.bf16 %v4339_v32  ;;  %v6349_v5 = vunpack.i.l.bf16 %v4601_v35  ;;  %vm6358_vm11 = vmmov %vm6356_vm15 }
 0x2a3   : > { %6342 = vst [vmem:[#allocation58_spill] sm:$0xff] %v4720_v59  ;;  %1523 = vmatpush.msra.mxu1 %v1144_v42  ;;  %v4729_v6 = vsel %vm386_vm1, %v6343_v43, %v2725_v55  ;;  %v4735_v60 = vsel %vm386_vm1, %v6345_v31, %v2726_v30  ;;  %v6352_v59 = vunpack.i.l.bf16 %v4061_v26  ;;  %v4767_v26 = vld [vmem:[%s5887_s4 + $0x10] sm:$0xff]  ;;  %vm1473_vm0 = vcmask 130048  }
 0x2a4   : > { %6344 = vst [vmem:[#allocation59_spill] sm:$0xff] %v4729_v6  ;;  %v4741_v42 = vsel %vm386_vm1, %v2725_v55, %v6347_v39  ;;  %v1143_v43 = vsel %vm6351_vm13, %v6350_v13, %v6349_v5  ;;  %v6066_v39 = vunpack.i.h.bf16 %v4289_v10  ;;  %1560 = vmatmul.f32.vlgmr.msra.gmra.mxu2 %v4767_v26  ;;  %vm6371_vm13 = vcmp.lt.s32.totalorder %v3119_v18, 2 }
 0x2a5   : > { %6346 = vst [vmem:[#allocation60_spill] sm:$0xff] %v4735_v60  ;;  %v4753_v6 = vsel %vm6353_vm3, %v6352_v59, %v2715_v53  ;;  %1524 = vmatpush.msra.mxu1 %v1143_v43  ;;  %v6360_v60 = vunpack.i.h.bf16 %v4021_v1 }
 0x2a6   : > { %6348 = vst [vmem:[#allocation61_spill] sm:$0xff] %v4741_v42 }
 0x2a7   : > { %6354 = vst [vmem:[#allocation62_spill] sm:$0xff] %v4753_v6  ;;  %1986 = vperm.xlu1 %2451, %v1983_v50   ;;  %v4755_v32 = vpop.permute.xlu0 %2748  ;;  %v4757_v31 = vpop.permute.xlu2 %2798  ;;  %v6357_v50 = vunpack.i.l.bf16 %v4289_v10  ;;  %v6368_v10 = vunpack.i.l.bf16 %v4049_v33 }
 0x2a8   : > { %6355 = vst [vmem:[#allocation63_spill] sm:$0xff] %v4757_v31  ;;  %v4759_v55 = vpop.permute.xlu1 %2733 }
 0x2a9   : > { %v6064_v42 = vunpack.i.h.bf16 %v4759_v55  ;;  %v6065_v5 = vunpack.i.l.bf16 %v4759_v55  ;;  %v1023_v13 = vsel %vm6358_vm11, %v6066_v39, %v6357_v50  ;;  %v6362_v50 = vunpack.i.h.bf16 %v4101_v44 }
 0x2ab   : > { %v1024_v59 = vsel %vm6356_vm15, %v6064_v42, %v6065_v5  ;;  %v1000_v42 = vsel %vm386_vm1, %v2726_v30, %v6360_v60  ;;  %v976_v1 = vsel %vm373_vm2, %v2721_v0, %v6362_v50  ;;  %v4807_v60 = vld [vmem:[%s5887_s4 + $0x30] sm:$0xff]  ;;  %v6364_v30 = vunpack.i.l.bf16 %v4101_v44  ;;  %vm6367_vm1 = vmmov %vm6353_vm3 }
 0x2ac   : > { %1488 = vmatpush.msra.mxu3 %v1024_v59  ;;  %v4793_v59 = vld [vmem:[%s5887_s4 + $0x18] sm:$0xff]  ;;  %6363 = vst [vmem:[#allocation66_spill] sm:$0xff] %v4807_v60  ;;  %1563 = vmatmul.f32.gmra.mxu2 %v4807_v60  ;;  %v6366_v0 = vunpack.i.h.bf16 %v4049_v33  ;;  %vm6373_vm3 = vcmp.lt.s32.totalorder %v3119_v18, 126  ;;  %vm6376_vm15 = vmmov %vm6371_vm13 }
 0x2ad   : > { %2153 = vmatmul.msk.f32.vlgmr.msra.gmra.mxu0 %vm1473_vm0, %v4793_v59  ;;  %vm6379_vm11 = vmmov %vm6373_vm3 }
 0x2ae   : > { %1489 = vmatpush.msra.mxu3 %v1023_v13  ;;  %v952_v50 = vsel %vm6367_vm1, %v2716_v63, %v6366_v0  ;;  %v4852_v63 = vld [vmem:[%s5887_s4 + $0x50] sm:$0xff] }
 0x2af   : > { %v4782_v43 = vpop.permute.xlu0 %2763  ;;  %v4784_v6 = vpop.permute.xlu2 %2803 }
 0x2b0   : > { %6359 = vst [vmem:[#allocation64_spill] sm:$0xff] %v4784_v6  ;;  %v4795_v5 = vpop.permute.xlu1 %2738  ;;  %1490 = vmatpush.msra.mxu3 %v1000_v42  ;;  %v975_v42 = vsel %vm373_vm2, %v2720_v24, %v6364_v30  ;;  %vm6369_vm2 = vmmov %vm6367_vm1  ;;  %vm6382_vm1 = vcmp.lt.s32.totalorder %v3119_v18, 18 }
 0x2b1   : > { %6361 = vst [vmem:[#allocation65_spill] sm:$0xff] %v4795_v5  ;;  %v951_v44 = vsel %vm6369_vm2, %v2715_v53, %v6368_v10  ;;  %v6372_v10 = vunpack.i.h.bf16 %v4351_v22  ;;  %vm6385_vm2 = vcmp.lt.s32.totalorder %v3119_v18, 41 }
 0x2b2   : > { %1491 = vmatpush.msra.mxu3 %v4375_v56 }
 0x2b4   : > { %1492 = vmatpush.msra.mxu3 %v976_v1  ;;  %v4825_v1 = vld [vmem:[%s5887_s4 + $0x38] sm:$0xff]  ;;  %1566 = vmatmul.f32.gmra.mxu2 %v4852_v63 }
 0x2b5   : > { %2154 = vmatmul.msk.f32.gmra.mxu0 %vm1473_vm0, %v4825_v1 }
 0x2b6   : > { %1493 = vmatpush.msra.mxu3 %v975_v42 }
 0x2b7   : > { %v4814_v56 = vpop.permute.xlu0 %2783  ;;  %v4816_v13 = vpop.permute.xlu2 %2808 }
 0x2b8   : > { %6365 = vst [vmem:[#allocation67_spill] sm:$0xff] %v4814_v56  ;;  %v6070_v30 = vunpack.i.l.bf16 %v4814_v56  ;;  %v4831_v42 = vpop.permute.xlu1 %2753  ;;  %1494 = vmatpush.msra.mxu3 %v952_v50  ;;  %v6370_v50 = vunpack.i.h.bf16 %v4814_v56 }
 0x2b9   : > { %v6071_v0 = vunpack.i.l.bf16 %v4831_v42  ;;  %v6377_v24 = vunpack.i.h.bf16 %v4831_v42 }
 0x2ba   : > { %1495 = vmatpush.msra.mxu3 %v951_v44  ;;  %v1120_v60 = vsel %vm6371_vm13, %v6370_v50, %v6070_v30  ;;  %v6374_v50 = vunpack.i.l.bf16 %v4631_v48  ;;  %v6375_v30 = vunpack.i.h.bf16 %v4631_v48  ;;  %vm6388_vm13 = vcmp.lt.s32.totalorder %v3119_v18, 127 }
 0x2bb   : > { %1525 = vmatpush.msra.mxu1 %v1120_v60  ;;  %v1188_v53 = vsel %vm6373_vm3, %v6372_v10, %v6071_v0  ;;  %v6378_v10 = vunpack.i.h.bf16 %v4007_v12  ;;  %v6389_v12 = vunpack.i.l.bf16 %v4419_v36  ;;  %vm6391_vm3 = vmmov %vm6382_vm1 }
 0x2bc   : > { %1496 = vmatpush.msra.mxu3 %v4481_v61  ;;  %1633 = vmatpush.msrb.mxu0 %v1188_v53  ;;  %v1119_v60 = vsel %vm6376_vm15, %v6375_v30, %v6374_v50  ;;  %v6380_v30 = vunpack.i.l.bf16 %v4757_v31  ;;  %v6381_v50 = vunpack.i.h.bf16 %v4757_v31  ;;  %vm6394_vm15 = vmmov %vm6385_vm2 }
 0x2bd   : > { %1526 = vmatpush.msra.mxu1 %v1119_v60  ;;  %v1187_v0 = vsel %vm6379_vm11, %v6378_v10, %v6377_v24  ;;  %v6383_v24 = vunpack.i.h.bf16 %v4065_v19  ;;  %v6384_v10 = vunpack.i.h.bf16 %v4635_v45  ;;  %vm6397_vm11 = vmmov %vm6388_vm13 }
 0x2be   : > { %1497 = vmatpush.msra.mxu3 %v4487_v54  ;;  %1634 = vmatpush.msrb.mxu0 %v1187_v0  ;;  %v1096_v60 = vsel %vm6382_vm1, %v6381_v50, %v6380_v30  ;;  %v6386_v54 = vunpack.i.l.bf16 %v4782_v43  ;;  %v6387_v0 = vunpack.i.h.bf16 %v4189_v23  ;;  %v6074_v50 = vunpack.i.l.bf16 %v4795_v5 }
 0x2bf   : > { %v4887_v33 = vpop.permute.xlu0 %2788  ;;  %v4889_v44 = vpop.permute.xlu2 %2823  ;;  %v904_v61 = vsel %vm6385_vm2, %v6384_v10, %v6383_v24  ;;  %1527 = vmatpush.msra.mxu1 %v1096_v60  ;;  %v6390_v24 = vunpack.i.h.bf16 %v4419_v36  ;;  %v4916_v10 = vld [vmem:[%s5887_s4 + $0x58] sm:$0xff]  ;;  %v6396_v30 = vunpack.i.h.bf16 %v4023_v28  ;;  %vm6400_vm1 = vcmp.lt.s32.totalorder %v3119_v18, 19 }
 0x2c0   : > { %v1164_v53 = vsel %vm6388_vm13, %v6387_v0, %v6386_v54  ;;  %v4905_v39 = vpop.permute.xlu1 %2768  ;;  %1498 = vmatpush.msra.mxu3 %v904_v61  ;;  %v6392_v54 = vunpack.i.l.bf16 %v4065_v19  ;;  %v6393_v0 = vunpack.i.l.bf16 %v4635_v45  ;;  %2155 = vmatmul.msk.f32.gmra.mxu0 %vm1473_vm0, %v4916_v10  ;;  %v6398_v19 = vunpack.i.l.bf16 %v4784_v6  ;;  %vm6405_vm13 = vmmov %vm6400_vm1 }
 0x2c1   : > { %1635 = vmatpush.msrb.mxu0 %v1164_v53  ;;  %v1095_v60 = vsel %vm6391_vm3, %v6390_v24, %v6389_v12  ;;  %v6395_v53 = vunpack.i.h.bf16 %v4782_v43  ;;  %v6073_v24 = vunpack.i.l.bf16 %v4755_v32  ;;  %v6399_v45 = vunpack.i.h.bf16 %v4784_v6 }
 0x2c2   : > { %v903_v61 = vsel %vm6394_vm15, %v6393_v0, %v6392_v54  ;;  %1528 = vmatpush.msra.mxu1 %v1095_v60  ;;  %v6075_v54 = vunpack.i.l.bf16 %v4887_v33  ;;  %v6401_v0 = vunpack.i.h.bf16 %v3994_v11  ;;  %vm6403_vm2 = vcmp.lt.s32.totalorder %v3119_v18, 42 }
 0x2c3   : > { %v1163_v12 = vsel %vm6397_vm11, %v6396_v30, %v6395_v53  ;;  %1499 = vmatpush.msra.mxu3 %v903_v61  ;;  %v1072_v60 = vsel %vm6400_vm1, %v6399_v45, %v6398_v19  ;;  %v6402_v30 = vunpack.i.h.bf16 %v4662_v62  ;;  %v4949_v61 = vld [vmem:[%s5887_s4 + $0x70] sm:$0xff]  ;;  %v6404_v19 = vunpack.i.h.bf16 %v4795_v5  ;;  %vm6408_vm3 = vmmov %vm6403_vm2 }
 0x2c4   : > { %1636 = vmatpush.msrb.mxu0 %v1163_v12  ;;  %1529 = vmatpush.msra.mxu1 %v1072_v60  ;;  %v4962_v60 = vld [vmem:[%s5887_s4] sm:$0xff]  ;;  %v6077_v12 = vunpack.i.l.bf16 %v4633_v49  ;;  %vm6411_vm15 = vcmp.lt.s32.totalorder %v3119_v18, 1  ;;  %vm6418_vm1 = vcmp.lt.s32.totalorder %v3119_v18, 21  ;;  %v6494_v28 = vunpack.i.l.bf16 %v4465_v51 }
 0x2c5   : > { %v880_v53 = vsel %vm6403_vm2, %v6402_v30, %v6401_v0  ;;  %v1071_v45 = vsel %vm6405_vm13, %v6404_v19, %v6074_v50  ;;  %v6076_v0 = vunpack.i.h.bf16 %v4887_v33  ;;  %v6406_v30 = vunpack.i.l.bf16 %v3994_v11  ;;  %1569 = vmatmul.f32.gmra.mxu2 %v4949_v61  ;;  %vm6415_vm11 = vmmov %vm6411_vm15 }
 0x2c6   : > { %1500 = vmatpush.msra.mxu3 %v880_v53  ;;  %1637 = vmatpush.msrb.mxu0 %v3932_v57  ;;  %v6407_v53 = vunpack.i.l.bf16 %v4662_v62  ;;  %v6409_v19 = vunpack.i.h.bf16 %v4235_v3  ;;  %v6078_v62 = vunpack.i.l.bf16 %v4816_v13  ;;  %vm6420_vm2 = vcmp.lt.s32.totalorder %v3119_v18, 2 }
 0x2c7   : > { %1530 = vmatpush.msra.mxu1 %v1071_v45  ;;  %v4982_v45 = vpop.permute.xlu0 %2813  ;;  %vm6425_vm13 = vmmov %vm6420_vm2 }
 0x2c8   : > { %v879_v57 = vsel %vm6408_vm3, %v6407_v53, %v6406_v30  ;;  %1638 = vmatpush.msrb.mxu0 %v3887_v29  ;;  %v1404_v11 = vsel %vm607_vm12, %v6409_v19, %v6073_v24  ;;  %v6410_v30 = vunpack.i.l.bf16 %v4706_v25  ;;  %v4994_v19 = vpop.permute.xlu1 %2793  ;;  %v6413_v24 = vunpack.i.h.bf16 %v3996_v41 }
 0x2c9   : > { %1501 = vmatpush.msra.mxu3 %v879_v57  ;;  %1660 = vmatpush.msrb.mxu1 %v1404_v11  ;;  %v4992_v57 = vpop.permute.xlu2 %2838  ;;  %v6412_v11 = vunpack.i.h.bf16 %v4755_v32  ;;  %vm6430_vm3 = vcmp.lt.s32.totalorder %v3119_v18, 18 }
 0x2ca   : > { %1502 = vmatmul.f32.vlgmr.msra.gmra.mxu3 %v4962_v60  ;;  %v1142_v29 = vsel %vm6411_vm15, %v6410_v30, %v6075_v54  ;;  %v5005_v30 = vld [vmem:[%s5887_s4 + $0x78] sm:$0xff]  ;;  %v6079_v54 = vunpack.i.l.bf16 %v4465_v51  ;;  %vm6435_vm15 = vmmov %vm6430_vm3 }
 0x2cb   : > { %1602 = vmatpush.msrb.mxu3 %v4566_v20  ;;  %1639 = vmatpush.msrb.mxu0 %v1142_v29  ;;  %v1403_v50 = vsel %vm607_vm12, %v6413_v24, %v6412_v11  ;;  %v6414_v29 = vunpack.i.l.bf16 %v4601_v35  ;;  %v6416_v24 = vunpack.i.h.bf16 %v4293_v8  ;;  %v6417_v20 = vunpack.i.l.bf16 %v4759_v55 }
 0x2cc   : > { %1661 = vmatpush.msrb.mxu1 %v1403_v50  ;;  %2156 = vmatmul.msk.f32.gmra.mxu0 %vm1473_vm0, %v5005_v30 }
 0x2cd   : > { %v1141_v53 = vsel %vm6415_vm11, %v6414_v29, %v6076_v0  ;;  %1603 = vmatpush.msrb.mxu3 %v4617_v16  ;;  %v1380_v50 = vsel %vm594_vm14, %v6416_v24, %v6077_v12  ;;  %v1022_v29 = vsel %vm6418_vm1, %v6417_v20, %v6079_v54  ;;  %v6419_v16 = vunpack.i.l.bf16 %v4814_v56  ;;  %v5047_v20 = vld [vmem:[%s5887_s4 + $0x20] sm:$0xff] }
 0x2ce   : > { %1640 = vmatpush.msrb.mxu0 %v1141_v53  ;;  %1662 = vmatpush.msrb.mxu1 %v1380_v50  ;;  %v6421_v24 = vunpack.i.h.bf16 %v4633_v49  ;;  %v6422_v12 = vunpack.i.h.bf16 %v3992_v14  ;;  %v5052_v50 = vld [vmem:[%s5887_s4 + $0x8] sm:$0xff]  ;;  %v6427_v54 = vunpack.i.h.bf16 %v4137_v21  ;;  %vm6444_vm11 = vcmp.lt.s32.totalorder %v3119_v18, 19 }
 0x2cf   : > { %v1118_v53 = vsel %vm6420_vm2, %v6419_v16, %v6078_v62  ;;  %1604 = vmatpush.msrb.mxu3 %v1022_v29  ;;  %v6423_v16 = vunpack.i.h.bf16 %v4816_v13  ;;  %1531 = vmatmul.f32.vlgmr.msra.gmra.mxu1 %v5052_v50  ;;  %v5072_v0 = vpop.permute.xlu0 %2828  ;;  %vm6449_vm1 = vcmp.lt.s32.totalorder %v3119_v18, 86  ;;  %vm6453_vm2 = vmmov %vm6444_vm11 }
 0x2d0   : > { %1641 = vmatpush.msrb.mxu0 %v1118_v53  ;;  %v1379_v11 = vsel %vm594_vm14, %v6422_v12, %v6421_v24  ;;  %v6424_v53 = vunpack.i.l.bf16 %v4631_v48  ;;  %v6437_v24 = vunpack.i.h.bf16 %v4337_v37  ;;  %v6446_v48 = vunpack.i.h.bf16 %v4461_v52  ;;  %v6470_v52 = vld [vmem:[#allocation22_spill] sm:$0xff] }
 0x2d1   : > { %1663 = vmatpush.msrb.mxu1 %v1379_v11  ;;  %1605 = vmatpush.msrb.mxu3 %v4503_v15  ;;  %v6426_v11 = vunpack.i.l.bf16 %v4905_v39  ;;  %v5075_v15 = vpop.permute.xlu2 %2853 }
 0x2d2   : > { %v1117_v12 = vsel %vm6425_vm13, %v6424_v53, %v6423_v16  ;;  %1505 = vmatmul.f32.gmra.mxu3 %v5047_v20  ;;  %v5077_v16 = vpop.permute.xlu1 %2818  ;;  %v6428_v53 = vunpack.i.l.bf16 %v4889_v44  ;;  %vm6461_vm13 = vmmov %vm6449_vm1  ;;  %v6466_v56 = vunpack.i.l.bf16 %v5075_v15 }
 0x2d3   : > { %1642 = vmatpush.msrb.mxu0 %v1117_v12  ;;  %v1356_v29 = vsel %vm581_vm5, %v6427_v54, %v6426_v11  ;;  %1606 = vmatpush.msrb.mxu3 %v4205_v46  ;;  %v6429_v12 = vunpack.i.l.bf16 %v4757_v31  ;;  %v6431_v54 = vunpack.i.h.bf16 %v4905_v39  ;;  %v6432_v11 = vunpack.i.h.bf16 %v4011_v34 }
 0x2d4   : > { %1664 = vmatpush.msrb.mxu1 %v1356_v29  ;;  %v6433_v29 = vunpack.i.h.bf16 %v4889_v44  ;;  %v6434_v31 = vunpack.i.l.bf16 %v4419_v36  ;;  %v6445_v36 = vunpack.i.l.bf16 %v4982_v45 }
 0x2d5   : > { %v1094_v62 = vsel %vm6430_vm3, %v6429_v12, %v6428_v53  ;;  %v1355_v46 = vsel %vm581_vm5, %v6432_v11, %v6431_v54  ;;  %1607 = vmatpush.msrb.mxu3 %v4213_v9  ;;  %v6081_v12 = vunpack.i.l.bf16 %v4994_v19  ;;  %v5110_v9 = vld [vmem:[%s5887_s4 + $0x40] sm:$0xff]  ;;  %vm6469_vm3 = vcmp.lt.s32.totalorder %v3119_v18, 110 }
 0x2d6   : > { %1643 = vmatpush.msrb.mxu0 %v1094_v62  ;;  %1665 = vmatpush.msrb.mxu1 %v1355_v46  ;;  %v1093_v53 = vsel %vm6435_vm15, %v6434_v31, %v6433_v29  ;;  %v6436_v62 = vunpack.i.l.bf16 %v4664_v40  ;;  %v5115_v31 = vld [vmem:[%s5887_s4 + $0x28] sm:$0xff]  ;;  %v6438_v46 = vunpack.i.h.bf16 %v4664_v40  ;;  %v6439_v29 = vunpack.i.h.bf16 %v3973_v47  ;;  %vm6476_vm15 = vmmov %vm6469_vm3 }
 0x2d7   : > { %1608 = vmatpush.msrb.mxu3 %v4121_v27  ;;  %1534 = vmatmul.f32.gmra.mxu1 %v5115_v31 }
 0x2d8   : > { %1644 = vmatpush.msrb.mxu0 %v1093_v53  ;;  %v1332_v54 = vsel %vm568_vm6, %v6437_v24, %v6436_v62  ;;  %v1331_v27 = vsel %vm568_vm6, %v6439_v29, %v6438_v46  ;;  %v6440_v53 = vunpack.i.h.bf16 %v4417_v7  ;;  %v6443_v24 = vunpack.i.l.bf16 %v4784_v6 }
 0x2d9   : > { %1666 = vmatpush.msrb.mxu1 %v1332_v54  ;;  %1609 = vmatpush.msrb.mxu3 %v4127_v2  ;;  %v5134_v54 = vpop.permute.xlu0 %2843  ;;  %v6452_v6 = vunpack.i.l.bf16 %v4795_v5  ;;  %v6457_v2 = vld [vmem:[#allocation24_spill] sm:$0xff] }
 0x2da   : > { %1508 = vmatmul.f32.gmra.mxu3 %v5110_v9  ;;  %v1308_v62 = vsel %vm555_vm7, %v6440_v53, %v6081_v12  ;;  %v6084_v46 = vunpack.i.l.bf16 %v5134_v54  ;;  %v5139_v29 = vpop.permute.xlu1 %2833  ;;  %v6441_v53 = vunpack.i.h.bf16 %v4994_v19  ;;  %v6442_v12 = vunpack.i.h.bf16 %v4037_v58 }
 0x2db   : > { %1667 = vmatpush.msrb.mxu1 %v1331_v27  ;;  %1610 = vmatpush.msrb.mxu3 %v4255_v17  ;;  %v1450_v27 = vld [vmem:[%s5888_s5 + $0x8] sm:$0xff] }
 0x2dc   : > { %v1307_v17 = vsel %vm555_vm7, %v6442_v12, %v6441_v53  ;;  %1460 = vperm.xlu2 %2932, %v1450_v27   ;;  %v1070_v11 = vsel %vm6444_vm11, %v6443_v24, %v6084_v46  ;;  %v1284_v12 = vsel %vm542_vm4, %v6446_v48, %v6445_v36  ;;  %v6447_v27 = vunpack.i.l.bf16 %v5139_v29  ;;  %v6450_v24 = vld [vmem:[#allocation23_spill] sm:$0xff]  ;;  %v5186_v48 = vld [vmem:[%s5887_s4 + $0x60] sm:$0xff] }
 0x2dd   : > { %1668 = vmatpush.msrb.mxu1 %v1308_v62  ;;  %v5152_v62 = vpop.permute.xlu2 %2868  ;;  %1611 = vmatpush.msrb.mxu3 %v4261_v38  ;;  %v6448_v38 = vunpack.i.h.bf16 %v4546_v4  ;;  %v6451_v46 = vunpack.i.h.bf16 %v5134_v54  ;;  %vm6495_vm11 = vcmp.lt.s32.totalorder %v3119_v18, 21 }
 0x2de   : > { %1645 = vmatpush.msrb.mxu0 %v1070_v11  ;;  %v6454_v11 = vunpack.i.h.bf16 %v4982_v45  ;;  %v6102_v7 = vunpack.i.h.bf16 %v5152_v62 }
 0x2df   : > { %1669 = vmatpush.msrb.mxu1 %v1307_v17  ;;  %v1428_v53 = vsel %vm6449_vm1, %v6448_v38, %v6447_v27  ;;  %1612 = vmatpush.msrb.mxu3 %v6450_v24  ;;  %v1069_v36 = vsel %vm6453_vm2, %v6452_v6, %v6451_v46  ;;  %v6455_v27 = vld [vmem:[#allocation11_spill] sm:$0xff]  ;;  %v6459_v17 = vld [vmem:[#allocation16_spill] sm:$0xff]  ;;  %v6463_v46 = vunpack.i.l.bf16 %v5072_v0  ;;  %vm6497_vm1 = vcmp.lt.s32.totalorder %v3119_v18, 126  ;;  %vm6502_vm2 = vmmov %vm6495_vm11 }
 0x2e0   : > { %1703 = vmatpush.msrb.mxu2 %v1428_v53  ;;  %v6456_v38 = vunpack.i.h.bf16 %v6455_v27  ;;  %1646 = vmatpush.msrb.mxu0 %v1069_v36  ;;  %v5197_v24 = vld [vmem:[%s5887_s4 + $0x48] sm:$0xff]  ;;  %v6458_v53 = vunpack.i.h.bf16 %v5139_v29  ;;  %v6460_v5 = vunpack.i.h.bf16 %v6459_v17  ;;  %v6467_v27 = vld [vmem:[#allocation48_spill] sm:$0xff] }
 0x2e1   : > { %1670 = vmatpush.msrb.mxu1 %v1284_v12  ;;  %1613 = vmatpush.msrb.mxu3 %v6457_v2  ;;  %v5209_v36 = vpop.permute.xlu0 %2858  ;;  %v6464_v2 = vld [vmem:[#allocation41_spill] sm:$0xff] }
 0x2e2   : > { %v1283_v12 = vsel %vm542_vm4, %v6456_v38, %v6454_v11  ;;  %v1427_v11 = vsel %vm6461_vm13, %v6460_v5, %v6458_v53  ;;  %1511 = vmatmul.f32.gmra.mxu3 %v5186_v48  ;;  %1537 = vmatmul.f32.gmra.mxu1 %v5197_v24  ;;  %v6462_v38 = vld [vmem:[#allocation21_spill] sm:$0xff]  ;;  %v6468_v5 = vunpack.i.l.bf16 %v6467_v27  ;;  %v6491_v47 = vunpack.i.h.bf16 %v5209_v36  ;;  %vm6504_vm13 = vmmov %vm6497_vm1 }
 0x2e3   : > { %1671 = vmatpush.msrb.mxu1 %v1283_v12  ;;  %1704 = vmatpush.msrb.mxu2 %v1427_v11  ;;  %v6465_v12 = vunpack.i.h.bf16 %v6464_v2  ;;  %v5225_v11 = vpop.permute.xlu1 %2848  ;;  %v6479_v2 = vld [vmem:[#allocation27_spill] sm:$0xff] }
 0x2e4   : > { %1614 = vmatpush.msrb.mxu3 %v6462_v38  ;;  %v1210_v53 = vsel %vm6469_vm3, %v6468_v5, %v6466_v56  ;;  %v6092_v38 = vunpack.i.l.bf16 %v5225_v11  ;;  %v6474_v56 = vunpack.i.h.bf16 %v5075_v15  ;;  %2157 = vmatmul.msk.f32.vlgmr.msrb.gmra.mxu2 %vm1473_vm0, %v4793_v59  ;;  %vm6508_vm3 = vcmp.lt.s32.totalorder %v3119_v18, 127 }
 0x2e5   : > { %v1260_v6 = vsel %vm529_vm9, %v6465_v12, %v6463_v46  ;;  %1747 = vmatpush.msra.mxu0 %v1210_v53  ;;  %v6471_v46 = vunpack.i.h.bf16 %v5072_v0  ;;  %v6472_v12 = vld [vmem:[#allocation18_spill] sm:$0xff] }
 0x2e6   : > { %1672 = vmatpush.msrb.mxu1 %v1260_v6  ;;  %1615 = vmatpush.msrb.mxu3 %v6470_v52  ;;  %v6473_v25 = vunpack.i.h.bf16 %v6472_v12  ;;  %v6475_v6 = vunpack.i.h.bf16 %v6467_v27  ;;  %v6477_v52 = vld [vmem:[#allocation45_spill] sm:$0xff]  ;;  %v5253_v27 = vpop.permute.xlu2 %2883 }
 0x2e7   : > { %v6478_v53 = vunpack.i.h.bf16 %v6477_v52  ;;  %1647 = vmatmul.f32.vlgmr.msrb.gmra.mxu0 %v5052_v50 }
 0x2e8   : > { %v1259_v58 = vsel %vm529_vm9, %v6473_v25, %v6471_v46  ;;  %v1209_v5 = vsel %vm6476_vm15, %v6475_v6, %v6474_v56  ;;  %1616 = vmatpush.msrb.mxu3 %v6479_v2  ;;  %v6485_v46 = vld [vmem:[#allocation33_spill] sm:$0xff]  ;;  %vm6511_vm15 = vmmov %vm6508_vm3 }
 0x2e9   : > { %1673 = vmatpush.msrb.mxu1 %v1259_v58  ;;  %1748 = vmatpush.msra.mxu0 %v1209_v5  ;;  %v1236_v35 = vsel %vm516_vm8, %v6478_v53, %v6092_v38  ;;  %v5260_v58 = vld [vmem:[%s5887_s4 + $0x68] sm:$0xff]  ;;  %v6480_v5 = vld [vmem:[#allocation28_spill] sm:$0xff]  ;;  %v6481_v53 = vunpack.i.h.bf16 %v5225_v11  ;;  %v6482_v38 = vld [vmem:[#allocation14_spill] sm:$0xff]  ;;  %v6486_v52 = vunpack.i.l.bf16 %v6485_v46  ;;  %v5277_v56 = vpop.permute.xlu0 %2873 }
 0x2ea   : > { %1617 = vmatpush.msrb.mxu3 %v6480_v5  ;;  %v6483_v25 = vunpack.i.h.bf16 %v6482_v38  ;;  %1540 = vmatmul.f32.gmra.mxu1 %v5260_v58 }
 0x2eb   : > { %1674 = vmatpush.msrb.mxu1 %v1236_v35  ;;  %v6484_v35 = vunpack.i.l.bf16 %v5077_v16  ;;  %1618 = vmatmul.f32.vlgmr.msrb.gmra.mxu3 %v4962_v60 }
 0x2ec   : > { %v1235_v2 = vsel %vm516_vm8, %v6483_v25, %v6481_v53  ;;  %v6487_v25 = vunpack.i.l.bf16 %v5209_v36  ;;  %v6488_v53 = vunpack.i.l.bf16 %v4755_v32  ;;  %2158 = vmatmul.msk.f32.gmra.mxu2 %vm1473_vm0, %v4825_v1 }
 0x2ed   : > { %v1044_v12 = vsel %vm412_vm10, %v6486_v52, %v6484_v35  ;;  %1675 = vmatpush.msrb.mxu1 %v1235_v2  ;;  %v5289_v52 = vpop.permute.xlu1 %2863  ;;  %v6490_v2 = vunpack.i.h.bf16 %v6485_v46  ;;  %v6493_v46 = vunpack.i.l.bf16 %v4992_v57 }
 0x2ee   : > { %1718 = vmatpush.msra.mxu3 %v1044_v12  ;;  %v1402_v38 = vsel %vm607_vm12, %v6488_v53, %v6487_v25  ;;  %v6489_v12 = vunpack.i.h.bf16 %v5077_v16  ;;  %v6099_v5 = vunpack.i.h.bf16 %v5289_v52  ;;  %v6096_v6 = vunpack.i.l.bf16 %v5289_v52 }
 0x2ef   : > { %1776 = vmatpush.msra.mxu1 %v1402_v38  ;;  %v6492_v25 = vunpack.i.h.bf16 %v4755_v32  ;;  %v1020_v38 = vsel %vm6495_vm11, %v6494_v28, %v6493_v46  ;;  %v6496_v32 = vunpack.i.l.bf16 %v4831_v42  ;;  %v6501_v46 = vunpack.i.h.bf16 %v4465_v51  ;;  %1650 = vmatmul.f32.gmra.mxu0 %v5115_v31 }
 0x2f0   : > { %v1043_v35 = vsel %vm412_vm10, %v6490_v2, %v6489_v12  ;;  %v6098_v12 = vunpack.i.l.bf16 %v5277_v56  ;;  %v6498_v2 = vunpack.i.l.bf16 %v5152_v62  ;;  %v6505_v51 = vunpack.i.h.bf16 %v4633_v49 }
 0x2f1   : > { %1719 = vmatpush.msra.mxu3 %v1043_v35  ;;  %v1401_v53 = vsel %vm607_vm12, %v6492_v25, %v6491_v47  ;;  %v1186_v47 = vsel %vm6497_vm1, %v6496_v32, %v6096_v6  ;;  %v6499_v35 = vunpack.i.l.bf16 %v4633_v49  ;;  %v6500_v25 = vunpack.i.h.bf16 %v4992_v57 }
 0x2f2   : > { %1777 = vmatpush.msra.mxu1 %v1401_v53  ;;  %1749 = vmatpush.msra.mxu0 %v1186_v47  ;;  %v6503_v32 = vunpack.i.h.bf16 %v4831_v42  ;;  %v1377_v47 = vsel %vm594_vm14, %v6505_v51, %v6102_v7  ;;  %v6507_v42 = vunpack.i.l.bf16 %v4782_v43  ;;  %vm6520_vm11 = vcmp.lt.s32.totalorder %v3119_v18, 1  ;;  %v6522_v7 = vld [vmem:[#allocation35_spill] sm:$0xff] }
 0x2f3   : > { %1720 = vmatpush.msra.mxu3 %v1020_v38  ;;  %v1378_v28 = vsel %vm594_vm14, %v6499_v35, %v6498_v2  ;;  %v1019_v53 = vsel %vm6502_vm2, %v6501_v46, %v6500_v25  ;;  %v6097_v38 = vunpack.i.h.bf16 %v5277_v56  ;;  %v5340_v2 = vpop.permute.xlu2 %2898  ;;  %v6506_v35 = vld [vmem:[#allocation38_spill] sm:$0xff]  ;;  %1676 = vmatmul.f32.vlgmr.msrb.gmra.mxu1 %v4767_v26  ;;  %vm6524_vm1 = vmmov %vm6520_vm11  ;;  %vm6530_vm2 = vcmp.lt.s32.totalorder %v3119_v18, 2 }
 0x2f4   : > { %1778 = vmatpush.msra.mxu1 %v1378_v28  ;;  %v1185_v6 = vsel %vm6504_vm13, %v6503_v32, %v6099_v5  ;;  %v5349_v28 = vpop.permute.xlu0 %2888  ;;  %v1162_v25 = vsel %vm6508_vm3, %v6507_v42, %v6098_v12  ;;  %1621 = vmatmul.f32.gmra.mxu3 %v5047_v20  ;;  %v6510_v32 = vunpack.i.h.bf16 %v4782_v43  ;;  %v6513_v42 = vunpack.i.l.bf16 %v4905_v39  ;;  %v6517_v12 = vld [vmem:[#allocation6_spill] sm:$0xff]  ;;  %vm6534_vm13 = vmmov %vm6530_vm2 }
 0x2f5   : > { %1721 = vmatpush.msra.mxu3 %v1019_v53  ;;  %1750 = vmatpush.msra.mxu0 %v1185_v6  ;;  %v5358_v46 = vpop.permute.xlu1 %2878  ;;  %v6509_v53 = vld [vmem:[#allocation59_spill] sm:$0xff]  ;;  %v6104_v43 = vunpack.i.l.bf16 %v5253_v27  ;;  %v6525_v5 = vld [vmem:[#allocation66_spill] sm:$0xff]  ;;  %vm6541_vm3 = vcmp.lt.s32.totalorder %v3119_v18, 86 }
 0x2f6   : > { %1779 = vmatpush.msra.mxu1 %v1377_v47  ;;  %v6101_v49 = vunpack.i.h.bf16 %v5358_v46  ;;  %v6100_v6 = vunpack.i.l.bf16 %v5358_v46  ;;  %v1161_v51 = vsel %vm6511_vm15, %v6510_v32, %v6097_v38  ;;  %2159 = vmatmul.msk.f32.gmra.mxu2 %vm1473_vm0, %v4916_v10  ;;  %v6103_v47 = vunpack.i.l.bf16 %v5349_v28 }
 0x2f7   : > { %1722 = vmatpush.msra.mxu3 %v6506_v35  ;;  %1751 = vmatpush.msra.mxu0 %v1162_v25  ;;  %v6512_v35 = vld [vmem:[#allocation25_spill] sm:$0xff]  ;;  %v6105_v32 = vunpack.i.h.bf16 %v5349_v28  ;;  %vm6544_vm15 = vcmp.lt.s32.totalorder %v3119_v18, 18 }
 0x2f8   : > { %v1354_v25 = vsel %vm581_vm5, %v6513_v42, %v6100_v6  ;;  %v6109_v42 = vunpack.i.h.bf16 %v5253_v27  ;;  %1653 = vmatmul.f32.gmra.mxu0 %v5197_v24 }
 0x2f9   : > { %1723 = vmatpush.msra.mxu3 %v6509_v53  ;;  %1752 = vmatpush.msra.mxu0 %v1161_v51  ;;  %v6514_v53 = vld [vmem:[#allocation5_spill] sm:$0xff]  ;;  %v6515_v51 = vld [vmem:[#allocation26_spill] sm:$0xff] }
 0x2fa   : > { %1780 = vmatpush.msra.mxu1 %v1354_v25 }
 0x2fb   : > { %1724 = vmatpush.msra.mxu3 %v6512_v35  ;;  %1753 = vmatpush.msra.mxu0 %v6514_v53  ;;  %v6516_v35 = vunpack.i.h.bf16 %v4905_v39  ;;  %v6518_v53 = vld [vmem:[#allocation34_spill] sm:$0xff]  ;;  %v5403_v6 = vpop.permute.xlu2 %2913 }
 0x2fc   : > { %v5395_v25 = vpop.permute.xlu0 %2903  ;;  %1624 = vmatmul.f32.gmra.mxu3 %v5110_v9  ;;  %1679 = vmatmul.f32.gmra.mxu1 %v6525_v5 }
 0x2fd   : > { %1725 = vmatpush.msra.mxu3 %v6515_v51  ;;  %v1353_v38 = vsel %vm581_vm5, %v6516_v35, %v6101_v49  ;;  %1754 = vmatpush.msra.mxu0 %v6517_v12  ;;  %v6519_v51 = vunpack.i.l.bf16 %v4887_v33  ;;  %v5406_v35 = vpop.permute.xlu1 %2893  ;;  %v6521_v12 = vunpack.i.l.bf16 %v4664_v40 }
 0x2fe   : > { %1781 = vmatpush.msra.mxu1 %v1353_v38  ;;  %v6108_v49 = vunpack.i.l.bf16 %v5406_v35  ;;  %2160 = vmatmul.msk.f32.gmra.mxu2 %vm1473_vm0, %v5005_v30 }
 0x2ff   : > { %1726 = vmatpush.msra.mxu3 %v6518_v53  ;;  %v1140_v39 = vsel %vm6520_vm11, %v6519_v51, %v6103_v47  ;;  %v1330_v38 = vsel %vm568_vm6, %v6521_v12, %v6104_v43  ;;  %v6106_v53 = vunpack.i.h.bf16 %v5340_v2  ;;  %v6523_v51 = vunpack.i.h.bf16 %v4887_v33  ;;  %vm6552_vm11 = vmmov %vm6544_vm15 }
 0x300   : > { %1755 = vmatpush.msra.mxu0 %v1140_v39  ;;  %1782 = vmatpush.msra.mxu1 %v1330_v38  ;;  %v6107_v47 = vunpack.i.h.bf16 %v5406_v35  ;;  %v6526_v12 = vunpack.i.h.bf16 %v4664_v40  ;;  %v6527_v38 = vld [vmem:[#allocation31_spill] sm:$0xff]  ;;  %v6528_v33 = vunpack.i.l.bf16 %v5340_v2  ;;  %v6529_v43 = vunpack.i.l.bf16 %v4816_v13 }
 0x301   : > { %1727 = vmatpush.msra.mxu3 %v6522_v7  ;;  %v1139_v39 = vsel %vm6524_vm1, %v6523_v51, %v6105_v32  ;;  %v6110_v32 = vunpack.i.l.bf16 %v5395_v25  ;;  %vm6556_vm1 = vmmov %vm6541_vm3  ;;  %1656 = vmatmul.f32.gmra.mxu0 %v5260_v58 }
 0x302   : > { %1756 = vmatpush.msra.mxu0 %v1139_v39  ;;  %v1329_v7 = vsel %vm568_vm6, %v6526_v12, %v6109_v42  ;;  %v1116_v51 = vsel %vm6530_vm2, %v6529_v43, %v6528_v33  ;;  %v6531_v39 = vunpack.i.l.bf16 %v4994_v19  ;;  %v6532_v12 = vld [vmem:[#allocation32_spill] sm:$0xff]  ;;  %v6533_v43 = vunpack.i.h.bf16 %v4816_v13  ;;  %vm6561_vm2 = vmmov %vm6556_vm1 }
 0x303   : > { %1728 = vmatpush.msra.mxu3 %v6527_v38  ;;  %1783 = vmatpush.msra.mxu1 %v1329_v7  ;;  %v6111_v38 = vunpack.i.h.bf16 %v5395_v25  ;;  %v6535_v33 = vunpack.i.h.bf16 %v4994_v19  ;;  %v6537_v19 = vunpack.i.l.bf16 %v4982_v45  ;;  %v6539_v42 = vunpack.i.h.bf16 %v4982_v45 }
 0x304   : > { %v1306_v40 = vsel %vm555_vm7, %v6531_v39, %v6108_v49  ;;  %1757 = vmatpush.msra.mxu0 %v1116_v51  ;;  %v1115_v7 = vsel %vm6534_vm13, %v6533_v43, %v6106_v53  ;;  %v6536_v39 = vld [vmem:[#allocation19_spill] sm:$0xff]  ;;  %1627 = vmatmul.f32.gmra.mxu3 %v5186_v48  ;;  %v6545_v45 = vunpack.i.l.bf16 %v5072_v0  ;;  %vm6567_vm13 = vmmov %vm6556_vm1 }
 0x305   : > { %1729 = vmatpush.msra.mxu3 %v6532_v12  ;;  %1784 = vmatpush.msra.mxu1 %v1306_v40  ;;  %v1305_v51 = vsel %vm555_vm7, %v6535_v33, %v6107_v47  ;;  %v2919_v40 = vpop.permute.xlu0 %2918  ;;  %v2915_v12 = vunpack.i.l.bf16 %v5403_v6  ;;  %v5465_v43 = vpop.permute.xlu1 %2908  ;;  %v6549_v33 = vunpack.i.l.bf16 %v5077_v16 }
 0x306   : > { %1758 = vmatpush.msra.mxu0 %v1115_v7  ;;  %v2920_v13 = vunpack.i.l.bf16 %v2919_v40  ;;  %v1282_v7 = vsel %vm542_vm4, %v6537_v19, %v6110_v32  ;;  %v5477_v47 = vpop.permute.xlu2 %2928  ;;  %v2921_v49 = vunpack.i.h.bf16 %v2919_v40  ;;  %1682 = vmatmul.f32.gmra.mxu1 %v4852_v63  ;;  %v1281_v19 = vsel %vm542_vm4, %v6539_v42, %v6111_v38 }
 0x307   : > { %1730 = vmatpush.msra.mxu3 %v6536_v39  ;;  %1785 = vmatpush.msra.mxu1 %v1305_v51  ;;  %v6112_v51 = vunpack.i.l.bf16 %v5465_v43  ;;  %v6538_v39 = vld [vmem:[#allocation20_spill] sm:$0xff]  ;;  %v6540_v32 = vunpack.i.l.bf16 %v5139_v29  ;;  %v6543_v40 = vunpack.i.l.bf16 %v4889_v44  ;;  %v1258_v42 = vsel %vm529_vm9, %v6545_v45, %v2915_v12 }
 0x309   : > { %1731 = vmatpush.msra.mxu3 %v6538_v39  ;;  %1786 = vmatpush.msra.mxu1 %v1282_v7  ;;  %v1426_v39 = vsel %vm6541_vm3, %v6540_v32, %v2920_v13  ;;  %v6542_v7 = vld [vmem:[#allocation29_spill] sm:$0xff]  ;;  %v1092_v53 = vsel %vm6544_vm15, %v6543_v40, %v6112_v51  ;;  %v2930_v32 = vunpack.i.l.bf16 %v5477_v47  ;;  %v6550_v40 = vunpack.i.h.bf16 %v5465_v43 }
 0x30a   : > { %1759 = vmatpush.msra.mxu0 %v1092_v53  ;;  %1819 = vmatpush.msra.mxu2 %v1426_v39  ;;  %v6551_v51 = vunpack.i.h.bf16 %v4889_v44  ;;  %v6553_v39 = vunpack.i.h.bf16 %v5403_v6  ;;  %v6557_v44 = vld [vmem:[#allocation47_spill] sm:$0xff]  ;;  %vm6570_vm3 = vcmp.lt.s32.totalorder %v3119_v18, 19 }
 0x30b   : > { %1732 = vmatpush.msra.mxu3 %v6542_v7  ;;  %1787 = vmatpush.msra.mxu1 %v1281_v19  ;;  %v6546_v7 = vld [vmem:[#allocation30_spill] sm:$0xff] }
 0x30c   : > { %v6547_v19 = vld [vmem:[#allocation46_spill] sm:$0xff]  ;;  %v1091_v45 = vsel %vm6552_vm11, %v6551_v51, %v6550_v40  ;;  %v6558_v51 = vunpack.i.h.bf16 %v6557_v44  ;;  %vm6581_vm11 = vmmov %vm6570_vm3 }
 0x30d   : > { %1733 = vmatpush.msra.mxu3 %v6546_v7  ;;  %1788 = vmatpush.msra.mxu1 %v1258_v42  ;;  %v6548_v38 = vunpack.i.h.bf16 %v6547_v19  ;;  %v6554_v42 = vunpack.i.h.bf16 %v5072_v0  ;;  %v6555_v19 = vunpack.i.h.bf16 %v5139_v29  ;;  %v6559_v0 = vunpack.i.h.bf16 %v5077_v16 }
 0x30e   : > { %1760 = vmatpush.msra.mxu0 %v1091_v45  ;;  %1734 = vmatmul.f32.vlgmr.msra.gmra.mxu3 %v4962_v60  ;;  %v6560_v29 = vunpack.i.l.bf16 %v4546_v4  ;;  %v5540_v45 = vpop.permute.xlu1 %2923  ;;  %v6564_v4 = vunpack.i.l.bf16 %v4992_v57 }
 0x30f   : > { %v1042_v53 = vsel %vm412_vm10, %v6549_v33, %v6548_v38  ;;  %v1257_v7 = vsel %vm529_vm9, %v6554_v42, %v6553_v39  ;;  %v1425_v38 = vsel %vm6556_vm1, %v6555_v19, %v2921_v49  ;;  %v2931_v33 = vunpack.i.h.bf16 %v5477_v47  ;;  %1685 = vmatmul.f32.gmra.mxu1 %v4949_v61 }
 0x310   : > { %1834 = vmatpush.msrb.mxu3 %v1042_v53  ;;  %1789 = vmatpush.msra.mxu1 %v1257_v7  ;;  %v1041_v53 = vsel %vm412_vm10, %v6559_v0, %v6558_v51  ;;  %v1432_v40 = vsel %vm6561_vm2, %v2920_v13, %v6560_v29  ;;  %v2925_v39 = vunpack.i.l.bf16 %v5540_v45  ;;  %v6562_v42 = vunpack.i.l.bf16 %v5225_v11 }
 0x311   : > { %1820 = vmatpush.msra.mxu2 %v1425_v38  ;;  %v6563_v7 = vunpack.i.h.bf16 %v4759_v55  ;;  %vm6565_vm10 = vcmp.lt.s32.totalorder %v3119_v18, 21  ;;  %v2926_v19 = vunpack.i.h.bf16 %v5540_v45  ;;  %v6566_v38 = vunpack.i.l.bf16 %v6459_v17  ;;  %v6571_v17 = vld [vmem:[#allocation37_spill] sm:$0xff] }
 0x312   : > { %1835 = vmatpush.msrb.mxu3 %v1041_v53  ;;  %v1234_v16 = vsel %vm516_vm8, %v6562_v42, %v2930_v32  ;;  %2161 = vmatmul.msk.f32.vlgmr.msra.gmra.mxu2 %vm1473_vm0, %v4793_v59  ;;  %v6568_v55 = vunpack.i.h.bf16 %v5225_v11  ;;  %v6569_v0 = vunpack.i.l.bf16 %v5134_v54  ;;  %v6572_v29 = vunpack.i.h.bf16 %v6571_v17  ;;  %vm6574_vm15 = vmmov %vm6565_vm10  ;;  %v6589_v17 = vld [vmem:[#allocation53_spill] sm:$0xff] }
 0x313   : > { %1935 = vmatpush.msrb.mxu2 %v1432_v40  ;;  %1790 = vmatpush.msra.mxu1 %v1234_v16  ;;  %v1018_v13 = vsel %vm6565_vm10, %v6564_v4, %v6563_v7  ;;  %v1431_v44 = vsel %vm6567_vm13, %v2921_v49, %v6566_v38  ;;  %v6573_v49 = vunpack.i.h.bf16 %v4992_v57  ;;  %v6575_v11 = vunpack.i.l.bf16 %v4235_v3 }
 0x314   : > { %1836 = vmatpush.msrb.mxu3 %v1018_v13  ;;  %v1233_v51 = vsel %vm516_vm8, %v6568_v55, %v2931_v33  ;;  %v1068_v53 = vsel %vm6570_vm3, %v6569_v0, %v2925_v39  ;;  %v6576_v42 = vunpack.i.l.bf16 %v5209_v36  ;;  %v6577_v7 = vunpack.i.l.bf16 %v3996_v41  ;;  %v6579_v13 = vld [vmem:[#allocation60_spill] sm:$0xff]  ;;  %v6582_v41 = vld [vmem:[#allocation61_spill] sm:$0xff] }
 0x315   : > { %1936 = vmatpush.msrb.mxu2 %v1431_v44  ;;  %1791 = vmatpush.msra.mxu1 %v1233_v51  ;;  %v1017_v40 = vsel %vm6574_vm15, %v6573_v49, %v6572_v29  ;;  %v6578_v4 = vunpack.i.h.bf16 %v5209_v36  ;;  %v6580_v3 = vunpack.i.h.bf16 %v5134_v54  ;;  %v6583_v36 = vld [vmem:[#allocation36_spill] sm:$0xff]  ;;  %v6585_v55 = vunpack.i.l.bf16 %v5075_v15  ;;  %v6590_v29 = vld [vmem:[#allocation7_spill] sm:$0xff]  ;;  %vm6677_vm15 = vmmov %vm6581_vm11 }
 0x316   : > { %v1408_v16 = vsel %vm607_vm12, %v6576_v42, %v6575_v11  ;;  %1837 = vmatpush.msrb.mxu3 %v1017_v40  ;;  %1761 = vmatpush.msra.mxu0 %v1068_v53  ;;  %v6584_v44 = vunpack.i.l.bf16 %v6583_v36  ;;  %v6587_v0 = vunpack.i.l.bf16 %v4293_v8  ;;  %v6588_v54 = vunpack.i.l.bf16 %v5152_v62 }
 0x317   : > { %1892 = vmatpush.msrb.mxu1 %v1408_v16  ;;  %v1407_v57 = vsel %vm607_vm12, %v6578_v4, %v6577_v7  ;;  %v1067_v38 = vsel %vm6581_vm11, %v6580_v3, %v2926_v19  ;;  %1737 = vmatmul.f32.gmra.mxu3 %v5047_v20  ;;  %vm6586_vm12 = vcmp.lt.s32.totalorder %v3119_v18, 110  ;;  %v6591_v49 = vunpack.i.l.bf16 %v6590_v29  ;;  %v6596_v7 = vld [vmem:[#allocation54_spill] sm:$0xff] }
 0x318   : > { %1838 = vmatpush.msrb.mxu3 %v6579_v13  ;;  %1762 = vmatpush.msra.mxu0 %v1067_v38  ;;  %v1216_v51 = vsel %vm6586_vm12, %v6585_v55, %v6584_v44  ;;  %v1384_v53 = vsel %vm594_vm14, %v6588_v54, %v6587_v0  ;;  %v6592_v40 = vunpack.i.h.bf16 %v5075_v15  ;;  %vm6593_vm1 = vmmov %vm6586_vm12  ;;  %v6594_v8 = vunpack.i.l.bf16 %v3992_v14  ;;  %v6602_v3 = vld [vmem:[#allocation58_spill] sm:$0xff] }
 0x319   : > { %1893 = vmatpush.msrb.mxu1 %v1407_v57  ;;  %1763 = vmatmul.f32.vlgmr.msra.gmra.mxu0 %v5052_v50  ;;  %v6595_v42 = vunpack.i.h.bf16 %v5152_v62  ;;  %v6597_v4 = vunpack.i.l.bf16 %v4351_v22  ;;  %v6598_v57 = vunpack.i.l.bf16 %v5289_v52  ;;  %vm6599_vm2 = vcmp.lt.s32.totalorder %v3119_v18, 126  ;;  %v6603_v22 = vld [vmem:[#allocation13_spill] sm:$0xff]  ;;  %v6612_v54 = vld [vmem:[#allocation62_spill] sm:$0xff] }
 0x31a   : > { %1839 = vmatpush.msrb.mxu3 %v6582_v41  ;;  %1863 = vmatpush.msrb.mxu0 %v1216_v51  ;;  %v1215_v11 = vsel %vm6593_vm1, %v6592_v40, %v6591_v49  ;;  %v6600_v13 = vunpack.i.l.bf16 %v4137_v21  ;;  %v6601_v14 = vunpack.i.l.bf16 %v5358_v46  ;;  %v6604_v38 = vunpack.i.l.bf16 %v6603_v22  ;;  %v6632_v22 = vld [vmem:[#allocation9_spill] sm:$0xff] }
 0x31b   : > { %1894 = vmatpush.msrb.mxu1 %v1384_v53  ;;  %v1383_v16 = vsel %vm594_vm14, %v6595_v42, %v6594_v8  ;;  %v1192_v15 = vsel %vm6599_vm2, %v6598_v57, %v6597_v4  ;;  %2162 = vmatmul.msk.f32.gmra.mxu2 %vm1473_vm0, %v4825_v1  ;;  %v6605_v41 = vunpack.i.h.bf16 %v5289_v52  ;;  %vm6606_vm14 = vmmov %vm6599_vm2  ;;  %v6607_v21 = vunpack.i.l.bf16 %v4011_v34 }
 0x31c   : > { %1792 = vmatmul.f32.vlgmr.msra.gmra.mxu1 %v4767_v26  ;;  %1840 = vmatpush.msrb.mxu3 %v6589_v17  ;;  %v1360_v62 = vsel %vm581_vm5, %v6601_v14, %v6600_v13  ;;  %v6608_v44 = vunpack.i.h.bf16 %v5358_v46  ;;  %v6609_v51 = vunpack.i.l.bf16 %v4189_v23  ;;  %v6610_v52 = vunpack.i.l.bf16 %v5277_v56  ;;  %v6615_v17 = vld [vmem:[#allocation43_spill] sm:$0xff]  ;;  %v6629_v13 = vld [vmem:[#allocation17_spill] sm:$0xff] }
 0x31d   : > { %1864 = vmatpush.msrb.mxu0 %v1215_v11  ;;  %1895 = vmatpush.msrb.mxu1 %v1383_v16  ;;  %v1191_v36 = vsel %vm6606_vm14, %v6605_v41, %v6604_v38  ;;  %vm6611_vm10 = vcmp.lt.s32.totalorder %v3119_v18, 127  ;;  %v6613_v34 = vunpack.i.l.bf16 %v4337_v37  ;;  %v6614_v46 = vunpack.i.l.bf16 %v5253_v27  ;;  %v6616_v23 = vld [vmem:[#allocation15_spill] sm:$0xff]  ;;  %v6620_v11 = vld [vmem:[#allocation10_spill] sm:$0xff]  ;;  %v6623_v16 = vld [vmem:[#allocation44_spill] sm:$0xff] }
 0x31e   : > { %1841 = vmatpush.msrb.mxu3 %v6596_v7  ;;  %v1359_v55 = vsel %vm581_vm5, %v6608_v44, %v6607_v21  ;;  %v1168_v0 = vsel %vm6611_vm10, %v6610_v52, %v6609_v51  ;;  %v6617_v29 = vunpack.i.l.bf16 %v6616_v23  ;;  %v6618_v49 = vunpack.i.h.bf16 %v5277_v56  ;;  %vm6619_vm5 = vmmov %vm6611_vm10  ;;  %v6624_v7 = vld [vmem:[#allocation39_spill] sm:$0xff]  ;;  %v6633_v38 = vld [vmem:[#allocation57_spill] sm:$0xff] }
 0x31f   : > { %1865 = vmatpush.msrb.mxu0 %v1192_v15  ;;  %1896 = vmatpush.msrb.mxu1 %v1360_v62  ;;  %v1336_v53 = vsel %vm568_vm6, %v6614_v46, %v6613_v34  ;;  %v6621_v8 = vunpack.i.l.bf16 %v6620_v11  ;;  %v6622_v37 = vunpack.i.h.bf16 %v5253_v27  ;;  %v6625_v4 = vunpack.i.l.bf16 %v6624_v7  ;;  %v6627_v15 = vld [vmem:[#allocation12_spill] sm:$0xff]  ;;  %v6628_v27 = vld [vmem:[#allocation51_spill] sm:$0xff]  ;;  %v6656_v7 = vld [vmem:[#allocation50_spill] sm:$0xff] }
 0x320   : > { %1842 = vmatpush.msrb.mxu3 %v6602_v3  ;;  %v1167_v40 = vsel %vm6619_vm5, %v6618_v49, %v6617_v29  ;;  %v6626_v57 = vunpack.i.l.bf16 %v5406_v35  ;;  %v6630_v14 = vunpack.i.l.bf16 %v6629_v13  ;;  %v6631_v62 = vunpack.i.h.bf16 %v5406_v35  ;;  %v6637_v44 = vld [vmem:[#allocation52_spill] sm:$0xff]  ;;  %v6638_v35 = vld [vmem:[#allocation42_spill] sm:$0xff]  ;;  %v6650_v11 = vld [vmem:[#allocation67_spill] sm:$0xff] }
 0x321   : > { %1866 = vmatpush.msrb.mxu0 %v1191_v36  ;;  %1897 = vmatpush.msrb.mxu1 %v1359_v55  ;;  %v1335_v42 = vsel %vm568_vm6, %v6622_v37, %v6621_v8  ;;  %v6634_v41 = vunpack.i.h.bf16 %v6633_v38  ;;  %v6635_v36 = vunpack.i.l.bf16 %v5349_v28  ;;  %vm6636_vm6 = vcmp.lt.s32.totalorder %v3119_v18, 1 }
 0x322   : > { %1740 = vmatmul.f32.gmra.mxu3 %v5110_v9  ;;  %1766 = vmatmul.f32.gmra.mxu0 %v5115_v31  ;;  %v1312_v56 = vsel %vm555_vm7, %v6626_v57, %v6625_v4  ;;  %v1311_v3 = vsel %vm555_vm7, %v6631_v62, %v6630_v14  ;;  %v6639_v55 = vunpack.i.l.bf16 %v6638_v35  ;;  %v6640_v51 = vunpack.i.l.bf16 %v5395_v25  ;;  %vm6645_vm7 = vmmov %vm6636_vm6 }
 0x323   : > { %1843 = vmatpush.msrb.mxu3 %v6612_v54  ;;  %1867 = vmatpush.msrb.mxu0 %v1168_v0  ;;  %v1138_v21 = vsel %vm6636_vm6, %v6635_v36, %v6634_v41  ;;  %v6641_v0 = vld [vmem:[#allocation55_spill] sm:$0xff]  ;;  %v6642_v54 = vld [vmem:[#allocation49_spill] sm:$0xff]  ;;  %v6644_v46 = vunpack.i.h.bf16 %v5349_v28  ;;  %v6648_v29 = vunpack.i.h.bf16 %v5395_v25  ;;  %v6651_v8 = vunpack.i.h.bf16 %v6650_v11  ;;  %v6669_v41 = vld [vmem:[#allocation40_spill] sm:$0xff] }
 0x324   : > { %1898 = vmatpush.msrb.mxu1 %v1336_v53  ;;  %2163 = vmatmul.msk.f32.gmra.mxu2 %vm1473_vm0, %v4916_v10  ;;  %v1288_v52 = vsel %vm542_vm4, %v6640_v51, %v6639_v55  ;;  %v6643_v34 = vunpack.i.h.bf16 %v6642_v54  ;;  %v6652_v37 = vunpack.i.l.bf16 %v5340_v2  ;;  %vm6653_vm13 = vcmp.lt.s32.totalorder %v3119_v18, 2 }
 0x325   : > { %1795 = vmatmul.f32.gmra.mxu1 %v6525_v5  ;;  %1844 = vmatpush.msrb.mxu3 %v6615_v17  ;;  %v6646_v17 = vld [vmem:[#allocation11_spill] sm:$0xff]  ;;  %v6657_v4 = vunpack.i.h.bf16 %v6656_v7  ;;  %v6658_v57 = vunpack.i.h.bf16 %v5340_v2  ;;  %v6662_v13 = vunpack.i.h.bf16 %v5403_v6  ;;  %v6665_v2 = vunpack.i.l.bf16 %v5465_v43 }
 0x326   : > { %1868 = vmatpush.msrb.mxu0 %v1167_v40  ;;  %1899 = vmatpush.msrb.mxu1 %v1335_v42  ;;  %v1137_v53 = vsel %vm6645_vm7, %v6644_v46, %v6643_v34  ;;  %v6647_v23 = vunpack.i.l.bf16 %v6646_v17  ;;  %v6649_v40 = vld [vmem:[#allocation56_spill] sm:$0xff]  ;;  %v1114_v28 = vsel %vm6653_vm13, %v6652_v37, %v6651_v8  ;;  %v6654_v42 = vld [vmem:[#allocation41_spill] sm:$0xff]  ;;  %vm6666_vm3 = vcmp.lt.s32.totalorder %v3119_v18, 18 }
 0x327   : > { %1845 = vmatpush.msrb.mxu3 %v6623_v16  ;;  %v6655_v16 = vunpack.i.l.bf16 %v6654_v42  ;;  %v6671_v36 = vunpack.i.h.bf16 %v5465_v43  ;;  %v6678_v43 = vld [vmem:[#allocation65_spill] sm:$0xff]  ;;  %v1561_v18 = vpop.f32.mrf.mxu2 }
 0x328   : > { %1869 = vmatpush.msrb.mxu0 %v6627_v15  ;;  %1900 = vmatpush.msrb.mxu1 %v1312_v56  ;;  %v1287_v49 = vsel %vm542_vm4, %v6648_v29, %v6647_v23  ;;  %vm6659_vm4 = vmmov %vm6653_vm13  ;;  %v6660_v15 = vld [vmem:[#allocation18_spill] sm:$0xff] }
 0x329   : > { %1846 = vmatpush.msrb.mxu3 %v6628_v27  ;;  %v1264_v25 = vsel %vm529_vm9, %v2915_v12, %v6655_v16  ;;  %v1113_v56 = vsel %vm6659_vm4, %v6658_v57, %v6657_v4  ;;  %v6661_v27 = vunpack.i.l.bf16 %v6660_v15  ;;  %v6663_v12 = vld [vmem:[#allocation63_spill] sm:$0xff] }
 0x32a   : > { %1870 = vmatpush.msrb.mxu0 %v6632_v22  ;;  %1901 = vmatpush.msrb.mxu1 %v1311_v3  ;;  %v6664_v62 = vunpack.i.h.bf16 %v6663_v12  ;;  %v6667_v22 = vld [vmem:[#allocation45_spill] sm:$0xff] }
 0x32b   : > { %1743 = vmatmul.f32.gmra.mxu3 %v5186_v48  ;;  %1769 = vmatmul.f32.gmra.mxu0 %v5197_v24  ;;  %v1263_v14 = vsel %vm529_vm9, %v6662_v13, %v6661_v27  ;;  %v6668_v38 = vunpack.i.l.bf16 %v6667_v22  ;;  %vm6672_vm9 = vmmov %vm6666_vm3  ;;  %v6680_v13 = vld [vmem:[#allocation2_spill] sm:$0xff] }
 0x32c   : > { %1847 = vmatpush.msrb.mxu3 %v6637_v44  ;;  %1871 = vmatpush.msrb.mxu0 %v1138_v21  ;;  %v1090_v3 = vsel %vm6666_vm3, %v6665_v2, %v6664_v62  ;;  %v6673_v44 = vld [vmem:[#allocation14_spill] sm:$0xff] }
 0x32d   : > { %1902 = vmatpush.msrb.mxu1 %v1288_v52  ;;  %2164 = vmatmul.msk.f32.gmra.mxu2 %vm1473_vm0, %v5005_v30  ;;  %v1240_v6 = vsel %vm516_vm8, %v2930_v32, %v6668_v38  ;;  %v6674_v35 = vunpack.i.l.bf16 %v6673_v44  ;;  %v6675_v32 = vld [vmem:[#allocation64_spill] sm:$0xff] }
 0x32e   : > { %1798 = vmatmul.f32.gmra.mxu1 %v4852_v63  ;;  %1848 = vmatpush.msrb.mxu3 %v6641_v0  ;;  %v6676_v51 = vunpack.i.h.bf16 %v6675_v32  ;;  %v6679_v0 = vunpack.i.h.bf16 %v6678_v43 }
 0x32f   : > { %1872 = vmatpush.msrb.mxu0 %v1137_v53  ;;  %1903 = vmatpush.msrb.mxu1 %v1287_v49  ;;  %v1239_v55 = vsel %vm516_vm8, %v2931_v33, %v6674_v35  ;;  %v5820_v33 = vpop.permute.xlu1 %1465  ;;  %vm1989_vm8 = vcmask 261120  }
 0x330   : > { %1849 = vmatpush.msrb.mxu3 %v6649_v40  ;;  %v1066_v52 = vsel %vm6677_vm15, %v2925_v39, %v6676_v51  ;;  %v1065_v47 = vsel %vm6581_vm11, %v2926_v19, %v6679_v0 }
 0x331   : > { %1873 = vmatpush.msrb.mxu0 %v1114_v28  ;;  %1904 = vmatpush.msrb.mxu1 %v1264_v25 }
 0x333   : > { %1874 = vmatpush.msrb.mxu0 %v1113_v56  ;;  %1905 = vmatpush.msrb.mxu1 %v1263_v14 }
 0x334   : > { %1772 = vmatmul.f32.gmra.mxu0 %v5260_v58  ;;  %1850 = vmatmul.f32.vlgmr.msrb.gmra.mxu3 %v4962_v60  ;;  %v6670_v60 = vunpack.i.h.bf16 %v6669_v41 }
 0x335   : > { %1875 = vmatpush.msrb.mxu0 %v1090_v3  ;;  %1906 = vmatpush.msrb.mxu1 %v1240_v6 }
 0x336   : > { %1801 = vmatmul.f32.gmra.mxu1 %v4949_v61  ;;  %v1089_v21 = vsel %vm6672_vm9, %v6671_v36, %v6670_v60  ;;  %2165 = vmatmul.msk.f32.vlgmr.msrb.gmra.mxu2 %vm1473_vm0, %v4793_v59  ;;  %v1590_v59 = vpop.f32.mrf.mxu0  ;;  %v5837_v60 = vld [vmem:[%s5889_s6] sm:$0xff] }
 0x337   : > { %1876 = vmatpush.msrb.mxu0 %v1089_v21  ;;  %1907 = vmatpush.msrb.mxu1 %v1239_v55 }
 0x339   : > { %1877 = vmatpush.msrb.mxu0 %v1066_v52 }
 0x33b   : > { %1878 = vmatpush.msrb.mxu0 %v1065_v47 }
 0x33c   : > { %1853 = vmatmul.f32.gmra.mxu3 %v5047_v20  ;;  %1879 = vmatmul.f32.vlgmr.msrb.gmra.mxu0 %v5052_v50 }
 0x33e   : > { %1908 = vmatmul.f32.vlgmr.msrb.gmra.mxu1 %v4767_v26  ;;  %2166 = vmatmul.msk.f32.gmra.mxu2 %vm1473_vm0, %v4825_v1  ;;  %v1564_v1 = vpop.f32.mrf.mxu2  ;;  %v1593_v20 = vpop.f32.mrf.mxu0 }
 0x344   : > { %1856 = vmatmul.f32.gmra.mxu3 %v5110_v9  ;;  %1882 = vmatmul.f32.gmra.mxu0 %v5115_v31 }
 0x346   : > { %1911 = vmatmul.f32.gmra.mxu1 %v6525_v5  ;;  %2167 = vmatmul.msk.f32.gmra.mxu2 %vm1473_vm0, %v4916_v10  ;;  %v1567_v31 = vpop.f32.mrf.mxu2  ;;  %v5818_v5 = vpop.permute.xlu0 %1470 }
 0x34c   : > { %1859 = vmatmul.f32.gmra.mxu3 %v5186_v48  ;;  %1885 = vmatmul.f32.gmra.mxu0 %v5197_v24  ;;  %v1532_v50 = vpop.f32.mrf.mxu1  ;;  %v1596_v48 = vpop.f32.mrf.mxu0 }
 0x34d   : > { %v1503_v26 = vpop.f32.mrf.mxu3 }
 0x34e   : > { %1914 = vmatmul.f32.gmra.mxu1 %v4852_v63  ;;  %2168 = vmatmul.msk.f32.gmra.mxu2 %vm1473_vm0, %v5005_v30  ;;  %v5822_v63 = vpop.permute.xlu2 %1460  ;;  %v1570_v39 = vpop.f32.mrf.mxu2 }
 0x34f   : > { %v5826_v19 = vpop.permute.xlu0 %1455 }
 0x350   : > { %v1504_v54 = vadd.f32 %v1503_v26, %v5826_v19 }
 0x352   : > { %v1533_v23 = vadd.f32 %v1532_v50, %v1504_v54 }
 0x354   : > { %1888 = vmatmul.f32.gmra.mxu0 %v5260_v58  ;;  %v1535_v9 = vpop.f32.mrf.mxu1  ;;  %v1562_v37 = vadd.f32 %v1561_v18, %v1533_v23 }
 0x355   : > { %v1506_v10 = vpop.f32.mrf.mxu3 }
 0x356   : > { %1917 = vmatmul.f32.gmra.mxu1 %v4949_v61  ;;  %v1507_v58 = vadd.f32 %v1506_v10, %v5822_v63  ;;  %v1599_v61 = vpop.f32.mrf.mxu0  ;;  %v1591_v57 = vadd.f32 %v1590_v59, %v1562_v37 }
 0x358   : > { %v1536_v46 = vadd.f32 %v1535_v9, %v1507_v58  ;;  %v1950_v62 = vmax.f32 %v1591_v57, 0.0 }
 0x35a   : > { %v1565_v40 = vadd.f32 %v1564_v1, %v1536_v46  ;;  %v1966_v41 = vmul.f32 %v1950_v62, %v6680_v13 }
 0x35c   : > { %v1594_v25 = vadd.f32 %v1593_v20, %v1565_v40 }
 0x35d   : > { %v1509_v24 = vpop.f32.mrf.mxu3 }
 0x35e   : > { %v1510_v30 = vadd.f32 %v1509_v24, %v5820_v33  ;;  %v1954_v27 = vmax.f32 %v1594_v25, 0.0 }
 0x35f   : > { %v1538_v45 = vpop.f32.mrf.mxu1 }
 0x360   : > { %v1539_v34 = vadd.f32 %v1538_v45, %v1510_v30  ;;  %v1970_v22 = vmul.f32 %v1954_v27, %v6680_v13 }
 0x362   : > { %v1568_v29 = vadd.f32 %v1567_v31, %v1539_v34 }
 0x364   : > { %v1597_v28 = vadd.f32 %v1596_v48, %v1568_v29  ;;  %v1648_v16 = vpop.f32.mrf.mxu0 }
 0x365   : > { %v1512_v53 = vpop.f32.mrf.mxu3 }
 0x366   : > { %v1513_v17 = vadd.f32 %v1512_v53, %v5818_v5  ;;  %v1958_v56 = vmax.f32 %v1597_v28, 0.0 }
 0x367   : > { %v1541_v49 = vpop.f32.mrf.mxu1  ;;  %v1706_v8 = vpop.f32.mrf.mxu2 }
 0x368   : > { %v1542_v11 = vadd.f32 %v1541_v49, %v1513_v17  ;;  %v1974_v2 = vmul.f32 %v1958_v56, %v6680_v13  ;;  %v6681_v17 = vld [vmem:[#allocation3_spill] sm:$0xff] }
 0x36a   : > { %v1571_v42 = vadd.f32 %v1570_v39, %v1542_v11 }
 0x36c   : > { %v1600_v7 = vadd.f32 %v1599_v61, %v1571_v42  ;;  %v1651_v6 = vpop.f32.mrf.mxu0 }
 0x36e   : > { %v1619_v4 = vpop.f32.mrf.mxu3  ;;  %v1962_v15 = vmax.f32 %v1600_v7, 0.0 }
 0x36f   : > { %v1709_v3 = vpop.f32.mrf.mxu2  ;;  %v1620_v52 = vadd.f32 %v1619_v4, %v5826_v19 }
 0x370   : > { %v1978_v14 = vmul.f32 %v1962_v15, %v6680_v13  ;;  %v1677_v12 = vpop.f32.mrf.mxu1 }
 0x371   : > { %v1649_v26 = vadd.f32 %v1648_v16, %v1620_v52 }
 0x372   : > { %2005 = vmatpush.msra.mxu3 %v1978_v14 }
 0x373   : > { %v1678_v31 = vadd.f32 %v1677_v12, %v1649_v26 }
 0x374   : > { %2006 = vmatpush.msra.mxu3 %v1974_v2 }
 0x375   : > { %v1654_v55 = vpop.f32.mrf.mxu0  ;;  %v1707_v39 = vadd.f32 %v1706_v8, %v1678_v31 }
 0x376   : > { %2007 = vmatpush.msra.mxu3 %v1970_v22 }
 0x377   : > { %v1622_v38 = vpop.f32.mrf.mxu3  ;;  %v1951_v49 = vmax.f32 %v1707_v39, 0.0 }
 0x378   : > { %2008 = vmatpush.msra.mxu3 %v1966_v41  ;;  %v1623_v32 = vadd.f32 %v1622_v38, %v5822_v63 }
 0x379   : > { %v1680_v36 = vpop.f32.mrf.mxu1  ;;  %2169 = vmatmul.msk.f32.vlgmr.msra.gmra.mxu3 %vm1989_vm8, %v5837_v60  ;;  %v1712_v21 = vpop.f32.mrf.mxu2  ;;  %v1967_v28 = vmul.f32 %v1951_v49, %v6681_v17 }
 0x37a   : > { %v1652_v0 = vadd.f32 %v1651_v6, %v1623_v32 }
 0x37c   : > { %v1681_v10 = vadd.f32 %v1680_v36, %v1652_v0 }
 0x37e   : > { %v1657_v20 = vpop.f32.mrf.mxu0  ;;  %v1710_v30 = vadd.f32 %v1709_v3, %v1681_v10 }
 0x37f   : > { %v1625_v44 = vpop.f32.mrf.mxu3 }
 0x380   : > { %v1626_v35 = vadd.f32 %v1625_v44, %v5820_v33  ;;  %v1955_v53 = vmax.f32 %v1710_v30, 0.0 }
 0x381   : > { %v1715_v59 = vpop.f32.mrf.mxu2 }
 0x382   : > { %v1655_v43 = vadd.f32 %v1654_v55, %v1626_v35  ;;  %v1971_v11 = vmul.f32 %v1955_v53, %v6681_v17 }
 0x383   : > { %v1683_v51 = vpop.f32.mrf.mxu1 }
 0x384   : > { %v1684_v1 = vadd.f32 %v1683_v51, %v1655_v43 }
 0x386   : > { %v1713_v48 = vadd.f32 %v1712_v21, %v1684_v1 }
 0x387   : > { %v1628_v47 = vpop.f32.mrf.mxu3 }
 0x388   : > { %v1629_v18 = vadd.f32 %v1628_v47, %v5818_v5  ;;  %v1959_v61 = vmax.f32 %v1713_v48, 0.0 }
 0x38a   : > { %v1658_v50 = vadd.f32 %v1657_v20, %v1629_v18  ;;  %v1975_v40 = vmul.f32 %v1959_v61, %v6681_v17 }
 0x38c   : > { %v1686_v9 = vpop.f32.mrf.mxu1 }
 0x38d   : > { %v1687_v24 = vadd.f32 %v1686_v9, %v1658_v50 }
 0x38f   : > { %v1716_v45 = vadd.f32 %v1715_v59, %v1687_v24  ;;  %v6682_v59 = vld [vmem:[#allocation4_spill] sm:$0xff] }
 0x391   : > { %v1735_v58 = vpop.f32.mrf.mxu3  ;;  %v1963_v54 = vmax.f32 %v1716_v45, 0.0 }
 0x392   : > { %v1736_v27 = vadd.f32 %v1735_v58, %v5826_v19 }
 0x393   : > { %v1979_v23 = vmul.f32 %v1963_v54, %v6681_v17 }
 0x395   : > { %v1822_v46 = vpop.f32.mrf.mxu2  ;;  %2025 = vmatpush.msrb.mxu3 %v1979_v23 }
 0x396   : > { %v1764_v34 = vpop.f32.mrf.mxu0 }
 0x397   : > { %2026 = vmatpush.msrb.mxu3 %v1975_v40  ;;  %v1765_v2 = vadd.f32 %v1764_v34, %v1736_v27  ;;  %v6683_v27 = vld [vmem:[#allocation8_spill] sm:$0xff] }
 0x399   : > { %v1793_v29 = vpop.f32.mrf.mxu1  ;;  %2027 = vmatpush.msrb.mxu3 %v1971_v11 }
 0x39a   : > { %v1738_v37 = vpop.f32.mrf.mxu3  ;;  %v1794_v21 = vadd.f32 %v1793_v29, %v1765_v2  ;;  %v1987_v2 = vpop.permute.xlu1 %1986 }
 0x39b   : > { %2028 = vmatpush.msrb.mxu3 %v1967_v28  ;;  %v1739_v57 = vadd.f32 %v1738_v37, %v5822_v63 }
 0x39c   : > { %2170 = vmatmul.msk.f32.vlgmr.msrb.gmra.mxu3 %vm1989_vm8, %v5837_v60  ;;  %v1823_v52 = vadd.f32 %v1822_v46, %v1794_v21  ;;  %v2934_v21 = vld [vmem:[%s3031_s10 + $0x8] sm:$0xff] }
 0x39e   : > { %v1825_v42 = vpop.f32.mrf.mxu2  ;;  %v1952_v50 = vmax.f32 %v1823_v52, 0.0 }
 0x39f   : > { %v1767_v8 = vpop.f32.mrf.mxu0 }
 0x3a0   : > { %v1768_v14 = vadd.f32 %v1767_v8, %v1739_v57  ;;  %v1968_v48 = vmul.f32 %v1952_v50, %v6682_v59 }
 0x3a2   : > { %v1796_v16 = vpop.f32.mrf.mxu1 }
 0x3a3   : > { %v1797_v38 = vadd.f32 %v1796_v16, %v1768_v14 }
 0x3a5   : > { %v1741_v25 = vpop.f32.mrf.mxu3  ;;  %v1826_v55 = vadd.f32 %v1825_v42, %v1797_v38  ;;  %v2933_v38 = vld [vmem:[%s3031_s10] sm:$0xff] }
 0x3a6   : > { %v1742_v7 = vadd.f32 %v1741_v25, %v5820_v33 }
 0x3a7   : > { %v1828_v56 = vpop.f32.mrf.mxu2  ;;  %v1956_v18 = vmax.f32 %v1826_v55, 0.0 }
 0x3a8   : > { %v1770_v4 = vpop.f32.mrf.mxu0 }
 0x3a9   : > { %v1771_v13 = vadd.f32 %v1770_v4, %v1742_v7  ;;  %v1972_v9 = vmul.f32 %v1956_v18, %v6682_v59 }
 0x3ab   : > { %v1799_v15 = vpop.f32.mrf.mxu1 }
 0x3ac   : > { %v1800_v3 = vadd.f32 %v1799_v15, %v1771_v13 }
 0x3ae   : > { %v1744_v12 = vpop.f32.mrf.mxu3  ;;  %v1829_v44 = vadd.f32 %v1828_v56, %v1800_v3 }
 0x3af   : > { %v1745_v62 = vadd.f32 %v1744_v12, %v5818_v5 }
 0x3b0   : > { %v1831_v36 = vpop.f32.mrf.mxu2  ;;  %v1960_v43 = vmax.f32 %v1829_v44, 0.0 }
 0x3b1   : > { %v1773_v22 = vpop.f32.mrf.mxu0 }
 0x3b2   : > { %v1774_v6 = vadd.f32 %v1773_v22, %v1745_v62  ;;  %v1976_v10 = vmul.f32 %v1960_v43, %v6682_v59  ;;  %v2936_v43 = vld [vmem:[%s3031_s10 + $0x18] sm:$0xff] }
 0x3b3   : > { %v1802_v41 = vpop.f32.mrf.mxu1 }
 0x3b4   : > { %v1803_v35 = vadd.f32 %v1802_v41, %v1774_v6 }
 0x3b6   : > { %v1832_v32 = vadd.f32 %v1831_v36, %v1803_v35 }
 0x3b7   : > { %v1851_v51 = vpop.f32.mrf.mxu3 }
 0x3b8   : > { %v1964_v0 = vmax.f32 %v1832_v32, 0.0  ;;  %v1852_v53 = vadd.f32 %v1851_v51, %v5826_v19 }
 0x3b9   : > { %v1880_v47 = vpop.f32.mrf.mxu0  ;;  %v1938_v20 = vpop.f32.mrf.mxu2 }
 0x3ba   : > { %v1980_v26 = vmul.f32 %v1964_v0, %v6682_v59  ;;  %v1881_v49 = vadd.f32 %v1880_v47, %v1852_v53 }
 0x3bb   : > { %v1909_v1 = vpop.f32.mrf.mxu1 }
 0x3bc   : > { %2045 = vmatpush.msra.mxu0 %v1980_v26 }
 0x3be   : > { %2046 = vmatpush.msra.mxu0 %v1976_v10 }
 0x3bf   : > { %v1854_v31 = vpop.f32.mrf.mxu3 }
 0x3c0   : > { %2047 = vmatpush.msra.mxu0 %v1972_v9  ;;  %v1855_v54 = vadd.f32 %v1854_v31, %v5822_v63 }
 0x3c1   : > { %v1883_v24 = vpop.f32.mrf.mxu0  ;;  %v1941_v45 = vpop.f32.mrf.mxu2 }
 0x3c2   : > { %2048 = vmatpush.msra.mxu0 %v1968_v48  ;;  %v1884_v23 = vadd.f32 %v1883_v24, %v1855_v54 }
 0x3c3   : > { %v1912_v30 = vpop.f32.mrf.mxu1  ;;  %2171 = vmatmul.msk.f32.vlgmr.msra.gmra.mxu0 %vm1989_vm8, %v5837_v60 }
 0x3c4   : > { %v1913_v28 = vadd.f32 %v1912_v30, %v1884_v23 }
 0x3c6   : > { %v1942_v63 = vadd.f32 %v1941_v45, %v1913_v28 }
 0x3c7   : > { %v1857_v58 = vpop.f32.mrf.mxu3 }
 0x3c8   : > { %v1858_v39 = vadd.f32 %v1857_v58, %v5820_v33  ;;  %v1910_v33 = vadd.f32 %v1909_v1, %v1881_v49  ;;  %v1957_v15 = vmax.f32 %v1942_v63, 0.0 }
 0x3c9   : > { %v1886_v61 = vpop.f32.mrf.mxu0  ;;  %v1944_v46 = vpop.f32.mrf.mxu2 }
 0x3ca   : > { %v1887_v17 = vadd.f32 %v1886_v61, %v1858_v39  ;;  %v1939_v57 = vadd.f32 %v1938_v20, %v1910_v33  ;;  %v1973_v12 = vmul.f32 %v1957_v15, %v6683_v27 }
 0x3cb   : > { %v1915_v34 = vpop.f32.mrf.mxu1 }
 0x3cc   : > { %v1916_v40 = vadd.f32 %v1915_v34, %v1887_v17  ;;  %v1953_v14 = vmax.f32 %v1939_v57, 0.0 }
 0x3ce   : > { %v1945_v25 = vadd.f32 %v1944_v46, %v1916_v40  ;;  %v1969_v62 = vmul.f32 %v1953_v14, %v6683_v27 }
 0x3cf   : > { %v1860_v29 = vpop.f32.mrf.mxu3 }
 0x3d0   : > { %v1861_v11 = vadd.f32 %v1860_v29, %v5818_v5  ;;  %v1961_v56 = vmax.f32 %v1945_v25, 0.0 }
 0x3d1   : > { %v1889_v37 = vpop.f32.mrf.mxu0  ;;  %v1947_v16 = vpop.f32.mrf.mxu2 }
 0x3d2   : > { %v1890_v8 = vadd.f32 %v1889_v37, %v1861_v11  ;;  %v1977_v5 = vmul.f32 %v1961_v56, %v6683_v27 }
 0x3d3   : > { %v1918_v42 = vpop.f32.mrf.mxu1 }
 0x3d4   : > { %v1919_v7 = vadd.f32 %v1918_v42, %v1890_v8 }
 0x3d6   : > { %v1948_v4 = vadd.f32 %v1947_v16, %v1919_v7 }
 0x3d8   : > { %v1965_v19 = vmax.f32 %v1948_v4, 0.0 }
 0x3da   : > { %v1981_v13 = vmul.f32 %v1965_v19, %v6683_v27 }
 0x3dc   : > { %2065 = vmatpush.msra.mxu1 %v1981_v13 }
 0x3de   : > { %2066 = vmatpush.msra.mxu1 %v1977_v5 }
 0x3e0   : > { %2067 = vmatpush.msra.mxu1 %v1973_v12 }
 0x3e2   : > { %2068 = vmatpush.msra.mxu1 %v1969_v62 }
 0x3e3   : > { %2172 = vmatmul.msk.f32.vlgmr.msra.gmra.mxu1 %vm1989_vm8, %v5837_v60  ;;  %v2935_v60 = vld [vmem:[%s3031_s10 + $0x10] sm:$0xff] }
 0x3fc   : > { %v2010_v3 = vpop.f32.mrf.mxu3 }
 0x3fd   : > { %v2011_v22 = vadd.f32 %v2010_v3, %v1987_v2 }
 0x3ff   : > { %v2073_v6 = vadd.f32 %v2933_v38, %v2011_v22 }
 0x401   : > { %2077 = vst [vmem:[%s305_s26] sm:$0xff] %v2073_v6 }
 0x41f   : > { %v2030_v41 = vpop.f32.mrf.mxu3 }
 0x420   : > { %v2031_v36 = vadd.f32 %v2030_v41, %v1987_v2 }
 0x422   : > { %v2074_v44 = vadd.f32 %v2934_v21, %v2031_v36 }
 0x424   : > { %2078 = vst [vmem:[%s305_s26 + $0x8] sm:$0xff] %v2074_v44 }
 0x440   : > { %v2050_v35 = vpop.f32.mrf.mxu0 }
 0x441   : > { %v2051_v55 = vadd.f32 %v2050_v35, %v1987_v2 }
 0x443   : > { %v2075_v32 = vadd.f32 %v2935_v60, %v2051_v55 }
 0x445   : > { %2079 = vst [vmem:[%s305_s26 + $0x10] sm:$0xff] %v2075_v32 }
 0x460   : > { %v2070_v51 = vpop.f32.mrf.mxu1 }
 0x461   : > { %v2071_v52 = vadd.f32 %v2070_v51, %v1987_v2 }
 0x463   : > { %v2076_v0 = vadd.f32 %v2936_v43, %v2071_v52 }
 0x465   : > { %2080 = vst [vmem:[%s305_s26 + $0x18] sm:$0xff] %v2076_v0 }
 0x466 PF: > { %s18_s27 = sadd.s32 1, %s2943_s27  }
 0x467   : > { %p15_p4 = scmp.ge.s32.totalorder %s18_s27, 4  }
 0x469   :  { %17 = sbr.rel (!%p15_p4) target bundleno = 1 (0x1), region = 82 }

</bundles_post_ra>
